<compile_context>
chip_gen: v5e
topology: v5e:2x2
jax: 0.10.0
libtpu: 0.0.40
codegen_flags: <defaults>
</compile_context>

<pallas_src>
import math
import functools

import jax
import jax.numpy as jnp
from jax.experimental import pallas as pl
from jax.experimental.pallas import tpu as pltpu

K_CONV = 5            # Conv1d kernel size in the reference model
PAD_CONV = 2          # circular padding (= (K-1)//2)
# Safe on v5e/v6e/v7x at this config.  Re-derive against v7x's 64 MiB VMEM
# if the resident head slab (B, L, Dm) grows with the config.
VMEM_LIMIT = 32 * 1024 * 1024


def _cparams(dims):
    return pltpu.CompilerParams(dimension_semantics=dims,
                                vmem_limit_bytes=VMEM_LIMIT)


# ---------------------------------------------------------------------------
# In-kernel helpers
# ---------------------------------------------------------------------------
def _circ_conv(y, wf, cout):
    """Circular Conv1d (kernel K_CONV, pad PAD_CONV, stride 1, no bias) as one
    MXU matmul followed by K static circular shifts.

    y  : (B, T, Cin)    -- wraps circularly along T
    wf : (Cin, K*cout)  -- wf[c, k*cout + o] = w_torch[o, c, k]
    out: (B, T, cout)   -- out[b,t,o] = sum_{c,k} w[o,c,k] * y[b,(t+k-PAD)%T,c]
    """
    B, T, Cin = y.shape
    z = jnp.dot(y.reshape(B * T, Cin), wf, preferred_element_type=jnp.float32)
    z = z.reshape(B, T, K_CONV * cout)
    acc = None
    for k in range(K_CONV):
        r = (PAD_CONV - k) % T
        if r == 0:
            zk = z
        else:
            # static circular shift along the (sublane) time axis
            zk = jnp.concatenate([z[:, T - r:, :], z[:, :T - r, :]], axis=1)
        zk = zk[:, :, k * cout:(k + 1) * cout]
        acc = zk if acc is None else acc + zk
    return acc


def _norm_axis1(v):
    # torch: (x - mean) / sqrt(var(unbiased=False) + 1e-5) along dim=1
    m = jnp.mean(v, axis=1, keepdims=True)
    var = jnp.mean((v - m) * (v - m), axis=1, keepdims=True)
    return (v - m) * jax.lax.rsqrt(var + 1e-5)              # EUP rsqrt


def _softmax_axis0(s):
    # F.softmax(..., dim=-3) on a 3-D (B, L, S) tensor -> softmax over batch
    m = jnp.max(s, axis=0, keepdims=True)
    e = jnp.exp(s - m)
    return e / jnp.sum(e, axis=0, keepdims=True)            # exact division


def _graph_body(cur, conv_ref, gcn_ref, out_ref, *, step, S, bn, Dm):
    """All `bn` blocks of one head on the resident activation `cur`
    (B, L_in, Dm); stores the full (B, bn*S, Dm) layer output in one shot."""
    B = cur.shape[0]
    Sm1 = S - 1
    Ct = 3 * Dm

    convw = conv_ref[0]                                     # (CR, CC)
    w3 = convw[0:2 * Dm, 0:K_CONV * Ct]                     # fused time/block convs
    wdf = convw[2 * Dm:2 * Dm + Sm1, 0:K_CONV * Sm1]        # dim-graph conv

    gcn = gcn_ref[0]                                        # (GR, GC)
    wgt = gcn[0:Dm, 0:Dm]
    wgd = gcn[Dm:Dm + S, 0:S]
    wgb = gcn[Dm + S:2 * Dm + S, 0:Dm]
    bgt = gcn[2 * Dm + S + 0:2 * Dm + S + 1, 0:Dm]          # (1, Dm)
    bgd = gcn[2 * Dm + S + 1:2 * Dm + S + 2, 0:S]           # (1, S)
    bgb = gcn[2 * Dm + S + 2:2 * Dm + S + 3, 0:Dm]          # (1, Dm)

    inv_sqrt_d = 1.0 / math.sqrt(Dm)
    inv_sqrt_s = 1.0 / math.sqrt(Sm1)

    blocks = []
    for i in range(bn):                                     # unrolled: bn static
        st = i * step
        x1 = cur[:, st:st + S, :]                           # (B, S, Dm)
        x2 = cur[:, st + step:st + step + S, :]             # (B, S, Dm)

        # --- fused TimeGraph / BlockGraph convolutions (one MXU matmul) ------
        p = _circ_conv(jnp.concatenate([x1, x2], axis=-1), w3, Ct)   # (B,S,3Dm)
        pt = _norm_axis1(p[:, :, 0:Dm])
        p1 = _norm_axis1(p[:, :, Dm:2 * Dm])
        p2 = _norm_axis1(p[:, :, 2 * Dm:3 * Dm])
        tg = _softmax_axis0(jnp.einsum('ble,bse->bls', pt, pt,
                                       preferred_element_type=jnp.float32) * inv_sqrt_d)
        bg = _softmax_axis0(jnp.einsum('ble,bse->bls', p1, p2,
                                       preferred_element_type=jnp.float32) * inv_sqrt_d)

        # --- DimGenerateGraph (diff on sublane axis, then transpose) ---------
        dt = x1[:, 1:, :] - x1[:, :-1, :]                   # (B, S-1, Dm)
        zd = _norm_axis1(_circ_conv(jnp.swapaxes(dt, 1, 2), wdf, Sm1))  # (B,Dm,S-1)
        dg = _softmax_axis0(jnp.einsum('ble,bse->bls', zd, zd,
                                       preferred_element_type=jnp.float32) * inv_sqrt_s)

        # --- GCN_Block --------------------------------------------------------
        sup_b = jnp.dot(x1.reshape(B * S, Dm), wgb,
                        preferred_element_type=jnp.float32).reshape(B, S, Dm)
        gcn_b = jnp.einsum('bsl,ble->bse', bg, sup_b,
                           preferred_element_type=jnp.float32) + bgb
        block_vec = jnp.maximum(gcn_b, 0.0) + x1            # (B, S, Dm)

        # --- GCN_Dim (works in (B, Dm, S) layout) -----------------------------
        bv_t = jnp.swapaxes(block_vec, 1, 2)                # (B, Dm, S)
        sup_d = jnp.dot(bv_t.reshape(B * Dm, S), wgd,
                        preferred_element_type=jnp.float32).reshape(B, Dm, S)
        gcn_d = jnp.einsum('bsl,ble->bse', dg, sup_d,
                           preferred_element_type=jnp.float32) + bgd
        tdv = jnp.swapaxes(jnp.maximum(gcn_d, 0.0), 1, 2) + block_vec

        # --- GCN_Time -----------------------------------------------------------
        sup_t = jnp.dot(tdv.reshape(B * S, Dm), wgt,
                        preferred_element_type=jnp.float32).reshape(B, S, Dm)
        gcn_t = jnp.einsum('bsl,ble->bse', tg, sup_t,
                           preferred_element_type=jnp.float32) + bgt
        blocks.append(jnp.maximum(gcn_t, 0.0) + tdv)

    # One contiguous store per head (replaces per-block 8-lane stores).
    out_ref[0] = jnp.concatenate(blocks, axis=1).astype(out_ref.dtype)


# ---------------------------------------------------------------------------
# Layer kernels (grid = (head,), "parallel")
# ---------------------------------------------------------------------------
def _block_layer0_kernel(x_ref, ew_ref, eb_ref, conv_ref, gcn_ref, out_ref,
                         *, step, S, bn, Dm):
    # Per-head embedding Linear + ReLU fused in (dropout = eval identity).
    x = x_ref[...]                                          # (B, L, C)
    B, L, C = x.shape
    emb = jnp.dot(x.reshape(B * L, C), ew_ref[0],
                  preferred_element_type=jnp.float32) + eb_ref[0]
    cur = jnp.maximum(emb, 0.0).reshape(B, L, Dm)
    _graph_body(cur, conv_ref, gcn_ref, out_ref, step=step, S=S, bn=bn, Dm=Dm)


def _block_layerN_kernel(x_ref, conv_ref, gcn_ref, out_ref, *, step, S, bn, Dm):
    _graph_body(x_ref[0], conv_ref, gcn_ref, out_ref, step=step, S=S, bn=bn, Dm=Dm)


def block_layer_first(x, ew, eb, conv, gcnb, *, bn, step, S, Dm):
    B, L, C = x.shape
    H = ew.shape[0]
    kern = functools.partial(_block_layer0_kernel, step=step, S=S, bn=bn, Dm=Dm)
    return pl.pallas_call(
        kern,
        out_shape=jax.ShapeDtypeStruct((H, B, bn * S, Dm), jnp.float32),
        grid=(H,),
        in_specs=[
            pl.BlockSpec((B, L, C), lambda h: (0, 0, 0)),           # shared input
            pl.BlockSpec((1, C, Dm), lambda h: (h, 0, 0)),          # emb weight
            pl.BlockSpec((1, 1, Dm), lambda h: (h, 0, 0)),          # emb bias
            pl.BlockSpec((1,) + conv.shape[1:], lambda h: (h, 0, 0)),   # conv pack
            pl.BlockSpec((1,) + gcnb.shape[1:], lambda h: (h, 0, 0)),   # GCN+bias pack
        ],
        out_specs=pl.BlockSpec((1, B, bn * S, Dm), lambda h: (h, 0, 0, 0)),
        compiler_params=_cparams(("parallel",)),
    )(x, ew, eb, conv, gcnb)


def block_layer_next(cur, conv, gcnb, *, bn, step, S, Dm):
    H, B, L_in, _ = cur.shape
    kern = functools.partial(_block_layerN_kernel, step=step, S=S, bn=bn, Dm=Dm)
    return pl.pallas_call(
        kern,
        out_shape=jax.ShapeDtypeStruct((H, B, bn * S, Dm), jnp.float32),
        grid=(H,),
        in_specs=[
            pl.BlockSpec((1, B, L_in, Dm), lambda h: (h, 0, 0, 0)),
            pl.BlockSpec((1,) + conv.shape[1:], lambda h: (h, 0, 0)),
            pl.BlockSpec((1,) + gcnb.shape[1:], lambda h: (h, 0, 0)),
        ],
        out_specs=pl.BlockSpec((1, B, bn * S, Dm), lambda h: (h, 0, 0, 0)),
        compiler_params=_cparams(("parallel",)),
    )(cur, conv, gcnb)


# ---------------------------------------------------------------------------
# Fused simple_linear (time projection) + head concat + final projection
# ---------------------------------------------------------------------------
def _headproj_kernel(x_ref, sw_ref, sb_ref, pw_ref, pb_ref, o_ref):
    H, B, Lout, Dm = x_ref.shape
    P = sw_ref.shape[2]
    C = pw_ref.shape[2]
    acc = jnp.broadcast_to(pb_ref[...], (B * P, C))
    for h in range(H):                                      # unrolled, H static
        xh = x_ref[h]                                       # (B, Lout, Dm)
        xt = jnp.swapaxes(xh, 1, 2).reshape(B * Dm, Lout)
        y = jnp.dot(xt, sw_ref[h], preferred_element_type=jnp.float32) + sb_ref[h]
        yh = jnp.swapaxes(y.reshape(B, Dm, P), 1, 2).reshape(B * P, Dm)
        acc = acc + jnp.dot(yh, pw_ref[h], preferred_element_type=jnp.float32)
    o_ref[...] = acc.reshape(B, P, C).astype(o_ref.dtype)


def head_projection(cur, sw, sb, pw, pb):
    H, B, Lout, Dm = cur.shape
    P = sw.shape[2]
    C = pw.shape[2]
    return pl.pallas_call(
        _headproj_kernel,
        out_shape=jax.ShapeDtypeStruct((B, P, C), jnp.float32),
        grid=(1,),
        in_specs=[
            pl.BlockSpec((H, B, Lout, Dm), lambda i: (0, 0, 0, 0)),
            pl.BlockSpec((H, Lout, P), lambda i: (0, 0, 0)),
            pl.BlockSpec((H, 1, P), lambda i: (0, 0, 0)),
            pl.BlockSpec((H, Dm, C), lambda i: (0, 0, 0)),
            pl.BlockSpec((1, C), lambda i: (0, 0)),
        ],
        out_specs=pl.BlockSpec((B, P, C), lambda i: (0, 0, 0)),
        compiler_params=_cparams(("arbitrary",)),
    )(cur, sw, sb, pw, pb)


# ---------------------------------------------------------------------------
# Parameter construction (deterministic, synthetic), pre-packed for the kernels
# ---------------------------------------------------------------------------
def init_params(key, cfg):
    H, C, Dm = cfg['head_num'], cfg['c_out'], cfg['d_model']
    S, Ln = cfg['block_size'], cfg['layer_num']
    L, P, cov = cfg['seq_len'], cfg['pred_len'], cfg['cover_size']
    res = S - cov
    block_num = (L - S) // res
    out_len = S * (block_num + 1 - Ln)
    Sm1 = S - 1
    Ct = 3 * Dm

    keys = iter(jax.random.split(key, 10 * Ln + 6))

    def nrm(shape):
        return 0.1 * jax.random.normal(next(keys), shape, dtype=jnp.float32)

    CR = 2 * Dm + Sm1
    CC = max(K_CONV * Ct, K_CONV * Sm1)
    GR = 2 * Dm + S + 3
    GC = max(Dm, S)

    layers = []
    for _ in range(Ln):
        # torch-layout conv weights: (H, Cout, Cin, K)
        wt = nrm((H, Dm, Dm, K_CONV))          # TimeGenerateGraph conv (on x1)
        wb1 = nrm((H, Dm, Dm, K_CONV))         # BlockGenerateGraph proj1 (on x1)
        wb2 = nrm((H, Dm, Dm, K_CONV))         # BlockGenerateGraph proj2 (on x2)
        wd = nrm((H, Sm1, Sm1, K_CONV))        # DimGenerateGraph conv

        conv = jnp.zeros((H, CR, CC), jnp.float32)
        # Fused block-diagonal weight for concat([x1, x2], -1):
        #   column = k*(3*Dm) + g*Dm + o,  g in {time, block1, block2}
        for k in range(K_CONV):
            base = k * Ct
            conv = conv.at[:, 0:Dm, base:base + Dm].set(
                jnp.transpose(wt[..., k], (0, 2, 1)))
            conv = conv.at[:, 0:Dm, base + Dm:base + 2 * Dm].set(
                jnp.transpose(wb1[..., k], (0, 2, 1)))
            conv = conv.at[:, Dm:2 * Dm, base + 2 * Dm:base + 3 * Dm].set(
                jnp.transpose(wb2[..., k], (0, 2, 1)))
        # Dim conv, flattened: wd_f[h, c, k*Sm1 + o] = wd[h, o, c, k]
        wd_f = jnp.transpose(wd, (0, 2, 3, 1)).reshape(H, Sm1, K_CONV * Sm1)
        conv = conv.at[:, 2 * Dm:2 * Dm + Sm1, 0:K_CONV * Sm1].set(wd_f)

        gcnb = jnp.zeros((H, GR, GC), jnp.float32)
        gcnb = gcnb.at[:, 0:Dm, 0:Dm].set(nrm((H, Dm, Dm)))            # wgt
        gcnb = gcnb.at[:, Dm:Dm + S, 0:S].set(nrm((H, S, S)))          # wgd
        gcnb = gcnb.at[:, Dm + S:2 * Dm + S, 0:Dm].set(nrm((H, Dm, Dm)))  # wgb
        gcnb = gcnb.at[:, 2 * Dm + S + 0, 0:Dm].set(nrm((H, Dm)))      # bgt
        gcnb = gcnb.at[:, 2 * Dm + S + 1, 0:S].set(nrm((H, S)))        # bgd
        gcnb = gcnb.at[:, 2 * Dm + S + 2, 0:Dm].set(nrm((H, Dm)))      # bgb
        layers.append(dict(conv=conv, gcnb=gcnb))

    return dict(
        emb_w=nrm((H, C, Dm)), emb_b=nrm((H, 1, Dm)),
        layers=layers,
        simple_w=nrm((H, out_len, P)), simple_b=nrm((H, 1, P)),
        proj_w=nrm((H, Dm, C)), proj_b=nrm((1, C)),
    )


# ---------------------------------------------------------------------------
# Full model forward: layer_num + 1 pallas_call launches, no XLA glue between.
# ---------------------------------------------------------------------------
def forward(params, x, cfg):
    B, L, C = x.shape
    Dm = cfg['d_model']
    S, cov = cfg['block_size'], cfg['cover_size']
    Ln = cfg['layer_num']
    res = S - cov
    block_num = (L - S) // res

    lp0 = params['layers'][0]
    cur = block_layer_first(x, params['emb_w'], params['emb_b'],
                            lp0['conv'], lp0['gcnb'],
                            bn=block_num, step=res, S=S, Dm=Dm)       # (H,B,*,Dm)
    for l in range(1, Ln):
        lp = params['layers'][l]
        cur = block_layer_next(cur, lp['conv'], lp['gcnb'],
                               bn=block_num - l, step=S, S=S, Dm=Dm)

    # simple_linear over time + head concat + final projection, fused.
    return head_projection(cur, params['simple_w'], params['simple_b'],
                           params['proj_w'], params['proj_b'])        # (B,P,C)


# ---------------------------------------------------------------------------
if __name__ == "__main__":
    cfg = dict(head_num=2, c_out=4, d_model=8, seq_len=16, pred_len=8,
               dropout=0.0, layer_num=2, block_size=8, cover_size=4)

    key = jax.random.PRNGKey(0)
    kp, kx = jax.random.split(key)
    params = init_params(kp, cfg)
    x = jax.random.normal(kx, (2, cfg['seq_len'], cfg['c_out']), dtype=jnp.float32)

    fwd = jax.jit(functools.partial(forward, cfg=cfg))
    out = jax.block_until_ready(fwd(params, x))
    assert out.shape == (2, cfg['pred_len'], cfg['c_out']), out.shape
    assert bool(jnp.all(jnp.isfinite(out)))
    print("KERNEL_OK")
</pallas_src>

<mosaic_0001>
module attributes {stable_mosaic.version = 11 : i64} {
  func.func @_block_layer0_kernel(%arg0: i32, %arg1: memref<2x16x4xf32, #tpu.memory_space<vmem>>, %arg2: memref<1x4x8xf32, #tpu.memory_space<vmem>>, %arg3: memref<1x1x8xf32, #tpu.memory_space<vmem>>, %arg4: memref<1x23x120xf32, #tpu.memory_space<vmem>>, %arg5: memref<1x27x8xf32, #tpu.memory_space<vmem>>, %arg6: memref<1x2x16x8xf32, #tpu.memory_space<vmem>>) attributes {dimension_semantics = [#tpu.dimension_semantics<parallel>], iteration_bounds = array<i64: 2>, scalar_prefetch = 0 : i64, scratch_operands = 0 : i64, tpu.core_type = #tpu.core_type<tc>, window_params = [{pipeline_mode = #tpu.pipeline_mode<synchronous>, transform_indices = @transform_0, window_bounds = array<i64: 2, 16, 4>}, {transform_indices = @transform_1, window_bounds = array<i64: 1, 4, 8>}, {transform_indices = @transform_2, window_bounds = array<i64: 1, 1, 8>}, {transform_indices = @transform_3, window_bounds = array<i64: 1, 23, 120>}, {transform_indices = @transform_4, window_bounds = array<i64: 1, 27, 8>}, {transform_indices = @transform_5, window_bounds = array<i64: 1, 2, 16, 8>}]} {
    %c0 = arith.constant 0 : index
    %c0_0 = arith.constant 0 : index
    %c0_1 = arith.constant 0 : index
    %0 = vector.load %arg1[%c0, %c0_0, %c0_1] : memref<2x16x4xf32, #tpu.memory_space<vmem>>, vector<2x16x4xf32>
    %1 = vector.shape_cast %0 : vector<2x16x4xf32> to vector<32x4xf32>
    %c0_2 = arith.constant 0 : index
    %c0_3 = arith.constant 0 : index
    %c0_4 = arith.constant 0 : index
    %2 = vector.load %arg2[%c0_2, %c0_3, %c0_4] : memref<1x4x8xf32, #tpu.memory_space<vmem>>, vector<1x4x8xf32>
    %3 = vector.shape_cast %2 : vector<1x4x8xf32> to vector<4x8xf32>
    %cst = arith.constant dense<0.000000e+00> : vector<32x8xf32>
    %4 = tpu.matmul %1, %3, %cst {dimension_numbers = #tpu.dot_dimension_numbers<[1], [0], [0], [1], [0, 0, 1, 1], [], []>} : vector<32x4xf32>, vector<4x8xf32>, vector<32x8xf32> -> vector<32x8xf32>
    %c0_5 = arith.constant 0 : index
    %c0_6 = arith.constant 0 : index
    %c0_7 = arith.constant 0 : index
    %5 = vector.load %arg3[%c0_5, %c0_6, %c0_7] : memref<1x1x8xf32, #tpu.memory_space<vmem>>, vector<1x1x8xf32>
    %6 = vector.shape_cast %5 : vector<1x1x8xf32> to vector<1x8xf32>
    %7 = vector.broadcast %6 : vector<1x8xf32> to vector<32x8xf32>
    %8 = arith.addf %4, %7 : vector<32x8xf32>
    %cst_8 = arith.constant 0.000000e+00 : f32
    %9 = vector.broadcast %cst_8 : f32 to vector<32x8xf32>
    %10 = arith.maximumf %8, %9 : vector<32x8xf32>
    %11 = vector.shape_cast %10 : vector<32x8xf32> to vector<2x16x8xf32>
    %c0_9 = arith.constant 0 : index
    %c0_10 = arith.constant 0 : index
    %c0_11 = arith.constant 0 : index
    %12 = vector.load %arg4[%c0_9, %c0_10, %c0_11] : memref<1x23x120xf32, #tpu.memory_space<vmem>>, vector<1x23x120xf32>
    %13 = vector.shape_cast %12 : vector<1x23x120xf32> to vector<23x120xf32>
    %14 = vector.extract_strided_slice %13 {offsets = [0, 0], sizes = [16, 120], strides = [1, 1]} : vector<23x120xf32> to vector<16x120xf32>
    %15 = vector.extract_strided_slice %13 {offsets = [16, 0], sizes = [7, 35], strides = [1, 1]} : vector<23x120xf32> to vector<7x35xf32>
    %c0_12 = arith.constant 0 : index
    %c0_13 = arith.constant 0 : index
    %c0_14 = arith.constant 0 : index
    %16 = vector.load %arg5[%c0_12, %c0_13, %c0_14] : memref<1x27x8xf32, #tpu.memory_space<vmem>>, vector<1x27x8xf32>
    %17 = vector.shape_cast %16 : vector<1x27x8xf32> to vector<27x8xf32>
    %18 = vector.extract_strided_slice %17 {offsets = [0, 0], sizes = [8, 8], strides = [1, 1]} : vector<27x8xf32> to vector<8x8xf32>
    %19 = vector.extract_strided_slice %17 {offsets = [8, 0], sizes = [8, 8], strides = [1, 1]} : vector<27x8xf32> to vector<8x8xf32>
    %20 = vector.extract_strided_slice %17 {offsets = [16, 0], sizes = [8, 8], strides = [1, 1]} : vector<27x8xf32> to vector<8x8xf32>
    %21 = vector.extract_strided_slice %17 {offsets = [24, 0], sizes = [1, 8], strides = [1, 1]} : vector<27x8xf32> to vector<1x8xf32>
    %22 = vector.extract_strided_slice %17 {offsets = [25, 0], sizes = [1, 8], strides = [1, 1]} : vector<27x8xf32> to vector<1x8xf32>
    %23 = vector.extract_strided_slice %17 {offsets = [26, 0], sizes = [1, 8], strides = [1, 1]} : vector<27x8xf32> to vector<1x8xf32>
    %24 = vector.extract_strided_slice %11 {offsets = [0, 0, 0], sizes = [2, 8, 8], strides = [1, 1, 1]} : vector<2x16x8xf32> to vector<2x8x8xf32>
    %25 = vector.extract_strided_slice %11 {offsets = [0, 4, 0], sizes = [2, 8, 8], strides = [1, 1, 1]} : vector<2x16x8xf32> to vector<2x8x8xf32>
    %26 = tpu.concatenate %24, %25 in 2 : vector<2x8x8xf32>, vector<2x8x8xf32> -> vector<2x8x16xf32>
    %27 = vector.shape_cast %26 : vector<2x8x16xf32> to vector<16x16xf32>
    %cst_15 = arith.constant dense<0.000000e+00> : vector<16x120xf32>
    %28 = tpu.matmul %27, %14, %cst_15 {dimension_numbers = #tpu.dot_dimension_numbers<[1], [0], [0], [1], [0, 0, 1, 1], [], []>} : vector<16x16xf32>, vector<16x120xf32>, vector<16x120xf32> -> vector<16x120xf32>
    %29 = vector.shape_cast %28 : vector<16x120xf32> to vector<2x8x120xf32>
    %30 = vector.extract_strided_slice %29 {offsets = [0, 6, 0], sizes = [2, 2, 120], strides = [1, 1, 1]} : vector<2x8x120xf32> to vector<2x2x120xf32>
    %31 = vector.extract_strided_slice %29 {offsets = [0, 0, 0], sizes = [2, 6, 120], strides = [1, 1, 1]} : vector<2x8x120xf32> to vector<2x6x120xf32>
    %32 = tpu.concatenate %30, %31 in 1 : vector<2x2x120xf32>, vector<2x6x120xf32> -> vector<2x8x120xf32>
    %33 = vector.extract_strided_slice %32 {offsets = [0, 0, 0], sizes = [2, 8, 24], strides = [1, 1, 1]} : vector<2x8x120xf32> to vector<2x8x24xf32>
    %34 = vector.extract_strided_slice %29 {offsets = [0, 7, 0], sizes = [2, 1, 120], strides = [1, 1, 1]} : vector<2x8x120xf32> to vector<2x1x120xf32>
    %35 = vector.extract_strided_slice %29 {offsets = [0, 0, 0], sizes = [2, 7, 120], strides = [1, 1, 1]} : vector<2x8x120xf32> to vector<2x7x120xf32>
    %36 = tpu.concatenate %34, %35 in 1 : vector<2x1x120xf32>, vector<2x7x120xf32> -> vector<2x8x120xf32>
    %37 = vector.extract_strided_slice %36 {offsets = [0, 0, 24], sizes = [2, 8, 24], strides = [1, 1, 1]} : vector<2x8x120xf32> to vector<2x8x24xf32>
    %38 = arith.addf %33, %37 : vector<2x8x24xf32>
    %39 = vector.extract_strided_slice %29 {offsets = [0, 0, 48], sizes = [2, 8, 24], strides = [1, 1, 1]} : vector<2x8x120xf32> to vector<2x8x24xf32>
    %40 = arith.addf %38, %39 : vector<2x8x24xf32>
    %41 = vector.extract_strided_slice %29 {offsets = [0, 1, 0], sizes = [2, 7, 120], strides = [1, 1, 1]} : vector<2x8x120xf32> to vector<2x7x120xf32>
    %42 = vector.extract_strided_slice %29 {offsets = [0, 0, 0], sizes = [2, 1, 120], strides = [1, 1, 1]} : vector<2x8x120xf32> to vector<2x1x120xf32>
    %43 = tpu.concatenate %41, %42 in 1 : vector<2x7x120xf32>, vector<2x1x120xf32> -> vector<2x8x120xf32>
    %44 = vector.extract_strided_slice %43 {offsets = [0, 0, 72], sizes = [2, 8, 24], strides = [1, 1, 1]} : vector<2x8x120xf32> to vector<2x8x24xf32>
    %45 = arith.addf %40, %44 : vector<2x8x24xf32>
    %46 = vector.extract_strided_slice %29 {offsets = [0, 2, 0], sizes = [2, 6, 120], strides = [1, 1, 1]} : vector<2x8x120xf32> to vector<2x6x120xf32>
    %47 = vector.extract_strided_slice %29 {offsets = [0, 0, 0], sizes = [2, 2, 120], strides = [1, 1, 1]} : vector<2x8x120xf32> to vector<2x2x120xf32>
    %48 = tpu.concatenate %46, %47 in 1 : vector<2x6x120xf32>, vector<2x2x120xf32> -> vector<2x8x120xf32>
    %49 = vector.extract_strided_slice %48 {offsets = [0, 0, 96], sizes = [2, 8, 24], strides = [1, 1, 1]} : vector<2x8x120xf32> to vector<2x8x24xf32>
    %50 = arith.addf %45, %49 : vector<2x8x24xf32>
    %51 = vector.extract_strided_slice %50 {offsets = [0, 0, 0], sizes = [2, 8, 8], strides = [1, 1, 1]} : vector<2x8x24xf32> to vector<2x8x8xf32>
    %cst_16 = arith.constant dense<0.000000e+00> : vector<2x8xf32>
    %52 = vector.multi_reduction <add>, %51, %cst_16 [1] : vector<2x8x8xf32> to vector<2x8xf32>
    %53 = vector.shape_cast %52 : vector<2x8xf32> to vector<2x1x8xf32>
    %cst_17 = arith.constant 8.000000e+00 : f32
    %54 = vector.broadcast %cst_17 : f32 to vector<2x1x8xf32>
    %55 = arith.divf %53, %54 : vector<2x1x8xf32>
    %56 = vector.broadcast %55 : vector<2x1x8xf32> to vector<2x8x8xf32>
    %57 = arith.subf %51, %56 : vector<2x8x8xf32>
    %58 = vector.broadcast %55 : vector<2x1x8xf32> to vector<2x8x8xf32>
    %59 = arith.subf %51, %58 : vector<2x8x8xf32>
    %60 = arith.mulf %57, %59 : vector<2x8x8xf32>
    %cst_18 = arith.constant dense<0.000000e+00> : vector<2x8xf32>
    %61 = vector.multi_reduction <add>, %60, %cst_18 [1] : vector<2x8x8xf32> to vector<2x8xf32>
    %62 = vector.shape_cast %61 : vector<2x8xf32> to vector<2x1x8xf32>
    %cst_19 = arith.constant 8.000000e+00 : f32
    %63 = vector.broadcast %cst_19 : f32 to vector<2x1x8xf32>
    %64 = arith.divf %62, %63 : vector<2x1x8xf32>
    %65 = vector.broadcast %55 : vector<2x1x8xf32> to vector<2x8x8xf32>
    %66 = arith.subf %51, %65 : vector<2x8x8xf32>
    %cst_20 = arith.constant 9.99999974E-6 : f32
    %67 = vector.broadcast %cst_20 : f32 to vector<2x1x8xf32>
    %68 = arith.addf %64, %67 : vector<2x1x8xf32>
    %69 = math.rsqrt %68 : vector<2x1x8xf32>
    %70 = vector.broadcast %69 : vector<2x1x8xf32> to vector<2x8x8xf32>
    %71 = arith.mulf %66, %70 : vector<2x8x8xf32>
    %72 = vector.extract_strided_slice %50 {offsets = [0, 0, 8], sizes = [2, 8, 8], strides = [1, 1, 1]} : vector<2x8x24xf32> to vector<2x8x8xf32>
    %cst_21 = arith.constant dense<0.000000e+00> : vector<2x8xf32>
    %73 = vector.multi_reduction <add>, %72, %cst_21 [1] : vector<2x8x8xf32> to vector<2x8xf32>
    %74 = vector.shape_cast %73 : vector<2x8xf32> to vector<2x1x8xf32>
    %cst_22 = arith.constant 8.000000e+00 : f32
    %75 = vector.broadcast %cst_22 : f32 to vector<2x1x8xf32>
    %76 = arith.divf %74, %75 : vector<2x1x8xf32>
    %77 = vector.broadcast %76 : vector<2x1x8xf32> to vector<2x8x8xf32>
    %78 = arith.subf %72, %77 : vector<2x8x8xf32>
    %79 = vector.broadcast %76 : vector<2x1x8xf32> to vector<2x8x8xf32>
    %80 = arith.subf %72, %79 : vector<2x8x8xf32>
    %81 = arith.mulf %78, %80 : vector<2x8x8xf32>
    %cst_23 = arith.constant dense<0.000000e+00> : vector<2x8xf32>
    %82 = vector.multi_reduction <add>, %81, %cst_23 [1] : vector<2x8x8xf32> to vector<2x8xf32>
    %83 = vector.shape_cast %82 : vector<2x8xf32> to vector<2x1x8xf32>
    %cst_24 = arith.constant 8.000000e+00 : f32
    %84 = vector.broadcast %cst_24 : f32 to vector<2x1x8xf32>
    %85 = arith.divf %83, %84 : vector<2x1x8xf32>
    %86 = vector.broadcast %76 : vector<2x1x8xf32> to vector<2x8x8xf32>
    %87 = arith.subf %72, %86 : vector<2x8x8xf32>
    %cst_25 = arith.constant 9.99999974E-6 : f32
    %88 = vector.broadcast %cst_25 : f32 to vector<2x1x8xf32>
    %89 = arith.addf %85, %88 : vector<2x1x8xf32>
    %90 = math.rsqrt %89 : vector<2x1x8xf32>
    %91 = vector.broadcast %90 : vector<2x1x8xf32> to vector<2x8x8xf32>
    %92 = arith.mulf %87, %91 : vector<2x8x8xf32>
    %93 = vector.extract_strided_slice %50 {offsets = [0, 0, 16], sizes = [2, 8, 8], strides = [1, 1, 1]} : vector<2x8x24xf32> to vector<2x8x8xf32>
    %cst_26 = arith.constant dense<0.000000e+00> : vector<2x8xf32>
    %94 = vector.multi_reduction <add>, %93, %cst_26 [1] : vector<2x8x8xf32> to vector<2x8xf32>
    %95 = vector.shape_cast %94 : vector<2x8xf32> to vector<2x1x8xf32>
    %cst_27 = arith.constant 8.000000e+00 : f32
    %96 = vector.broadcast %cst_27 : f32 to vector<2x1x8xf32>
    %97 = arith.divf %95, %96 : vector<2x1x8xf32>
    %98 = vector.broadcast %97 : vector<2x1x8xf32> to vector<2x8x8xf32>
    %99 = arith.subf %93, %98 : vector<2x8x8xf32>
    %100 = vector.broadcast %97 : vector<2x1x8xf32> to vector<2x8x8xf32>
    %101 = arith.subf %93, %100 : vector<2x8x8xf32>
    %102 = arith.mulf %99, %101 : vector<2x8x8xf32>
    %cst_28 = arith.constant dense<0.000000e+00> : vector<2x8xf32>
    %103 = vector.multi_reduction <add>, %102, %cst_28 [1] : vector<2x8x8xf32> to vector<2x8xf32>
    %104 = vector.shape_cast %103 : vector<2x8xf32> to vector<2x1x8xf32>
    %cst_29 = arith.constant 8.000000e+00 : f32
    %105 = vector.broadcast %cst_29 : f32 to vector<2x1x8xf32>
    %106 = arith.divf %104, %105 : vector<2x1x8xf32>
    %107 = vector.broadcast %97 : vector<2x1x8xf32> to vector<2x8x8xf32>
    %108 = arith.subf %93, %107 : vector<2x8x8xf32>
    %cst_30 = arith.constant 9.99999974E-6 : f32
    %109 = vector.broadcast %cst_30 : f32 to vector<2x1x8xf32>
    %110 = arith.addf %106, %109 : vector<2x1x8xf32>
    %111 = math.rsqrt %110 : vector<2x1x8xf32>
    %112 = vector.broadcast %111 : vector<2x1x8xf32> to vector<2x8x8xf32>
    %113 = arith.mulf %108, %112 : vector<2x8x8xf32>
    "tpu.trace_start"() <{level = 10 : i32, message = "ble,bse->bls"}> : () -> ()
    %cst_31 = arith.constant dense<0.000000e+00> : vector<2x8x8xf32>
    %114 = tpu.matmul %71, %71, %cst_31 {dimension_numbers = #tpu.dot_dimension_numbers<[2], [2], [1], [1], [0, 0, 0, 1, 1, 1], [0], [0]>} : vector<2x8x8xf32>, vector<2x8x8xf32>, vector<2x8x8xf32> -> vector<2x8x8xf32>
    "tpu.trace_stop"() : () -> ()
    %cst_32 = arith.constant 0.353553385 : f32
    %115 = vector.broadcast %cst_32 : f32 to vector<2x8x8xf32>
    %116 = arith.mulf %114, %115 : vector<2x8x8xf32>
    %cst_33 = arith.constant dense<0xFF800000> : vector<8x8xf32>
    %117 = vector.multi_reduction <maximumf>, %116, %cst_33 [0] : vector<2x8x8xf32> to vector<8x8xf32>
    %118 = vector.shape_cast %117 : vector<8x8xf32> to vector<1x8x8xf32>
    %119 = vector.broadcast %118 : vector<1x8x8xf32> to vector<2x8x8xf32>
    %120 = arith.subf %116, %119 : vector<2x8x8xf32>
    %121 = math.exp %120 : vector<2x8x8xf32>
    %cst_34 = arith.constant dense<0.000000e+00> : vector<8x8xf32>
    %122 = vector.multi_reduction <add>, %121, %cst_34 [0] : vector<2x8x8xf32> to vector<8x8xf32>
    %123 = vector.shape_cast %122 : vector<8x8xf32> to vector<1x8x8xf32>
    %124 = vector.broadcast %123 : vector<1x8x8xf32> to vector<2x8x8xf32>
    %125 = arith.divf %121, %124 : vector<2x8x8xf32>
    "tpu.trace_start"() <{level = 10 : i32, message = "ble,bse->bls"}> : () -> ()
    %cst_35 = arith.constant dense<0.000000e+00> : vector<2x8x8xf32>
    %126 = tpu.matmul %92, %113, %cst_35 {dimension_numbers = #tpu.dot_dimension_numbers<[2], [2], [1], [1], [0, 0, 0, 1, 1, 1], [0], [0]>} : vector<2x8x8xf32>, vector<2x8x8xf32>, vector<2x8x8xf32> -> vector<2x8x8xf32>
    "tpu.trace_stop"() : () -> ()
    %cst_36 = arith.constant 0.353553385 : f32
    %127 = vector.broadcast %cst_36 : f32 to vector<2x8x8xf32>
    %128 = arith.mulf %126, %127 : vector<2x8x8xf32>
    %cst_37 = arith.constant dense<0xFF800000> : vector<8x8xf32>
    %129 = vector.multi_reduction <maximumf>, %128, %cst_37 [0] : vector<2x8x8xf32> to vector<8x8xf32>
    %130 = vector.shape_cast %129 : vector<8x8xf32> to vector<1x8x8xf32>
    %131 = vector.broadcast %130 : vector<1x8x8xf32> to vector<2x8x8xf32>
    %132 = arith.subf %128, %131 : vector<2x8x8xf32>
    %133 = math.exp %132 : vector<2x8x8xf32>
    %cst_38 = arith.constant dense<0.000000e+00> : vector<8x8xf32>
    %134 = vector.multi_reduction <add>, %133, %cst_38 [0] : vector<2x8x8xf32> to vector<8x8xf32>
    %135 = vector.shape_cast %134 : vector<8x8xf32> to vector<1x8x8xf32>
    %136 = vector.broadcast %135 : vector<1x8x8xf32> to vector<2x8x8xf32>
    %137 = arith.divf %133, %136 : vector<2x8x8xf32>
    %138 = vector.extract_strided_slice %24 {offsets = [0, 1, 0], sizes = [2, 7, 8], strides = [1, 1, 1]} : vector<2x8x8xf32> to vector<2x7x8xf32>
    %139 = vector.extract_strided_slice %24 {offsets = [0, 0, 0], sizes = [2, 7, 8], strides = [1, 1, 1]} : vector<2x8x8xf32> to vector<2x7x8xf32>
    %140 = arith.subf %138, %139 : vector<2x7x8xf32>
    %141 = tpu.transpose %140, [0, 2, 1] : vector<2x7x8xf32> -> vector<2x8x7xf32>
    %142 = vector.shape_cast %141 : vector<2x8x7xf32> to vector<16x7xf32>
    %cst_39 = arith.constant dense<0.000000e+00> : vector<16x35xf32>
    %143 = tpu.matmul %142, %15, %cst_39 {dimension_numbers = #tpu.dot_dimension_numbers<[1], [0], [0], [1], [0, 0, 1, 1], [], []>} : vector<16x7xf32>, vector<7x35xf32>, vector<16x35xf32> -> vector<16x35xf32>
    %144 = vector.shape_cast %143 : vector<16x35xf32> to vector<2x8x35xf32>
    %145 = vector.extract_strided_slice %144 {offsets = [0, 6, 0], sizes = [2, 2, 35], strides = [1, 1, 1]} : vector<2x8x35xf32> to vector<2x2x35xf32>
    %146 = vector.extract_strided_slice %144 {offsets = [0, 0, 0], sizes = [2, 6, 35], strides = [1, 1, 1]} : vector<2x8x35xf32> to vector<2x6x35xf32>
    %147 = tpu.concatenate %145, %146 in 1 : vector<2x2x35xf32>, vector<2x6x35xf32> -> vector<2x8x35xf32>
    %148 = vector.extract_strided_slice %147 {offsets = [0, 0, 0], sizes = [2, 8, 7], strides = [1, 1, 1]} : vector<2x8x35xf32> to vector<2x8x7xf32>
    %149 = vector.extract_strided_slice %144 {offsets = [0, 7, 0], sizes = [2, 1, 35], strides = [1, 1, 1]} : vector<2x8x35xf32> to vector<2x1x35xf32>
    %150 = vector.extract_strided_slice %144 {offsets = [0, 0, 0], sizes = [2, 7, 35], strides = [1, 1, 1]} : vector<2x8x35xf32> to vector<2x7x35xf32>
    %151 = tpu.concatenate %149, %150 in 1 : vector<2x1x35xf32>, vector<2x7x35xf32> -> vector<2x8x35xf32>
    %152 = vector.extract_strided_slice %151 {offsets = [0, 0, 7], sizes = [2, 8, 7], strides = [1, 1, 1]} : vector<2x8x35xf32> to vector<2x8x7xf32>
    %153 = arith.addf %148, %152 : vector<2x8x7xf32>
    %154 = vector.extract_strided_slice %144 {offsets = [0, 0, 14], sizes = [2, 8, 7], strides = [1, 1, 1]} : vector<2x8x35xf32> to vector<2x8x7xf32>
    %155 = arith.addf %153, %154 : vector<2x8x7xf32>
    %156 = vector.extract_strided_slice %144 {offsets = [0, 1, 0], sizes = [2, 7, 35], strides = [1, 1, 1]} : vector<2x8x35xf32> to vector<2x7x35xf32>
    %157 = vector.extract_strided_slice %144 {offsets = [0, 0, 0], sizes = [2, 1, 35], strides = [1, 1, 1]} : vector<2x8x35xf32> to vector<2x1x35xf32>
    %158 = tpu.concatenate %156, %157 in 1 : vector<2x7x35xf32>, vector<2x1x35xf32> -> vector<2x8x35xf32>
    %159 = vector.extract_strided_slice %158 {offsets = [0, 0, 21], sizes = [2, 8, 7], strides = [1, 1, 1]} : vector<2x8x35xf32> to vector<2x8x7xf32>
    %160 = arith.addf %155, %159 : vector<2x8x7xf32>
    %161 = vector.extract_strided_slice %144 {offsets = [0, 2, 0], sizes = [2, 6, 35], strides = [1, 1, 1]} : vector<2x8x35xf32> to vector<2x6x35xf32>
    %162 = vector.extract_strided_slice %144 {offsets = [0, 0, 0], sizes = [2, 2, 35], strides = [1, 1, 1]} : vector<2x8x35xf32> to vector<2x2x35xf32>
    %163 = tpu.concatenate %161, %162 in 1 : vector<2x6x35xf32>, vector<2x2x35xf32> -> vector<2x8x35xf32>
    %164 = vector.extract_strided_slice %163 {offsets = [0, 0, 28], sizes = [2, 8, 7], strides = [1, 1, 1]} : vector<2x8x35xf32> to vector<2x8x7xf32>
    %165 = arith.addf %160, %164 : vector<2x8x7xf32>
    %cst_40 = arith.constant dense<0.000000e+00> : vector<2x7xf32>
    %166 = vector.multi_reduction <add>, %165, %cst_40 [1] : vector<2x8x7xf32> to vector<2x7xf32>
    %167 = vector.shape_cast %166 : vector<2x7xf32> to vector<2x1x7xf32>
    %cst_41 = arith.constant 8.000000e+00 : f32
    %168 = vector.broadcast %cst_41 : f32 to vector<2x1x7xf32>
    %169 = arith.divf %167, %168 : vector<2x1x7xf32>
    %170 = vector.broadcast %169 : vector<2x1x7xf32> to vector<2x8x7xf32>
    %171 = arith.subf %165, %170 : vector<2x8x7xf32>
    %172 = vector.broadcast %169 : vector<2x1x7xf32> to vector<2x8x7xf32>
    %173 = arith.subf %165, %172 : vector<2x8x7xf32>
    %174 = arith.mulf %171, %173 : vector<2x8x7xf32>
    %cst_42 = arith.constant dense<0.000000e+00> : vector<2x7xf32>
    %175 = vector.multi_reduction <add>, %174, %cst_42 [1] : vector<2x8x7xf32> to vector<2x7xf32>
    %176 = vector.shape_cast %175 : vector<2x7xf32> to vector<2x1x7xf32>
    %cst_43 = arith.constant 8.000000e+00 : f32
    %177 = vector.broadcast %cst_43 : f32 to vector<2x1x7xf32>
    %178 = arith.divf %176, %177 : vector<2x1x7xf32>
    %179 = vector.broadcast %169 : vector<2x1x7xf32> to vector<2x8x7xf32>
    %180 = arith.subf %165, %179 : vector<2x8x7xf32>
    %cst_44 = arith.constant 9.99999974E-6 : f32
    %181 = vector.broadcast %cst_44 : f32 to vector<2x1x7xf32>
    %182 = arith.addf %178, %181 : vector<2x1x7xf32>
    %183 = math.rsqrt %182 : vector<2x1x7xf32>
    %184 = vector.broadcast %183 : vector<2x1x7xf32> to vector<2x8x7xf32>
    %185 = arith.mulf %180, %184 : vector<2x8x7xf32>
    "tpu.trace_start"() <{level = 10 : i32, message = "ble,bse->bls"}> : () -> ()
    %cst_45 = arith.constant dense<0.000000e+00> : vector<2x8x8xf32>
    %186 = tpu.matmul %185, %185, %cst_45 {dimension_numbers = #tpu.dot_dimension_numbers<[2], [2], [1], [1], [0, 0, 0, 1, 1, 1], [0], [0]>} : vector<2x8x7xf32>, vector<2x8x7xf32>, vector<2x8x8xf32> -> vector<2x8x8xf32>
    "tpu.trace_stop"() : () -> ()
    %cst_46 = arith.constant 0.377964467 : f32
    %187 = vector.broadcast %cst_46 : f32 to vector<2x8x8xf32>
    %188 = arith.mulf %186, %187 : vector<2x8x8xf32>
    %cst_47 = arith.constant dense<0xFF800000> : vector<8x8xf32>
    %189 = vector.multi_reduction <maximumf>, %188, %cst_47 [0] : vector<2x8x8xf32> to vector<8x8xf32>
    %190 = vector.shape_cast %189 : vector<8x8xf32> to vector<1x8x8xf32>
    %191 = vector.broadcast %190 : vector<1x8x8xf32> to vector<2x8x8xf32>
    %192 = arith.subf %188, %191 : vector<2x8x8xf32>
    %193 = math.exp %192 : vector<2x8x8xf32>
    %cst_48 = arith.constant dense<0.000000e+00> : vector<8x8xf32>
    %194 = vector.multi_reduction <add>, %193, %cst_48 [0] : vector<2x8x8xf32> to vector<8x8xf32>
    %195 = vector.shape_cast %194 : vector<8x8xf32> to vector<1x8x8xf32>
    %196 = vector.broadcast %195 : vector<1x8x8xf32> to vector<2x8x8xf32>
    %197 = arith.divf %193, %196 : vector<2x8x8xf32>
    %198 = vector.shape_cast %24 : vector<2x8x8xf32> to vector<16x8xf32>
    %cst_49 = arith.constant dense<0.000000e+00> : vector<16x8xf32>
    %199 = tpu.matmul %198, %20, %cst_49 {dimension_numbers = #tpu.dot_dimension_numbers<[1], [0], [0], [1], [0, 0, 1, 1], [], []>} : vector<16x8xf32>, vector<8x8xf32>, vector<16x8xf32> -> vector<16x8xf32>
    %200 = vector.shape_cast %199 : vector<16x8xf32> to vector<2x8x8xf32>
    "tpu.trace_start"() <{level = 10 : i32, message = "bsl,ble->bse"}> : () -> ()
    %cst_50 = arith.constant dense<0.000000e+00> : vector<2x8x8xf32>
    %201 = tpu.matmul %137, %200, %cst_50 {dimension_numbers = #tpu.dot_dimension_numbers<[2], [1], [1], [2], [0, 0, 0, 1, 1, 2], [0], [0]>} : vector<2x8x8xf32>, vector<2x8x8xf32>, vector<2x8x8xf32> -> vector<2x8x8xf32>
    "tpu.trace_stop"() : () -> ()
    %202 = vector.shape_cast %23 : vector<1x8xf32> to vector<1x1x8xf32>
    %203 = vector.broadcast %202 : vector<1x1x8xf32> to vector<2x8x8xf32>
    %204 = arith.addf %201, %203 : vector<2x8x8xf32>
    %cst_51 = arith.constant 0.000000e+00 : f32
    %205 = vector.broadcast %cst_51 : f32 to vector<2x8x8xf32>
    %206 = arith.maximumf %204, %205 : vector<2x8x8xf32>
    %207 = arith.addf %206, %24 : vector<2x8x8xf32>
    %208 = tpu.transpose %207, [0, 2, 1] : vector<2x8x8xf32> -> vector<2x8x8xf32>
    %209 = vector.shape_cast %208 : vector<2x8x8xf32> to vector<16x8xf32>
    %cst_52 = arith.constant dense<0.000000e+00> : vector<16x8xf32>
    %210 = tpu.matmul %209, %19, %cst_52 {dimension_numbers = #tpu.dot_dimension_numbers<[1], [0], [0], [1], [0, 0, 1, 1], [], []>} : vector<16x8xf32>, vector<8x8xf32>, vector<16x8xf32> -> vector<16x8xf32>
    %211 = vector.shape_cast %210 : vector<16x8xf32> to vector<2x8x8xf32>
    "tpu.trace_start"() <{level = 10 : i32, message = "bsl,ble->bse"}> : () -> ()
    %cst_53 = arith.constant dense<0.000000e+00> : vector<2x8x8xf32>
    %212 = tpu.matmul %197, %211, %cst_53 {dimension_numbers = #tpu.dot_dimension_numbers<[2], [1], [1], [2], [0, 0, 0, 1, 1, 2], [0], [0]>} : vector<2x8x8xf32>, vector<2x8x8xf32>, vector<2x8x8xf32> -> vector<2x8x8xf32>
    "tpu.trace_stop"() : () -> ()
    %213 = vector.shape_cast %22 : vector<1x8xf32> to vector<1x1x8xf32>
    %214 = vector.broadcast %213 : vector<1x1x8xf32> to vector<2x8x8xf32>
    %215 = arith.addf %212, %214 : vector<2x8x8xf32>
    %cst_54 = arith.constant 0.000000e+00 : f32
    %216 = vector.broadcast %cst_54 : f32 to vector<2x8x8xf32>
    %217 = arith.maximumf %215, %216 : vector<2x8x8xf32>
    %218 = tpu.transpose %217, [0, 2, 1] : vector<2x8x8xf32> -> vector<2x8x8xf32>
    %219 = arith.addf %218, %207 : vector<2x8x8xf32>
    %220 = vector.shape_cast %219 : vector<2x8x8xf32> to vector<16x8xf32>
    %cst_55 = arith.constant dense<0.000000e+00> : vector<16x8xf32>
    %221 = tpu.matmul %220, %18, %cst_55 {dimension_numbers = #tpu.dot_dimension_numbers<[1], [0], [0], [1], [0, 0, 1, 1], [], []>} : vector<16x8xf32>, vector<8x8xf32>, vector<16x8xf32> -> vector<16x8xf32>
    %222 = vector.shape_cast %221 : vector<16x8xf32> to vector<2x8x8xf32>
    "tpu.trace_start"() <{level = 10 : i32, message = "bsl,ble->bse"}> : () -> ()
    %cst_56 = arith.constant dense<0.000000e+00> : vector<2x8x8xf32>
    %223 = tpu.matmul %125, %222, %cst_56 {dimension_numbers = #tpu.dot_dimension_numbers<[2], [1], [1], [2], [0, 0, 0, 1, 1, 2], [0], [0]>} : vector<2x8x8xf32>, vector<2x8x8xf32>, vector<2x8x8xf32> -> vector<2x8x8xf32>
    "tpu.trace_stop"() : () -> ()
    %224 = vector.shape_cast %21 : vector<1x8xf32> to vector<1x1x8xf32>
    %225 = vector.broadcast %224 : vector<1x1x8xf32> to vector<2x8x8xf32>
    %226 = arith.addf %223, %225 : vector<2x8x8xf32>
    %cst_57 = arith.constant 0.000000e+00 : f32
    %227 = vector.broadcast %cst_57 : f32 to vector<2x8x8xf32>
    %228 = arith.maximumf %226, %227 : vector<2x8x8xf32>
    %229 = arith.addf %228, %219 : vector<2x8x8xf32>
    %230 = vector.extract_strided_slice %11 {offsets = [0, 4, 0], sizes = [2, 8, 8], strides = [1, 1, 1]} : vector<2x16x8xf32> to vector<2x8x8xf32>
    %231 = vector.extract_strided_slice %11 {offsets = [0, 8, 0], sizes = [2, 8, 8], strides = [1, 1, 1]} : vector<2x16x8xf32> to vector<2x8x8xf32>
    %232 = tpu.concatenate %230, %231 in 2 : vector<2x8x8xf32>, vector<2x8x8xf32> -> vector<2x8x16xf32>
    %233 = vector.shape_cast %232 : vector<2x8x16xf32> to vector<16x16xf32>
    %cst_58 = arith.constant dense<0.000000e+00> : vector<16x120xf32>
    %234 = tpu.matmul %233, %14, %cst_58 {dimension_numbers = #tpu.dot_dimension_numbers<[1], [0], [0], [1], [0, 0, 1, 1], [], []>} : vector<16x16xf32>, vector<16x120xf32>, vector<16x120xf32> -> vector<16x120xf32>
    %235 = vector.shape_cast %234 : vector<16x120xf32> to vector<2x8x120xf32>
    %236 = vector.extract_strided_slice %235 {offsets = [0, 6, 0], sizes = [2, 2, 120], strides = [1, 1, 1]} : vector<2x8x120xf32> to vector<2x2x120xf32>
    %237 = vector.extract_strided_slice %235 {offsets = [0, 0, 0], sizes = [2, 6, 120], strides = [1, 1, 1]} : vector<2x8x120xf32> to vector<2x6x120xf32>
    %238 = tpu.concatenate %236, %237 in 1 : vector<2x2x120xf32>, vector<2x6x120xf32> -> vector<2x8x120xf32>
    %239 = vector.extract_strided_slice %238 {offsets = [0, 0, 0], sizes = [2, 8, 24], strides = [1, 1, 1]} : vector<2x8x120xf32> to vector<2x8x24xf32>
    %240 = vector.extract_strided_slice %235 {offsets = [0, 7, 0], sizes = [2, 1, 120], strides = [1, 1, 1]} : vector<2x8x120xf32> to vector<2x1x120xf32>
    %241 = vector.extract_strided_slice %235 {offsets = [0, 0, 0], sizes = [2, 7, 120], strides = [1, 1, 1]} : vector<2x8x120xf32> to vector<2x7x120xf32>
    %242 = tpu.concatenate %240, %241 in 1 : vector<2x1x120xf32>, vector<2x7x120xf32> -> vector<2x8x120xf32>
    %243 = vector.extract_strided_slice %242 {offsets = [0, 0, 24], sizes = [2, 8, 24], strides = [1, 1, 1]} : vector<2x8x120xf32> to vector<2x8x24xf32>
    %244 = arith.addf %239, %243 : vector<2x8x24xf32>
    %245 = vector.extract_strided_slice %235 {offsets = [0, 0, 48], sizes = [2, 8, 24], strides = [1, 1, 1]} : vector<2x8x120xf32> to vector<2x8x24xf32>
    %246 = arith.addf %244, %245 : vector<2x8x24xf32>
    %247 = vector.extract_strided_slice %235 {offsets = [0, 1, 0], sizes = [2, 7, 120], strides = [1, 1, 1]} : vector<2x8x120xf32> to vector<2x7x120xf32>
    %248 = vector.extract_strided_slice %235 {offsets = [0, 0, 0], sizes = [2, 1, 120], strides = [1, 1, 1]} : vector<2x8x120xf32> to vector<2x1x120xf32>
    %249 = tpu.concatenate %247, %248 in 1 : vector<2x7x120xf32>, vector<2x1x120xf32> -> vector<2x8x120xf32>
    %250 = vector.extract_strided_slice %249 {offsets = [0, 0, 72], sizes = [2, 8, 24], strides = [1, 1, 1]} : vector<2x8x120xf32> to vector<2x8x24xf32>
    %251 = arith.addf %246, %250 : vector<2x8x24xf32>
    %252 = vector.extract_strided_slice %235 {offsets = [0, 2, 0], sizes = [2, 6, 120], strides = [1, 1, 1]} : vector<2x8x120xf32> to vector<2x6x120xf32>
    %253 = vector.extract_strided_slice %235 {offsets = [0, 0, 0], sizes = [2, 2, 120], strides = [1, 1, 1]} : vector<2x8x120xf32> to vector<2x2x120xf32>
    %254 = tpu.concatenate %252, %253 in 1 : vector<2x6x120xf32>, vector<2x2x120xf32> -> vector<2x8x120xf32>
    %255 = vector.extract_strided_slice %254 {offsets = [0, 0, 96], sizes = [2, 8, 24], strides = [1, 1, 1]} : vector<2x8x120xf32> to vector<2x8x24xf32>
    %256 = arith.addf %251, %255 : vector<2x8x24xf32>
    %257 = vector.extract_strided_slice %256 {offsets = [0, 0, 0], sizes = [2, 8, 8], strides = [1, 1, 1]} : vector<2x8x24xf32> to vector<2x8x8xf32>
    %cst_59 = arith.constant dense<0.000000e+00> : vector<2x8xf32>
    %258 = vector.multi_reduction <add>, %257, %cst_59 [1] : vector<2x8x8xf32> to vector<2x8xf32>
    %259 = vector.shape_cast %258 : vector<2x8xf32> to vector<2x1x8xf32>
    %cst_60 = arith.constant 8.000000e+00 : f32
    %260 = vector.broadcast %cst_60 : f32 to vector<2x1x8xf32>
    %261 = arith.divf %259, %260 : vector<2x1x8xf32>
    %262 = vector.broadcast %261 : vector<2x1x8xf32> to vector<2x8x8xf32>
    %263 = arith.subf %257, %262 : vector<2x8x8xf32>
    %264 = vector.broadcast %261 : vector<2x1x8xf32> to vector<2x8x8xf32>
    %265 = arith.subf %257, %264 : vector<2x8x8xf32>
    %266 = arith.mulf %263, %265 : vector<2x8x8xf32>
    %cst_61 = arith.constant dense<0.000000e+00> : vector<2x8xf32>
    %267 = vector.multi_reduction <add>, %266, %cst_61 [1] : vector<2x8x8xf32> to vector<2x8xf32>
    %268 = vector.shape_cast %267 : vector<2x8xf32> to vector<2x1x8xf32>
    %cst_62 = arith.constant 8.000000e+00 : f32
    %269 = vector.broadcast %cst_62 : f32 to vector<2x1x8xf32>
    %270 = arith.divf %268, %269 : vector<2x1x8xf32>
    %271 = vector.broadcast %261 : vector<2x1x8xf32> to vector<2x8x8xf32>
    %272 = arith.subf %257, %271 : vector<2x8x8xf32>
    %cst_63 = arith.constant 9.99999974E-6 : f32
    %273 = vector.broadcast %cst_63 : f32 to vector<2x1x8xf32>
    %274 = arith.addf %270, %273 : vector<2x1x8xf32>
    %275 = math.rsqrt %274 : vector<2x1x8xf32>
    %276 = vector.broadcast %275 : vector<2x1x8xf32> to vector<2x8x8xf32>
    %277 = arith.mulf %272, %276 : vector<2x8x8xf32>
    %278 = vector.extract_strided_slice %256 {offsets = [0, 0, 8], sizes = [2, 8, 8], strides = [1, 1, 1]} : vector<2x8x24xf32> to vector<2x8x8xf32>
    %cst_64 = arith.constant dense<0.000000e+00> : vector<2x8xf32>
    %279 = vector.multi_reduction <add>, %278, %cst_64 [1] : vector<2x8x8xf32> to vector<2x8xf32>
    %280 = vector.shape_cast %279 : vector<2x8xf32> to vector<2x1x8xf32>
    %cst_65 = arith.constant 8.000000e+00 : f32
    %281 = vector.broadcast %cst_65 : f32 to vector<2x1x8xf32>
    %282 = arith.divf %280, %281 : vector<2x1x8xf32>
    %283 = vector.broadcast %282 : vector<2x1x8xf32> to vector<2x8x8xf32>
    %284 = arith.subf %278, %283 : vector<2x8x8xf32>
    %285 = vector.broadcast %282 : vector<2x1x8xf32> to vector<2x8x8xf32>
    %286 = arith.subf %278, %285 : vector<2x8x8xf32>
    %287 = arith.mulf %284, %286 : vector<2x8x8xf32>
    %cst_66 = arith.constant dense<0.000000e+00> : vector<2x8xf32>
    %288 = vector.multi_reduction <add>, %287, %cst_66 [1] : vector<2x8x8xf32> to vector<2x8xf32>
    %289 = vector.shape_cast %288 : vector<2x8xf32> to vector<2x1x8xf32>
    %cst_67 = arith.constant 8.000000e+00 : f32
    %290 = vector.broadcast %cst_67 : f32 to vector<2x1x8xf32>
    %291 = arith.divf %289, %290 : vector<2x1x8xf32>
    %292 = vector.broadcast %282 : vector<2x1x8xf32> to vector<2x8x8xf32>
    %293 = arith.subf %278, %292 : vector<2x8x8xf32>
    %cst_68 = arith.constant 9.99999974E-6 : f32
    %294 = vector.broadcast %cst_68 : f32 to vector<2x1x8xf32>
    %295 = arith.addf %291, %294 : vector<2x1x8xf32>
    %296 = math.rsqrt %295 : vector<2x1x8xf32>
    %297 = vector.broadcast %296 : vector<2x1x8xf32> to vector<2x8x8xf32>
    %298 = arith.mulf %293, %297 : vector<2x8x8xf32>
    %299 = vector.extract_strided_slice %256 {offsets = [0, 0, 16], sizes = [2, 8, 8], strides = [1, 1, 1]} : vector<2x8x24xf32> to vector<2x8x8xf32>
    %cst_69 = arith.constant dense<0.000000e+00> : vector<2x8xf32>
    %300 = vector.multi_reduction <add>, %299, %cst_69 [1] : vector<2x8x8xf32> to vector<2x8xf32>
    %301 = vector.shape_cast %300 : vector<2x8xf32> to vector<2x1x8xf32>
    %cst_70 = arith.constant 8.000000e+00 : f32
    %302 = vector.broadcast %cst_70 : f32 to vector<2x1x8xf32>
    %303 = arith.divf %301, %302 : vector<2x1x8xf32>
    %304 = vector.broadcast %303 : vector<2x1x8xf32> to vector<2x8x8xf32>
    %305 = arith.subf %299, %304 : vector<2x8x8xf32>
    %306 = vector.broadcast %303 : vector<2x1x8xf32> to vector<2x8x8xf32>
    %307 = arith.subf %299, %306 : vector<2x8x8xf32>
    %308 = arith.mulf %305, %307 : vector<2x8x8xf32>
    %cst_71 = arith.constant dense<0.000000e+00> : vector<2x8xf32>
    %309 = vector.multi_reduction <add>, %308, %cst_71 [1] : vector<2x8x8xf32> to vector<2x8xf32>
    %310 = vector.shape_cast %309 : vector<2x8xf32> to vector<2x1x8xf32>
    %cst_72 = arith.constant 8.000000e+00 : f32
    %311 = vector.broadcast %cst_72 : f32 to vector<2x1x8xf32>
    %312 = arith.divf %310, %311 : vector<2x1x8xf32>
    %313 = vector.broadcast %303 : vector<2x1x8xf32> to vector<2x8x8xf32>
    %314 = arith.subf %299, %313 : vector<2x8x8xf32>
    %cst_73 = arith.constant 9.99999974E-6 : f32
    %315 = vector.broadcast %cst_73 : f32 to vector<2x1x8xf32>
    %316 = arith.addf %312, %315 : vector<2x1x8xf32>
    %317 = math.rsqrt %316 : vector<2x1x8xf32>
    %318 = vector.broadcast %317 : vector<2x1x8xf32> to vector<2x8x8xf32>
    %319 = arith.mulf %314, %318 : vector<2x8x8xf32>
    "tpu.trace_start"() <{level = 10 : i32, message = "ble,bse->bls"}> : () -> ()
    %cst_74 = arith.constant dense<0.000000e+00> : vector<2x8x8xf32>
    %320 = tpu.matmul %277, %277, %cst_74 {dimension_numbers = #tpu.dot_dimension_numbers<[2], [2], [1], [1], [0, 0, 0, 1, 1, 1], [0], [0]>} : vector<2x8x8xf32>, vector<2x8x8xf32>, vector<2x8x8xf32> -> vector<2x8x8xf32>
    "tpu.trace_stop"() : () -> ()
    %cst_75 = arith.constant 0.353553385 : f32
    %321 = vector.broadcast %cst_75 : f32 to vector<2x8x8xf32>
    %322 = arith.mulf %320, %321 : vector<2x8x8xf32>
    %cst_76 = arith.constant dense<0xFF800000> : vector<8x8xf32>
    %323 = vector.multi_reduction <maximumf>, %322, %cst_76 [0] : vector<2x8x8xf32> to vector<8x8xf32>
    %324 = vector.shape_cast %323 : vector<8x8xf32> to vector<1x8x8xf32>
    %325 = vector.broadcast %324 : vector<1x8x8xf32> to vector<2x8x8xf32>
    %326 = arith.subf %322, %325 : vector<2x8x8xf32>
    %327 = math.exp %326 : vector<2x8x8xf32>
    %cst_77 = arith.constant dense<0.000000e+00> : vector<8x8xf32>
    %328 = vector.multi_reduction <add>, %327, %cst_77 [0] : vector<2x8x8xf32> to vector<8x8xf32>
    %329 = vector.shape_cast %328 : vector<8x8xf32> to vector<1x8x8xf32>
    %330 = vector.broadcast %329 : vector<1x8x8xf32> to vector<2x8x8xf32>
    %331 = arith.divf %327, %330 : vector<2x8x8xf32>
    "tpu.trace_start"() <{level = 10 : i32, message = "ble,bse->bls"}> : () -> ()
    %cst_78 = arith.constant dense<0.000000e+00> : vector<2x8x8xf32>
    %332 = tpu.matmul %298, %319, %cst_78 {dimension_numbers = #tpu.dot_dimension_numbers<[2], [2], [1], [1], [0, 0, 0, 1, 1, 1], [0], [0]>} : vector<2x8x8xf32>, vector<2x8x8xf32>, vector<2x8x8xf32> -> vector<2x8x8xf32>
    "tpu.trace_stop"() : () -> ()
    %cst_79 = arith.constant 0.353553385 : f32
    %333 = vector.broadcast %cst_79 : f32 to vector<2x8x8xf32>
    %334 = arith.mulf %332, %333 : vector<2x8x8xf32>
    %cst_80 = arith.constant dense<0xFF800000> : vector<8x8xf32>
    %335 = vector.multi_reduction <maximumf>, %334, %cst_80 [0] : vector<2x8x8xf32> to vector<8x8xf32>
    %336 = vector.shape_cast %335 : vector<8x8xf32> to vector<1x8x8xf32>
    %337 = vector.broadcast %336 : vector<1x8x8xf32> to vector<2x8x8xf32>
    %338 = arith.subf %334, %337 : vector<2x8x8xf32>
    %339 = math.exp %338 : vector<2x8x8xf32>
    %cst_81 = arith.constant dense<0.000000e+00> : vector<8x8xf32>
    %340 = vector.multi_reduction <add>, %339, %cst_81 [0] : vector<2x8x8xf32> to vector<8x8xf32>
    %341 = vector.shape_cast %340 : vector<8x8xf32> to vector<1x8x8xf32>
    %342 = vector.broadcast %341 : vector<1x8x8xf32> to vector<2x8x8xf32>
    %343 = arith.divf %339, %342 : vector<2x8x8xf32>
    %344 = vector.extract_strided_slice %230 {offsets = [0, 1, 0], sizes = [2, 7, 8], strides = [1, 1, 1]} : vector<2x8x8xf32> to vector<2x7x8xf32>
    %345 = vector.extract_strided_slice %230 {offsets = [0, 0, 0], sizes = [2, 7, 8], strides = [1, 1, 1]} : vector<2x8x8xf32> to vector<2x7x8xf32>
    %346 = arith.subf %344, %345 : vector<2x7x8xf32>
    %347 = tpu.transpose %346, [0, 2, 1] : vector<2x7x8xf32> -> vector<2x8x7xf32>
    %348 = vector.shape_cast %347 : vector<2x8x7xf32> to vector<16x7xf32>
    %cst_82 = arith.constant dense<0.000000e+00> : vector<16x35xf32>
    %349 = tpu.matmul %348, %15, %cst_82 {dimension_numbers = #tpu.dot_dimension_numbers<[1], [0], [0], [1], [0, 0, 1, 1], [], []>} : vector<16x7xf32>, vector<7x35xf32>, vector<16x35xf32> -> vector<16x35xf32>
    %350 = vector.shape_cast %349 : vector<16x35xf32> to vector<2x8x35xf32>
    %351 = vector.extract_strided_slice %350 {offsets = [0, 6, 0], sizes = [2, 2, 35], strides = [1, 1, 1]} : vector<2x8x35xf32> to vector<2x2x35xf32>
    %352 = vector.extract_strided_slice %350 {offsets = [0, 0, 0], sizes = [2, 6, 35], strides = [1, 1, 1]} : vector<2x8x35xf32> to vector<2x6x35xf32>
    %353 = tpu.concatenate %351, %352 in 1 : vector<2x2x35xf32>, vector<2x6x35xf32> -> vector<2x8x35xf32>
    %354 = vector.extract_strided_slice %353 {offsets = [0, 0, 0], sizes = [2, 8, 7], strides = [1, 1, 1]} : vector<2x8x35xf32> to vector<2x8x7xf32>
    %355 = vector.extract_strided_slice %350 {offsets = [0, 7, 0], sizes = [2, 1, 35], strides = [1, 1, 1]} : vector<2x8x35xf32> to vector<2x1x35xf32>
    %356 = vector.extract_strided_slice %350 {offsets = [0, 0, 0], sizes = [2, 7, 35], strides = [1, 1, 1]} : vector<2x8x35xf32> to vector<2x7x35xf32>
    %357 = tpu.concatenate %355, %356 in 1 : vector<2x1x35xf32>, vector<2x7x35xf32> -> vector<2x8x35xf32>
    %358 = vector.extract_strided_slice %357 {offsets = [0, 0, 7], sizes = [2, 8, 7], strides = [1, 1, 1]} : vector<2x8x35xf32> to vector<2x8x7xf32>
    %359 = arith.addf %354, %358 : vector<2x8x7xf32>
    %360 = vector.extract_strided_slice %350 {offsets = [0, 0, 14], sizes = [2, 8, 7], strides = [1, 1, 1]} : vector<2x8x35xf32> to vector<2x8x7xf32>
    %361 = arith.addf %359, %360 : vector<2x8x7xf32>
    %362 = vector.extract_strided_slice %350 {offsets = [0, 1, 0], sizes = [2, 7, 35], strides = [1, 1, 1]} : vector<2x8x35xf32> to vector<2x7x35xf32>
    %363 = vector.extract_strided_slice %350 {offsets = [0, 0, 0], sizes = [2, 1, 35], strides = [1, 1, 1]} : vector<2x8x35xf32> to vector<2x1x35xf32>
    %364 = tpu.concatenate %362, %363 in 1 : vector<2x7x35xf32>, vector<2x1x35xf32> -> vector<2x8x35xf32>
    %365 = vector.extract_strided_slice %364 {offsets = [0, 0, 21], sizes = [2, 8, 7], strides = [1, 1, 1]} : vector<2x8x35xf32> to vector<2x8x7xf32>
    %366 = arith.addf %361, %365 : vector<2x8x7xf32>
    %367 = vector.extract_strided_slice %350 {offsets = [0, 2, 0], sizes = [2, 6, 35], strides = [1, 1, 1]} : vector<2x8x35xf32> to vector<2x6x35xf32>
    %368 = vector.extract_strided_slice %350 {offsets = [0, 0, 0], sizes = [2, 2, 35], strides = [1, 1, 1]} : vector<2x8x35xf32> to vector<2x2x35xf32>
    %369 = tpu.concatenate %367, %368 in 1 : vector<2x6x35xf32>, vector<2x2x35xf32> -> vector<2x8x35xf32>
    %370 = vector.extract_strided_slice %369 {offsets = [0, 0, 28], sizes = [2, 8, 7], strides = [1, 1, 1]} : vector<2x8x35xf32> to vector<2x8x7xf32>
    %371 = arith.addf %366, %370 : vector<2x8x7xf32>
    %cst_83 = arith.constant dense<0.000000e+00> : vector<2x7xf32>
    %372 = vector.multi_reduction <add>, %371, %cst_83 [1] : vector<2x8x7xf32> to vector<2x7xf32>
    %373 = vector.shape_cast %372 : vector<2x7xf32> to vector<2x1x7xf32>
    %cst_84 = arith.constant 8.000000e+00 : f32
    %374 = vector.broadcast %cst_84 : f32 to vector<2x1x7xf32>
    %375 = arith.divf %373, %374 : vector<2x1x7xf32>
    %376 = vector.broadcast %375 : vector<2x1x7xf32> to vector<2x8x7xf32>
    %377 = arith.subf %371, %376 : vector<2x8x7xf32>
    %378 = vector.broadcast %375 : vector<2x1x7xf32> to vector<2x8x7xf32>
    %379 = arith.subf %371, %378 : vector<2x8x7xf32>
    %380 = arith.mulf %377, %379 : vector<2x8x7xf32>
    %cst_85 = arith.constant dense<0.000000e+00> : vector<2x7xf32>
    %381 = vector.multi_reduction <add>, %380, %cst_85 [1] : vector<2x8x7xf32> to vector<2x7xf32>
    %382 = vector.shape_cast %381 : vector<2x7xf32> to vector<2x1x7xf32>
    %cst_86 = arith.constant 8.000000e+00 : f32
    %383 = vector.broadcast %cst_86 : f32 to vector<2x1x7xf32>
    %384 = arith.divf %382, %383 : vector<2x1x7xf32>
    %385 = vector.broadcast %375 : vector<2x1x7xf32> to vector<2x8x7xf32>
    %386 = arith.subf %371, %385 : vector<2x8x7xf32>
    %cst_87 = arith.constant 9.99999974E-6 : f32
    %387 = vector.broadcast %cst_87 : f32 to vector<2x1x7xf32>
    %388 = arith.addf %384, %387 : vector<2x1x7xf32>
    %389 = math.rsqrt %388 : vector<2x1x7xf32>
    %390 = vector.broadcast %389 : vector<2x1x7xf32> to vector<2x8x7xf32>
    %391 = arith.mulf %386, %390 : vector<2x8x7xf32>
    "tpu.trace_start"() <{level = 10 : i32, message = "ble,bse->bls"}> : () -> ()
    %cst_88 = arith.constant dense<0.000000e+00> : vector<2x8x8xf32>
    %392 = tpu.matmul %391, %391, %cst_88 {dimension_numbers = #tpu.dot_dimension_numbers<[2], [2], [1], [1], [0, 0, 0, 1, 1, 1], [0], [0]>} : vector<2x8x7xf32>, vector<2x8x7xf32>, vector<2x8x8xf32> -> vector<2x8x8xf32>
    "tpu.trace_stop"() : () -> ()
    %cst_89 = arith.constant 0.377964467 : f32
    %393 = vector.broadcast %cst_89 : f32 to vector<2x8x8xf32>
    %394 = arith.mulf %392, %393 : vector<2x8x8xf32>
    %cst_90 = arith.constant dense<0xFF800000> : vector<8x8xf32>
    %395 = vector.multi_reduction <maximumf>, %394, %cst_90 [0] : vector<2x8x8xf32> to vector<8x8xf32>
    %396 = vector.shape_cast %395 : vector<8x8xf32> to vector<1x8x8xf32>
    %397 = vector.broadcast %396 : vector<1x8x8xf32> to vector<2x8x8xf32>
    %398 = arith.subf %394, %397 : vector<2x8x8xf32>
    %399 = math.exp %398 : vector<2x8x8xf32>
    %cst_91 = arith.constant dense<0.000000e+00> : vector<8x8xf32>
    %400 = vector.multi_reduction <add>, %399, %cst_91 [0] : vector<2x8x8xf32> to vector<8x8xf32>
    %401 = vector.shape_cast %400 : vector<8x8xf32> to vector<1x8x8xf32>
    %402 = vector.broadcast %401 : vector<1x8x8xf32> to vector<2x8x8xf32>
    %403 = arith.divf %399, %402 : vector<2x8x8xf32>
    %404 = vector.shape_cast %230 : vector<2x8x8xf32> to vector<16x8xf32>
    %cst_92 = arith.constant dense<0.000000e+00> : vector<16x8xf32>
    %405 = tpu.matmul %404, %20, %cst_92 {dimension_numbers = #tpu.dot_dimension_numbers<[1], [0], [0], [1], [0, 0, 1, 1], [], []>} : vector<16x8xf32>, vector<8x8xf32>, vector<16x8xf32> -> vector<16x8xf32>
    %406 = vector.shape_cast %405 : vector<16x8xf32> to vector<2x8x8xf32>
    "tpu.trace_start"() <{level = 10 : i32, message = "bsl,ble->bse"}> : () -> ()
    %cst_93 = arith.constant dense<0.000000e+00> : vector<2x8x8xf32>
    %407 = tpu.matmul %343, %406, %cst_93 {dimension_numbers = #tpu.dot_dimension_numbers<[2], [1], [1], [2], [0, 0, 0, 1, 1, 2], [0], [0]>} : vector<2x8x8xf32>, vector<2x8x8xf32>, vector<2x8x8xf32> -> vector<2x8x8xf32>
    "tpu.trace_stop"() : () -> ()
    %408 = vector.shape_cast %23 : vector<1x8xf32> to vector<1x1x8xf32>
    %409 = vector.broadcast %408 : vector<1x1x8xf32> to vector<2x8x8xf32>
    %410 = arith.addf %407, %409 : vector<2x8x8xf32>
    %cst_94 = arith.constant 0.000000e+00 : f32
    %411 = vector.broadcast %cst_94 : f32 to vector<2x8x8xf32>
    %412 = arith.maximumf %410, %411 : vector<2x8x8xf32>
    %413 = arith.addf %412, %230 : vector<2x8x8xf32>
    %414 = tpu.transpose %413, [0, 2, 1] : vector<2x8x8xf32> -> vector<2x8x8xf32>
    %415 = vector.shape_cast %414 : vector<2x8x8xf32> to vector<16x8xf32>
    %cst_95 = arith.constant dense<0.000000e+00> : vector<16x8xf32>
    %416 = tpu.matmul %415, %19, %cst_95 {dimension_numbers = #tpu.dot_dimension_numbers<[1], [0], [0], [1], [0, 0, 1, 1], [], []>} : vector<16x8xf32>, vector<8x8xf32>, vector<16x8xf32> -> vector<16x8xf32>
    %417 = vector.shape_cast %416 : vector<16x8xf32> to vector<2x8x8xf32>
    "tpu.trace_start"() <{level = 10 : i32, message = "bsl,ble->bse"}> : () -> ()
    %cst_96 = arith.constant dense<0.000000e+00> : vector<2x8x8xf32>
    %418 = tpu.matmul %403, %417, %cst_96 {dimension_numbers = #tpu.dot_dimension_numbers<[2], [1], [1], [2], [0, 0, 0, 1, 1, 2], [0], [0]>} : vector<2x8x8xf32>, vector<2x8x8xf32>, vector<2x8x8xf32> -> vector<2x8x8xf32>
    "tpu.trace_stop"() : () -> ()
    %419 = vector.shape_cast %22 : vector<1x8xf32> to vector<1x1x8xf32>
    %420 = vector.broadcast %419 : vector<1x1x8xf32> to vector<2x8x8xf32>
    %421 = arith.addf %418, %420 : vector<2x8x8xf32>
    %cst_97 = arith.constant 0.000000e+00 : f32
    %422 = vector.broadcast %cst_97 : f32 to vector<2x8x8xf32>
    %423 = arith.maximumf %421, %422 : vector<2x8x8xf32>
    %424 = tpu.transpose %423, [0, 2, 1] : vector<2x8x8xf32> -> vector<2x8x8xf32>
    %425 = arith.addf %424, %413 : vector<2x8x8xf32>
    %426 = vector.shape_cast %425 : vector<2x8x8xf32> to vector<16x8xf32>
    %cst_98 = arith.constant dense<0.000000e+00> : vector<16x8xf32>
    %427 = tpu.matmul %426, %18, %cst_98 {dimension_numbers = #tpu.dot_dimension_numbers<[1], [0], [0], [1], [0, 0, 1, 1], [], []>} : vector<16x8xf32>, vector<8x8xf32>, vector<16x8xf32> -> vector<16x8xf32>
    %428 = vector.shape_cast %427 : vector<16x8xf32> to vector<2x8x8xf32>
    "tpu.trace_start"() <{level = 10 : i32, message = "bsl,ble->bse"}> : () -> ()
    %cst_99 = arith.constant dense<0.000000e+00> : vector<2x8x8xf32>
    %429 = tpu.matmul %331, %428, %cst_99 {dimension_numbers = #tpu.dot_dimension_numbers<[2], [1], [1], [2], [0, 0, 0, 1, 1, 2], [0], [0]>} : vector<2x8x8xf32>, vector<2x8x8xf32>, vector<2x8x8xf32> -> vector<2x8x8xf32>
    "tpu.trace_stop"() : () -> ()
    %430 = vector.shape_cast %21 : vector<1x8xf32> to vector<1x1x8xf32>
    %431 = vector.broadcast %430 : vector<1x1x8xf32> to vector<2x8x8xf32>
    %432 = arith.addf %429, %431 : vector<2x8x8xf32>
    %cst_100 = arith.constant 0.000000e+00 : f32
    %433 = vector.broadcast %cst_100 : f32 to vector<2x8x8xf32>
    %434 = arith.maximumf %432, %433 : vector<2x8x8xf32>
    %435 = arith.addf %434, %425 : vector<2x8x8xf32>
    %436 = tpu.concatenate %229, %435 in 1 : vector<2x8x8xf32>, vector<2x8x8xf32> -> vector<2x16x8xf32>
    %c0_101 = arith.constant 0 : index
    %c0_102 = arith.constant 0 : index
    %c0_103 = arith.constant 0 : index
    %c0_104 = arith.constant 0 : index
    %437 = vector.load %arg6[%c0_101, %c0_102, %c0_103, %c0_104] : memref<1x2x16x8xf32, #tpu.memory_space<vmem>>, vector<1x2x16x8xf32>
    %438 = vector.shape_cast %437 : vector<1x2x16x8xf32> to vector<2x16x8xf32>
    %439 = vector.shape_cast %436 : vector<2x16x8xf32> to vector<1x2x16x8xf32>
    tpu.vector_store %arg6[%c0_101, %c0_102, %c0_103, %c0_104], %439 {strides = array<i32>} : memref<1x2x16x8xf32, #tpu.memory_space<vmem>>, vector<1x2x16x8xf32>,
    return
  }
  func.func @transform_0(%arg0: i32) -> (i32, i32, i32) {
    %c0_i32 = arith.constant 0 : i32
    %c0_i32_0 = arith.constant 0 : i32
    %c0_i32_1 = arith.constant 0 : i32
    %c0_i32_2 = arith.constant 0 : i32
    return %c0_i32, %c0_i32_0, %c0_i32_1 : i32, i32, i32
  }
  func.func @transform_1(%arg0: i32) -> (i32, i32, i32) {
    %c0_i32 = arith.constant 0 : i32
    %c0_i32_0 = arith.constant 0 : i32
    %c0_i32_1 = arith.constant 0 : i32
    return %arg0, %c0_i32, %c0_i32_0 : i32, i32, i32
  }
  func.func @transform_2(%arg0: i32) -> (i32, i32, i32) {
    %c0_i32 = arith.constant 0 : i32
    %c0_i32_0 = arith.constant 0 : i32
    %c0_i32_1 = arith.constant 0 : i32
    return %arg0, %c0_i32, %c0_i32_0 : i32, i32, i32
  }
  func.func @transform_3(%arg0: i32) -> (i32, i32, i32) {
    %c0_i32 = arith.constant 0 : i32
    %c0_i32_0 = arith.constant 0 : i32
    %c0_i32_1 = arith.constant 0 : i32
    return %arg0, %c0_i32, %c0_i32_0 : i32, i32, i32
  }
  func.func @transform_4(%arg0: i32) -> (i32, i32, i32) {
    %c0_i32 = arith.constant 0 : i32
    %c0_i32_0 = arith.constant 0 : i32
    %c0_i32_1 = arith.constant 0 : i32
    return %arg0, %c0_i32, %c0_i32_0 : i32, i32, i32
  }
  func.func @transform_5(%arg0: i32) -> (i32, i32, i32, i32) {
    %c0_i32 = arith.constant 0 : i32
    %c0_i32_0 = arith.constant 0 : i32
    %c0_i32_1 = arith.constant 0 : i32
    %c0_i32_2 = arith.constant 0 : i32
    return %arg0, %c0_i32, %c0_i32_0, %c0_i32_1 : i32, i32, i32, i32
  }
}

module attributes {stable_mosaic.version = 11 : i64} {
  func.func @_headproj_kernel(%arg0: i32, %arg1: memref<2x2x8x8xf32, #tpu.memory_space<vmem>>, %arg2: memref<2x8x8xf32, #tpu.memory_space<vmem>>, %arg3: memref<2x1x8xf32, #tpu.memory_space<vmem>>, %arg4: memref<2x8x4xf32, #tpu.memory_space<vmem>>, %arg5: memref<1x4xf32, #tpu.memory_space<vmem>>, %arg6: memref<2x8x4xf32, #tpu.memory_space<vmem>>) attributes {dimension_semantics = [#tpu.dimension_semantics<arbitrary>], iteration_bounds = array<i64: 1>, scalar_prefetch = 0 : i64, scratch_operands = 0 : i64, tpu.core_type = #tpu.core_type<tc>, window_params = [{pipeline_mode = #tpu.pipeline_mode<synchronous>, transform_indices = @transform_0, window_bounds = array<i64: 2, 2, 8, 8>}, {pipeline_mode = #tpu.pipeline_mode<synchronous>, transform_indices = @transform_1, window_bounds = array<i64: 2, 8, 8>}, {pipeline_mode = #tpu.pipeline_mode<synchronous>, transform_indices = @transform_2, window_bounds = array<i64: 2, 1, 8>}, {pipeline_mode = #tpu.pipeline_mode<synchronous>, transform_indices = @transform_3, window_bounds = array<i64: 2, 8, 4>}, {pipeline_mode = #tpu.pipeline_mode<synchronous>, transform_indices = @transform_4, window_bounds = array<i64: 1, 4>}, {pipeline_mode = #tpu.pipeline_mode<synchronous>, transform_indices = @transform_5, window_bounds = array<i64: 2, 8, 4>}]} {
    %c0 = arith.constant 0 : index
    %c0_0 = arith.constant 0 : index
    %0 = vector.load %arg5[%c0, %c0_0] : memref<1x4xf32, #tpu.memory_space<vmem>>, vector<1x4xf32>
    %1 = vector.shape_cast %0 : vector<1x4xf32> to vector<1x4xf32>
    %2 = vector.broadcast %1 : vector<1x4xf32> to vector<16x4xf32>
    %c0_1 = arith.constant 0 : index
    %c0_2 = arith.constant 0 : index
    %c0_3 = arith.constant 0 : index
    %c0_4 = arith.constant 0 : index
    %3 = vector.load %arg1[%c0_1, %c0_2, %c0_3, %c0_4] : memref<2x2x8x8xf32, #tpu.memory_space<vmem>>, vector<1x2x8x8xf32>
    %4 = vector.shape_cast %3 : vector<1x2x8x8xf32> to vector<2x8x8xf32>
    %5 = tpu.transpose %4, [0, 2, 1] : vector<2x8x8xf32> -> vector<2x8x8xf32>
    %6 = vector.shape_cast %5 : vector<2x8x8xf32> to vector<16x8xf32>
    %c0_5 = arith.constant 0 : index
    %c0_6 = arith.constant 0 : index
    %c0_7 = arith.constant 0 : index
    %7 = vector.load %arg2[%c0_5, %c0_6, %c0_7] : memref<2x8x8xf32, #tpu.memory_space<vmem>>, vector<1x8x8xf32>
    %8 = vector.shape_cast %7 : vector<1x8x8xf32> to vector<8x8xf32>
    %cst = arith.constant dense<0.000000e+00> : vector<16x8xf32>
    %9 = tpu.matmul %6, %8, %cst {dimension_numbers = #tpu.dot_dimension_numbers<[1], [0], [0], [1], [0, 0, 1, 1], [], []>} : vector<16x8xf32>, vector<8x8xf32>, vector<16x8xf32> -> vector<16x8xf32>
    %c0_8 = arith.constant 0 : index
    %c0_9 = arith.constant 0 : index
    %c0_10 = arith.constant 0 : index
    %10 = vector.load %arg3[%c0_8, %c0_9, %c0_10] : memref<2x1x8xf32, #tpu.memory_space<vmem>>, vector<1x1x8xf32>
    %11 = vector.shape_cast %10 : vector<1x1x8xf32> to vector<1x8xf32>
    %12 = vector.broadcast %11 : vector<1x8xf32> to vector<16x8xf32>
    %13 = arith.addf %9, %12 : vector<16x8xf32>
    %14 = vector.shape_cast %13 : vector<16x8xf32> to vector<2x8x8xf32>
    %15 = tpu.transpose %14, [0, 2, 1] : vector<2x8x8xf32> -> vector<2x8x8xf32>
    %16 = vector.shape_cast %15 : vector<2x8x8xf32> to vector<16x8xf32>
    %c0_11 = arith.constant 0 : index
    %c0_12 = arith.constant 0 : index
    %c0_13 = arith.constant 0 : index
    %17 = vector.load %arg4[%c0_11, %c0_12, %c0_13] : memref<2x8x4xf32, #tpu.memory_space<vmem>>, vector<1x8x4xf32>
    %18 = vector.shape_cast %17 : vector<1x8x4xf32> to vector<8x4xf32>
    %cst_14 = arith.constant dense<0.000000e+00> : vector<16x4xf32>
    %19 = tpu.matmul %16, %18, %cst_14 {dimension_numbers = #tpu.dot_dimension_numbers<[1], [0], [0], [1], [0, 0, 1, 1], [], []>} : vector<16x8xf32>, vector<8x4xf32>, vector<16x4xf32> -> vector<16x4xf32>
    %20 = arith.addf %2, %19 : vector<16x4xf32>
    %c1 = arith.constant 1 : index
    %c0_15 = arith.constant 0 : index
    %c0_16 = arith.constant 0 : index
    %c0_17 = arith.constant 0 : index
    %21 = vector.load %arg1[%c1, %c0_15, %c0_16, %c0_17] : memref<2x2x8x8xf32, #tpu.memory_space<vmem>>, vector<1x2x8x8xf32>
    %22 = vector.shape_cast %21 : vector<1x2x8x8xf32> to vector<2x8x8xf32>
    %23 = tpu.transpose %22, [0, 2, 1] : vector<2x8x8xf32> -> vector<2x8x8xf32>
    %24 = vector.shape_cast %23 : vector<2x8x8xf32> to vector<16x8xf32>
    %c1_18 = arith.constant 1 : index
    %c0_19 = arith.constant 0 : index
    %c0_20 = arith.constant 0 : index
    %25 = vector.load %arg2[%c1_18, %c0_19, %c0_20] : memref<2x8x8xf32, #tpu.memory_space<vmem>>, vector<1x8x8xf32>
    %26 = vector.shape_cast %25 : vector<1x8x8xf32> to vector<8x8xf32>
    %cst_21 = arith.constant dense<0.000000e+00> : vector<16x8xf32>
    %27 = tpu.matmul %24, %26, %cst_21 {dimension_numbers = #tpu.dot_dimension_numbers<[1], [0], [0], [1], [0, 0, 1, 1], [], []>} : vector<16x8xf32>, vector<8x8xf32>, vector<16x8xf32> -> vector<16x8xf32>
    %c1_22 = arith.constant 1 : index
    %c0_23 = arith.constant 0 : index
    %c0_24 = arith.constant 0 : index
    %28 = vector.load %arg3[%c1_22, %c0_23, %c0_24] : memref<2x1x8xf32, #tpu.memory_space<vmem>>, vector<1x1x8xf32>
    %29 = vector.shape_cast %28 : vector<1x1x8xf32> to vector<1x8xf32>
    %30 = vector.broadcast %29 : vector<1x8xf32> to vector<16x8xf32>
    %31 = arith.addf %27, %30 : vector<16x8xf32>
    %32 = vector.shape_cast %31 : vector<16x8xf32> to vector<2x8x8xf32>
    %33 = tpu.transpose %32, [0, 2, 1] : vector<2x8x8xf32> -> vector<2x8x8xf32>
    %34 = vector.shape_cast %33 : vector<2x8x8xf32> to vector<16x8xf32>
    %c1_25 = arith.constant 1 : index
    %c0_26 = arith.constant 0 : index
    %c0_27 = arith.constant 0 : index
    %35 = vector.load %arg4[%c1_25, %c0_26, %c0_27] : memref<2x8x4xf32, #tpu.memory_space<vmem>>, vector<1x8x4xf32>
    %36 = vector.shape_cast %35 : vector<1x8x4xf32> to vector<8x4xf32>
    %cst_28 = arith.constant dense<0.000000e+00> : vector<16x4xf32>
    %37 = tpu.matmul %34, %36, %cst_28 {dimension_numbers = #tpu.dot_dimension_numbers<[1], [0], [0], [1], [0, 0, 1, 1], [], []>} : vector<16x8xf32>, vector<8x4xf32>, vector<16x4xf32> -> vector<16x4xf32>
    %38 = arith.addf %20, %37 : vector<16x4xf32>
    %39 = vector.shape_cast %38 : vector<16x4xf32> to vector<2x8x4xf32>
    %c0_29 = arith.constant 0 : index
    %c0_30 = arith.constant 0 : index
    %c0_31 = arith.constant 0 : index
    %40 = vector.load %arg6[%c0_29, %c0_30, %c0_31] : memref<2x8x4xf32, #tpu.memory_space<vmem>>, vector<2x8x4xf32>
    tpu.vector_store %arg6[%c0_29, %c0_30, %c0_31], %39 {strides = array<i32>} : memref<2x8x4xf32, #tpu.memory_space<vmem>>, vector<2x8x4xf32>,
    return
  }
  func.func @transform_0(%arg0: i32) -> (i32, i32, i32, i32) {
    %c0_i32 = arith.constant 0 : i32
    %c0_i32_0 = arith.constant 0 : i32
    %c0_i32_1 = arith.constant 0 : i32
    %c0_i32_2 = arith.constant 0 : i32
    %c0_i32_3 = arith.constant 0 : i32
    return %c0_i32, %c0_i32_0, %c0_i32_1, %c0_i32_2 : i32, i32, i32, i32
  }
  func.func @transform_1(%arg0: i32) -> (i32, i32, i32) {
    %c0_i32 = arith.constant 0 : i32
    %c0_i32_0 = arith.constant 0 : i32
    %c0_i32_1 = arith.constant 0 : i32
    %c0_i32_2 = arith.constant 0 : i32
    return %c0_i32, %c0_i32_0, %c0_i32_1 : i32, i32, i32
  }
  func.func @transform_2(%arg0: i32) -> (i32, i32, i32) {
    %c0_i32 = arith.constant 0 : i32
    %c0_i32_0 = arith.constant 0 : i32
    %c0_i32_1 = arith.constant 0 : i32
    %c0_i32_2 = arith.constant 0 : i32
    return %c0_i32, %c0_i32_0, %c0_i32_1 : i32, i32, i32
  }
  func.func @transform_3(%arg0: i32) -> (i32, i32, i32) {
    %c0_i32 = arith.constant 0 : i32
    %c0_i32_0 = arith.constant 0 : i32
    %c0_i32_1 = arith.constant 0 : i32
    %c0_i32_2 = arith.constant 0 : i32
    return %c0_i32, %c0_i32_0, %c0_i32_1 : i32, i32, i32
  }
  func.func @transform_4(%arg0: i32) -> (i32, i32) {
    %c0_i32 = arith.constant 0 : i32
    %c0_i32_0 = arith.constant 0 : i32
    %c0_i32_1 = arith.constant 0 : i32
    return %c0_i32, %c0_i32_0 : i32, i32
  }
  func.func @transform_5(%arg0: i32) -> (i32, i32, i32) {
    %c0_i32 = arith.constant 0 : i32
    %c0_i32_0 = arith.constant 0 : i32
    %c0_i32_1 = arith.constant 0 : i32
    %c0_i32_2 = arith.constant 0 : i32
    return %c0_i32, %c0_i32_0, %c0_i32_1 : i32, i32, i32
  }
}

module attributes {stable_mosaic.version = 11 : i64} {
  func.func @_block_layerN_kernel(%arg0: i32, %arg1: memref<1x2x16x8xf32, #tpu.memory_space<vmem>>, %arg2: memref<1x23x120xf32, #tpu.memory_space<vmem>>, %arg3: memref<1x27x8xf32, #tpu.memory_space<vmem>>, %arg4: memref<1x2x8x8xf32, #tpu.memory_space<vmem>>) attributes {dimension_semantics = [#tpu.dimension_semantics<parallel>], iteration_bounds = array<i64: 2>, scalar_prefetch = 0 : i64, scratch_operands = 0 : i64, tpu.core_type = #tpu.core_type<tc>, window_params = [{transform_indices = @transform_0, window_bounds = array<i64: 1, 2, 16, 8>}, {transform_indices = @transform_1, window_bounds = array<i64: 1, 23, 120>}, {transform_indices = @transform_2, window_bounds = array<i64: 1, 27, 8>}, {transform_indices = @transform_3, window_bounds = array<i64: 1, 2, 8, 8>}]} {
    %c0 = arith.constant 0 : index
    %c0_0 = arith.constant 0 : index
    %c0_1 = arith.constant 0 : index
    %c0_2 = arith.constant 0 : index
    %0 = vector.load %arg1[%c0, %c0_0, %c0_1, %c0_2] : memref<1x2x16x8xf32, #tpu.memory_space<vmem>>, vector<1x2x16x8xf32>
    %1 = vector.shape_cast %0 : vector<1x2x16x8xf32> to vector<2x16x8xf32>
    %c0_3 = arith.constant 0 : index
    %c0_4 = arith.constant 0 : index
    %c0_5 = arith.constant 0 : index
    %2 = vector.load %arg2[%c0_3, %c0_4, %c0_5] : memref<1x23x120xf32, #tpu.memory_space<vmem>>, vector<1x23x120xf32>
    %3 = vector.shape_cast %2 : vector<1x23x120xf32> to vector<23x120xf32>
    %4 = vector.extract_strided_slice %3 {offsets = [0, 0], sizes = [16, 120], strides = [1, 1]} : vector<23x120xf32> to vector<16x120xf32>
    %5 = vector.extract_strided_slice %3 {offsets = [16, 0], sizes = [7, 35], strides = [1, 1]} : vector<23x120xf32> to vector<7x35xf32>
    %c0_6 = arith.constant 0 : index
    %c0_7 = arith.constant 0 : index
    %c0_8 = arith.constant 0 : index
    %6 = vector.load %arg3[%c0_6, %c0_7, %c0_8] : memref<1x27x8xf32, #tpu.memory_space<vmem>>, vector<1x27x8xf32>
    %7 = vector.shape_cast %6 : vector<1x27x8xf32> to vector<27x8xf32>
    %8 = vector.extract_strided_slice %7 {offsets = [0, 0], sizes = [8, 8], strides = [1, 1]} : vector<27x8xf32> to vector<8x8xf32>
    %9 = vector.extract_strided_slice %7 {offsets = [8, 0], sizes = [8, 8], strides = [1, 1]} : vector<27x8xf32> to vector<8x8xf32>
    %10 = vector.extract_strided_slice %7 {offsets = [16, 0], sizes = [8, 8], strides = [1, 1]} : vector<27x8xf32> to vector<8x8xf32>
    %11 = vector.extract_strided_slice %7 {offsets = [24, 0], sizes = [1, 8], strides = [1, 1]} : vector<27x8xf32> to vector<1x8xf32>
    %12 = vector.extract_strided_slice %7 {offsets = [25, 0], sizes = [1, 8], strides = [1, 1]} : vector<27x8xf32> to vector<1x8xf32>
    %13 = vector.extract_strided_slice %7 {offsets = [26, 0], sizes = [1, 8], strides = [1, 1]} : vector<27x8xf32> to vector<1x8xf32>
    %14 = vector.extract_strided_slice %1 {offsets = [0, 0, 0], sizes = [2, 8, 8], strides = [1, 1, 1]} : vector<2x16x8xf32> to vector<2x8x8xf32>
    %15 = vector.extract_strided_slice %1 {offsets = [0, 8, 0], sizes = [2, 8, 8], strides = [1, 1, 1]} : vector<2x16x8xf32> to vector<2x8x8xf32>
    %16 = tpu.concatenate %14, %15 in 2 : vector<2x8x8xf32>, vector<2x8x8xf32> -> vector<2x8x16xf32>
    %17 = vector.shape_cast %16 : vector<2x8x16xf32> to vector<16x16xf32>
    %cst = arith.constant dense<0.000000e+00> : vector<16x120xf32>
    %18 = tpu.matmul %17, %4, %cst {dimension_numbers = #tpu.dot_dimension_numbers<[1], [0], [0], [1], [0, 0, 1, 1], [], []>} : vector<16x16xf32>, vector<16x120xf32>, vector<16x120xf32> -> vector<16x120xf32>
    %19 = vector.shape_cast %18 : vector<16x120xf32> to vector<2x8x120xf32>
    %20 = vector.extract_strided_slice %19 {offsets = [0, 6, 0], sizes = [2, 2, 120], strides = [1, 1, 1]} : vector<2x8x120xf32> to vector<2x2x120xf32>
    %21 = vector.extract_strided_slice %19 {offsets = [0, 0, 0], sizes = [2, 6, 120], strides = [1, 1, 1]} : vector<2x8x120xf32> to vector<2x6x120xf32>
    %22 = tpu.concatenate %20, %21 in 1 : vector<2x2x120xf32>, vector<2x6x120xf32> -> vector<2x8x120xf32>
    %23 = vector.extract_strided_slice %22 {offsets = [0, 0, 0], sizes = [2, 8, 24], strides = [1, 1, 1]} : vector<2x8x120xf32> to vector<2x8x24xf32>
    %24 = vector.extract_strided_slice %19 {offsets = [0, 7, 0], sizes = [2, 1, 120], strides = [1, 1, 1]} : vector<2x8x120xf32> to vector<2x1x120xf32>
    %25 = vector.extract_strided_slice %19 {offsets = [0, 0, 0], sizes = [2, 7, 120], strides = [1, 1, 1]} : vector<2x8x120xf32> to vector<2x7x120xf32>
    %26 = tpu.concatenate %24, %25 in 1 : vector<2x1x120xf32>, vector<2x7x120xf32> -> vector<2x8x120xf32>
    %27 = vector.extract_strided_slice %26 {offsets = [0, 0, 24], sizes = [2, 8, 24], strides = [1, 1, 1]} : vector<2x8x120xf32> to vector<2x8x24xf32>
    %28 = arith.addf %23, %27 : vector<2x8x24xf32>
    %29 = vector.extract_strided_slice %19 {offsets = [0, 0, 48], sizes = [2, 8, 24], strides = [1, 1, 1]} : vector<2x8x120xf32> to vector<2x8x24xf32>
    %30 = arith.addf %28, %29 : vector<2x8x24xf32>
    %31 = vector.extract_strided_slice %19 {offsets = [0, 1, 0], sizes = [2, 7, 120], strides = [1, 1, 1]} : vector<2x8x120xf32> to vector<2x7x120xf32>
    %32 = vector.extract_strided_slice %19 {offsets = [0, 0, 0], sizes = [2, 1, 120], strides = [1, 1, 1]} : vector<2x8x120xf32> to vector<2x1x120xf32>
    %33 = tpu.concatenate %31, %32 in 1 : vector<2x7x120xf32>, vector<2x1x120xf32> -> vector<2x8x120xf32>
    %34 = vector.extract_strided_slice %33 {offsets = [0, 0, 72], sizes = [2, 8, 24], strides = [1, 1, 1]} : vector<2x8x120xf32> to vector<2x8x24xf32>
    %35 = arith.addf %30, %34 : vector<2x8x24xf32>
    %36 = vector.extract_strided_slice %19 {offsets = [0, 2, 0], sizes = [2, 6, 120], strides = [1, 1, 1]} : vector<2x8x120xf32> to vector<2x6x120xf32>
    %37 = vector.extract_strided_slice %19 {offsets = [0, 0, 0], sizes = [2, 2, 120], strides = [1, 1, 1]} : vector<2x8x120xf32> to vector<2x2x120xf32>
    %38 = tpu.concatenate %36, %37 in 1 : vector<2x6x120xf32>, vector<2x2x120xf32> -> vector<2x8x120xf32>
    %39 = vector.extract_strided_slice %38 {offsets = [0, 0, 96], sizes = [2, 8, 24], strides = [1, 1, 1]} : vector<2x8x120xf32> to vector<2x8x24xf32>
    %40 = arith.addf %35, %39 : vector<2x8x24xf32>
    %41 = vector.extract_strided_slice %40 {offsets = [0, 0, 0], sizes = [2, 8, 8], strides = [1, 1, 1]} : vector<2x8x24xf32> to vector<2x8x8xf32>
    %cst_9 = arith.constant dense<0.000000e+00> : vector<2x8xf32>
    %42 = vector.multi_reduction <add>, %41, %cst_9 [1] : vector<2x8x8xf32> to vector<2x8xf32>
    %43 = vector.shape_cast %42 : vector<2x8xf32> to vector<2x1x8xf32>
    %cst_10 = arith.constant 8.000000e+00 : f32
    %44 = vector.broadcast %cst_10 : f32 to vector<2x1x8xf32>
    %45 = arith.divf %43, %44 : vector<2x1x8xf32>
    %46 = vector.broadcast %45 : vector<2x1x8xf32> to vector<2x8x8xf32>
    %47 = arith.subf %41, %46 : vector<2x8x8xf32>
    %48 = vector.broadcast %45 : vector<2x1x8xf32> to vector<2x8x8xf32>
    %49 = arith.subf %41, %48 : vector<2x8x8xf32>
    %50 = arith.mulf %47, %49 : vector<2x8x8xf32>
    %cst_11 = arith.constant dense<0.000000e+00> : vector<2x8xf32>
    %51 = vector.multi_reduction <add>, %50, %cst_11 [1] : vector<2x8x8xf32> to vector<2x8xf32>
    %52 = vector.shape_cast %51 : vector<2x8xf32> to vector<2x1x8xf32>
    %cst_12 = arith.constant 8.000000e+00 : f32
    %53 = vector.broadcast %cst_12 : f32 to vector<2x1x8xf32>
    %54 = arith.divf %52, %53 : vector<2x1x8xf32>
    %55 = vector.broadcast %45 : vector<2x1x8xf32> to vector<2x8x8xf32>
    %56 = arith.subf %41, %55 : vector<2x8x8xf32>
    %cst_13 = arith.constant 9.99999974E-6 : f32
    %57 = vector.broadcast %cst_13 : f32 to vector<2x1x8xf32>
    %58 = arith.addf %54, %57 : vector<2x1x8xf32>
    %59 = math.rsqrt %58 : vector<2x1x8xf32>
    %60 = vector.broadcast %59 : vector<2x1x8xf32> to vector<2x8x8xf32>
    %61 = arith.mulf %56, %60 : vector<2x8x8xf32>
    %62 = vector.extract_strided_slice %40 {offsets = [0, 0, 8], sizes = [2, 8, 8], strides = [1, 1, 1]} : vector<2x8x24xf32> to vector<2x8x8xf32>
    %cst_14 = arith.constant dense<0.000000e+00> : vector<2x8xf32>
    %63 = vector.multi_reduction <add>, %62, %cst_14 [1] : vector<2x8x8xf32> to vector<2x8xf32>
    %64 = vector.shape_cast %63 : vector<2x8xf32> to vector<2x1x8xf32>
    %cst_15 = arith.constant 8.000000e+00 : f32
    %65 = vector.broadcast %cst_15 : f32 to vector<2x1x8xf32>
    %66 = arith.divf %64, %65 : vector<2x1x8xf32>
    %67 = vector.broadcast %66 : vector<2x1x8xf32> to vector<2x8x8xf32>
    %68 = arith.subf %62, %67 : vector<2x8x8xf32>
    %69 = vector.broadcast %66 : vector<2x1x8xf32> to vector<2x8x8xf32>
    %70 = arith.subf %62, %69 : vector<2x8x8xf32>
    %71 = arith.mulf %68, %70 : vector<2x8x8xf32>
    %cst_16 = arith.constant dense<0.000000e+00> : vector<2x8xf32>
    %72 = vector.multi_reduction <add>, %71, %cst_16 [1] : vector<2x8x8xf32> to vector<2x8xf32>
    %73 = vector.shape_cast %72 : vector<2x8xf32> to vector<2x1x8xf32>
    %cst_17 = arith.constant 8.000000e+00 : f32
    %74 = vector.broadcast %cst_17 : f32 to vector<2x1x8xf32>
    %75 = arith.divf %73, %74 : vector<2x1x8xf32>
    %76 = vector.broadcast %66 : vector<2x1x8xf32> to vector<2x8x8xf32>
    %77 = arith.subf %62, %76 : vector<2x8x8xf32>
    %cst_18 = arith.constant 9.99999974E-6 : f32
    %78 = vector.broadcast %cst_18 : f32 to vector<2x1x8xf32>
    %79 = arith.addf %75, %78 : vector<2x1x8xf32>
    %80 = math.rsqrt %79 : vector<2x1x8xf32>
    %81 = vector.broadcast %80 : vector<2x1x8xf32> to vector<2x8x8xf32>
    %82 = arith.mulf %77, %81 : vector<2x8x8xf32>
    %83 = vector.extract_strided_slice %40 {offsets = [0, 0, 16], sizes = [2, 8, 8], strides = [1, 1, 1]} : vector<2x8x24xf32> to vector<2x8x8xf32>
    %cst_19 = arith.constant dense<0.000000e+00> : vector<2x8xf32>
    %84 = vector.multi_reduction <add>, %83, %cst_19 [1] : vector<2x8x8xf32> to vector<2x8xf32>
    %85 = vector.shape_cast %84 : vector<2x8xf32> to vector<2x1x8xf32>
    %cst_20 = arith.constant 8.000000e+00 : f32
    %86 = vector.broadcast %cst_20 : f32 to vector<2x1x8xf32>
    %87 = arith.divf %85, %86 : vector<2x1x8xf32>
    %88 = vector.broadcast %87 : vector<2x1x8xf32> to vector<2x8x8xf32>
    %89 = arith.subf %83, %88 : vector<2x8x8xf32>
    %90 = vector.broadcast %87 : vector<2x1x8xf32> to vector<2x8x8xf32>
    %91 = arith.subf %83, %90 : vector<2x8x8xf32>
    %92 = arith.mulf %89, %91 : vector<2x8x8xf32>
    %cst_21 = arith.constant dense<0.000000e+00> : vector<2x8xf32>
    %93 = vector.multi_reduction <add>, %92, %cst_21 [1] : vector<2x8x8xf32> to vector<2x8xf32>
    %94 = vector.shape_cast %93 : vector<2x8xf32> to vector<2x1x8xf32>
    %cst_22 = arith.constant 8.000000e+00 : f32
    %95 = vector.broadcast %cst_22 : f32 to vector<2x1x8xf32>
    %96 = arith.divf %94, %95 : vector<2x1x8xf32>
    %97 = vector.broadcast %87 : vector<2x1x8xf32> to vector<2x8x8xf32>
    %98 = arith.subf %83, %97 : vector<2x8x8xf32>
    %cst_23 = arith.constant 9.99999974E-6 : f32
    %99 = vector.broadcast %cst_23 : f32 to vector<2x1x8xf32>
    %100 = arith.addf %96, %99 : vector<2x1x8xf32>
    %101 = math.rsqrt %100 : vector<2x1x8xf32>
    %102 = vector.broadcast %101 : vector<2x1x8xf32> to vector<2x8x8xf32>
    %103 = arith.mulf %98, %102 : vector<2x8x8xf32>
    "tpu.trace_start"() <{level = 10 : i32, message = "ble,bse->bls"}> : () -> ()
    %cst_24 = arith.constant dense<0.000000e+00> : vector<2x8x8xf32>
    %104 = tpu.matmul %61, %61, %cst_24 {dimension_numbers = #tpu.dot_dimension_numbers<[2], [2], [1], [1], [0, 0, 0, 1, 1, 1], [0], [0]>} : vector<2x8x8xf32>, vector<2x8x8xf32>, vector<2x8x8xf32> -> vector<2x8x8xf32>
    "tpu.trace_stop"() : () -> ()
    %cst_25 = arith.constant 0.353553385 : f32
    %105 = vector.broadcast %cst_25 : f32 to vector<2x8x8xf32>
    %106 = arith.mulf %104, %105 : vector<2x8x8xf32>
    %cst_26 = arith.constant dense<0xFF800000> : vector<8x8xf32>
    %107 = vector.multi_reduction <maximumf>, %106, %cst_26 [0] : vector<2x8x8xf32> to vector<8x8xf32>
    %108 = vector.shape_cast %107 : vector<8x8xf32> to vector<1x8x8xf32>
    %109 = vector.broadcast %108 : vector<1x8x8xf32> to vector<2x8x8xf32>
    %110 = arith.subf %106, %109 : vector<2x8x8xf32>
    %111 = math.exp %110 : vector<2x8x8xf32>
    %cst_27 = arith.constant dense<0.000000e+00> : vector<8x8xf32>
    %112 = vector.multi_reduction <add>, %111, %cst_27 [0] : vector<2x8x8xf32> to vector<8x8xf32>
    %113 = vector.shape_cast %112 : vector<8x8xf32> to vector<1x8x8xf32>
    %114 = vector.broadcast %113 : vector<1x8x8xf32> to vector<2x8x8xf32>
    %115 = arith.divf %111, %114 : vector<2x8x8xf32>
    "tpu.trace_start"() <{level = 10 : i32, message = "ble,bse->bls"}> : () -> ()
    %cst_28 = arith.constant dense<0.000000e+00> : vector<2x8x8xf32>
    %116 = tpu.matmul %82, %103, %cst_28 {dimension_numbers = #tpu.dot_dimension_numbers<[2], [2], [1], [1], [0, 0, 0, 1, 1, 1], [0], [0]>} : vector<2x8x8xf32>, vector<2x8x8xf32>, vector<2x8x8xf32> -> vector<2x8x8xf32>
    "tpu.trace_stop"() : () -> ()
    %cst_29 = arith.constant 0.353553385 : f32
    %117 = vector.broadcast %cst_29 : f32 to vector<2x8x8xf32>
    %118 = arith.mulf %116, %117 : vector<2x8x8xf32>
    %cst_30 = arith.constant dense<0xFF800000> : vector<8x8xf32>
    %119 = vector.multi_reduction <maximumf>, %118, %cst_30 [0] : vector<2x8x8xf32> to vector<8x8xf32>
    %120 = vector.shape_cast %119 : vector<8x8xf32> to vector<1x8x8xf32>
    %121 = vector.broadcast %120 : vector<1x8x8xf32> to vector<2x8x8xf32>
    %122 = arith.subf %118, %121 : vector<2x8x8xf32>
    %123 = math.exp %122 : vector<2x8x8xf32>
    %cst_31 = arith.constant dense<0.000000e+00> : vector<8x8xf32>
    %124 = vector.multi_reduction <add>, %123, %cst_31 [0] : vector<2x8x8xf32> to vector<8x8xf32>
    %125 = vector.shape_cast %124 : vector<8x8xf32> to vector<1x8x8xf32>
    %126 = vector.broadcast %125 : vector<1x8x8xf32> to vector<2x8x8xf32>
    %127 = arith.divf %123, %126 : vector<2x8x8xf32>
    %128 = vector.extract_strided_slice %14 {offsets = [0, 1, 0], sizes = [2, 7, 8], strides = [1, 1, 1]} : vector<2x8x8xf32> to vector<2x7x8xf32>
    %129 = vector.extract_strided_slice %14 {offsets = [0, 0, 0], sizes = [2, 7, 8], strides = [1, 1, 1]} : vector<2x8x8xf32> to vector<2x7x8xf32>
    %130 = arith.subf %128, %129 : vector<2x7x8xf32>
    %131 = tpu.transpose %130, [0, 2, 1] : vector<2x7x8xf32> -> vector<2x8x7xf32>
    %132 = vector.shape_cast %131 : vector<2x8x7xf32> to vector<16x7xf32>
    %cst_32 = arith.constant dense<0.000000e+00> : vector<16x35xf32>
    %133 = tpu.matmul %132, %5, %cst_32 {dimension_numbers = #tpu.dot_dimension_numbers<[1], [0], [0], [1], [0, 0, 1, 1], [], []>} : vector<16x7xf32>, vector<7x35xf32>, vector<16x35xf32> -> vector<16x35xf32>
    %134 = vector.shape_cast %133 : vector<16x35xf32> to vector<2x8x35xf32>
    %135 = vector.extract_strided_slice %134 {offsets = [0, 6, 0], sizes = [2, 2, 35], strides = [1, 1, 1]} : vector<2x8x35xf32> to vector<2x2x35xf32>
    %136 = vector.extract_strided_slice %134 {offsets = [0, 0, 0], sizes = [2, 6, 35], strides = [1, 1, 1]} : vector<2x8x35xf32> to vector<2x6x35xf32>
    %137 = tpu.concatenate %135, %136 in 1 : vector<2x2x35xf32>, vector<2x6x35xf32> -> vector<2x8x35xf32>
    %138 = vector.extract_strided_slice %137 {offsets = [0, 0, 0], sizes = [2, 8, 7], strides = [1, 1, 1]} : vector<2x8x35xf32> to vector<2x8x7xf32>
    %139 = vector.extract_strided_slice %134 {offsets = [0, 7, 0], sizes = [2, 1, 35], strides = [1, 1, 1]} : vector<2x8x35xf32> to vector<2x1x35xf32>
    %140 = vector.extract_strided_slice %134 {offsets = [0, 0, 0], sizes = [2, 7, 35], strides = [1, 1, 1]} : vector<2x8x35xf32> to vector<2x7x35xf32>
    %141 = tpu.concatenate %139, %140 in 1 : vector<2x1x35xf32>, vector<2x7x35xf32> -> vector<2x8x35xf32>
    %142 = vector.extract_strided_slice %141 {offsets = [0, 0, 7], sizes = [2, 8, 7], strides = [1, 1, 1]} : vector<2x8x35xf32> to vector<2x8x7xf32>
    %143 = arith.addf %138, %142 : vector<2x8x7xf32>
    %144 = vector.extract_strided_slice %134 {offsets = [0, 0, 14], sizes = [2, 8, 7], strides = [1, 1, 1]} : vector<2x8x35xf32> to vector<2x8x7xf32>
    %145 = arith.addf %143, %144 : vector<2x8x7xf32>
    %146 = vector.extract_strided_slice %134 {offsets = [0, 1, 0], sizes = [2, 7, 35], strides = [1, 1, 1]} : vector<2x8x35xf32> to vector<2x7x35xf32>
    %147 = vector.extract_strided_slice %134 {offsets = [0, 0, 0], sizes = [2, 1, 35], strides = [1, 1, 1]} : vector<2x8x35xf32> to vector<2x1x35xf32>
    %148 = tpu.concatenate %146, %147 in 1 : vector<2x7x35xf32>, vector<2x1x35xf32> -> vector<2x8x35xf32>
    %149 = vector.extract_strided_slice %148 {offsets = [0, 0, 21], sizes = [2, 8, 7], strides = [1, 1, 1]} : vector<2x8x35xf32> to vector<2x8x7xf32>
    %150 = arith.addf %145, %149 : vector<2x8x7xf32>
    %151 = vector.extract_strided_slice %134 {offsets = [0, 2, 0], sizes = [2, 6, 35], strides = [1, 1, 1]} : vector<2x8x35xf32> to vector<2x6x35xf32>
    %152 = vector.extract_strided_slice %134 {offsets = [0, 0, 0], sizes = [2, 2, 35], strides = [1, 1, 1]} : vector<2x8x35xf32> to vector<2x2x35xf32>
    %153 = tpu.concatenate %151, %152 in 1 : vector<2x6x35xf32>, vector<2x2x35xf32> -> vector<2x8x35xf32>
    %154 = vector.extract_strided_slice %153 {offsets = [0, 0, 28], sizes = [2, 8, 7], strides = [1, 1, 1]} : vector<2x8x35xf32> to vector<2x8x7xf32>
    %155 = arith.addf %150, %154 : vector<2x8x7xf32>
    %cst_33 = arith.constant dense<0.000000e+00> : vector<2x7xf32>
    %156 = vector.multi_reduction <add>, %155, %cst_33 [1] : vector<2x8x7xf32> to vector<2x7xf32>
    %157 = vector.shape_cast %156 : vector<2x7xf32> to vector<2x1x7xf32>
    %cst_34 = arith.constant 8.000000e+00 : f32
    %158 = vector.broadcast %cst_34 : f32 to vector<2x1x7xf32>
    %159 = arith.divf %157, %158 : vector<2x1x7xf32>
    %160 = vector.broadcast %159 : vector<2x1x7xf32> to vector<2x8x7xf32>
    %161 = arith.subf %155, %160 : vector<2x8x7xf32>
    %162 = vector.broadcast %159 : vector<2x1x7xf32> to vector<2x8x7xf32>
    %163 = arith.subf %155, %162 : vector<2x8x7xf32>
    %164 = arith.mulf %161, %163 : vector<2x8x7xf32>
    %cst_35 = arith.constant dense<0.000000e+00> : vector<2x7xf32>
    %165 = vector.multi_reduction <add>, %164, %cst_35 [1] : vector<2x8x7xf32> to vector<2x7xf32>
    %166 = vector.shape_cast %165 : vector<2x7xf32> to vector<2x1x7xf32>
    %cst_36 = arith.constant 8.000000e+00 : f32
    %167 = vector.broadcast %cst_36 : f32 to vector<2x1x7xf32>
    %168 = arith.divf %166, %167 : vector<2x1x7xf32>
    %169 = vector.broadcast %159 : vector<2x1x7xf32> to vector<2x8x7xf32>
    %170 = arith.subf %155, %169 : vector<2x8x7xf32>
    %cst_37 = arith.constant 9.99999974E-6 : f32
    %171 = vector.broadcast %cst_37 : f32 to vector<2x1x7xf32>
    %172 = arith.addf %168, %171 : vector<2x1x7xf32>
    %173 = math.rsqrt %172 : vector<2x1x7xf32>
    %174 = vector.broadcast %173 : vector<2x1x7xf32> to vector<2x8x7xf32>
    %175 = arith.mulf %170, %174 : vector<2x8x7xf32>
    "tpu.trace_start"() <{level = 10 : i32, message = "ble,bse->bls"}> : () -> ()
    %cst_38 = arith.constant dense<0.000000e+00> : vector<2x8x8xf32>
    %176 = tpu.matmul %175, %175, %cst_38 {dimension_numbers = #tpu.dot_dimension_numbers<[2], [2], [1], [1], [0, 0, 0, 1, 1, 1], [0], [0]>} : vector<2x8x7xf32>, vector<2x8x7xf32>, vector<2x8x8xf32> -> vector<2x8x8xf32>
    "tpu.trace_stop"() : () -> ()
    %cst_39 = arith.constant 0.377964467 : f32
    %177 = vector.broadcast %cst_39 : f32 to vector<2x8x8xf32>
    %178 = arith.mulf %176, %177 : vector<2x8x8xf32>
    %cst_40 = arith.constant dense<0xFF800000> : vector<8x8xf32>
    %179 = vector.multi_reduction <maximumf>, %178, %cst_40 [0] : vector<2x8x8xf32> to vector<8x8xf32>
    %180 = vector.shape_cast %179 : vector<8x8xf32> to vector<1x8x8xf32>
    %181 = vector.broadcast %180 : vector<1x8x8xf32> to vector<2x8x8xf32>
    %182 = arith.subf %178, %181 : vector<2x8x8xf32>
    %183 = math.exp %182 : vector<2x8x8xf32>
    %cst_41 = arith.constant dense<0.000000e+00> : vector<8x8xf32>
    %184 = vector.multi_reduction <add>, %183, %cst_41 [0] : vector<2x8x8xf32> to vector<8x8xf32>
    %185 = vector.shape_cast %184 : vector<8x8xf32> to vector<1x8x8xf32>
    %186 = vector.broadcast %185 : vector<1x8x8xf32> to vector<2x8x8xf32>
    %187 = arith.divf %183, %186 : vector<2x8x8xf32>
    %188 = vector.shape_cast %14 : vector<2x8x8xf32> to vector<16x8xf32>
    %cst_42 = arith.constant dense<0.000000e+00> : vector<16x8xf32>
    %189 = tpu.matmul %188, %10, %cst_42 {dimension_numbers = #tpu.dot_dimension_numbers<[1], [0], [0], [1], [0, 0, 1, 1], [], []>} : vector<16x8xf32>, vector<8x8xf32>, vector<16x8xf32> -> vector<16x8xf32>
    %190 = vector.shape_cast %189 : vector<16x8xf32> to vector<2x8x8xf32>
    "tpu.trace_start"() <{level = 10 : i32, message = "bsl,ble->bse"}> : () -> ()
    %cst_43 = arith.constant dense<0.000000e+00> : vector<2x8x8xf32>
    %191 = tpu.matmul %127, %190, %cst_43 {dimension_numbers = #tpu.dot_dimension_numbers<[2], [1], [1], [2], [0, 0, 0, 1, 1, 2], [0], [0]>} : vector<2x8x8xf32>, vector<2x8x8xf32>, vector<2x8x8xf32> -> vector<2x8x8xf32>
    "tpu.trace_stop"() : () -> ()
    %192 = vector.shape_cast %13 : vector<1x8xf32> to vector<1x1x8xf32>
    %193 = vector.broadcast %192 : vector<1x1x8xf32> to vector<2x8x8xf32>
    %194 = arith.addf %191, %193 : vector<2x8x8xf32>
    %cst_44 = arith.constant 0.000000e+00 : f32
    %195 = vector.broadcast %cst_44 : f32 to vector<2x8x8xf32>
    %196 = arith.maximumf %194, %195 : vector<2x8x8xf32>
    %197 = arith.addf %196, %14 : vector<2x8x8xf32>
    %198 = tpu.transpose %197, [0, 2, 1] : vector<2x8x8xf32> -> vector<2x8x8xf32>
    %199 = vector.shape_cast %198 : vector<2x8x8xf32> to vector<16x8xf32>
    %cst_45 = arith.constant dense<0.000000e+00> : vector<16x8xf32>
    %200 = tpu.matmul %199, %9, %cst_45 {dimension_numbers = #tpu.dot_dimension_numbers<[1], [0], [0], [1], [0, 0, 1, 1], [], []>} : vector<16x8xf32>, vector<8x8xf32>, vector<16x8xf32> -> vector<16x8xf32>
    %201 = vector.shape_cast %200 : vector<16x8xf32> to vector<2x8x8xf32>
    "tpu.trace_start"() <{level = 10 : i32, message = "bsl,ble->bse"}> : () -> ()
    %cst_46 = arith.constant dense<0.000000e+00> : vector<2x8x8xf32>
    %202 = tpu.matmul %187, %201, %cst_46 {dimension_numbers = #tpu.dot_dimension_numbers<[2], [1], [1], [2], [0, 0, 0, 1, 1, 2], [0], [0]>} : vector<2x8x8xf32>, vector<2x8x8xf32>, vector<2x8x8xf32> -> vector<2x8x8xf32>
    "tpu.trace_stop"() : () -> ()
    %203 = vector.shape_cast %12 : vector<1x8xf32> to vector<1x1x8xf32>
    %204 = vector.broadcast %203 : vector<1x1x8xf32> to vector<2x8x8xf32>
    %205 = arith.addf %202, %204 : vector<2x8x8xf32>
    %cst_47 = arith.constant 0.000000e+00 : f32
    %206 = vector.broadcast %cst_47 : f32 to vector<2x8x8xf32>
    %207 = arith.maximumf %205, %206 : vector<2x8x8xf32>
    %208 = tpu.transpose %207, [0, 2, 1] : vector<2x8x8xf32> -> vector<2x8x8xf32>
    %209 = arith.addf %208, %197 : vector<2x8x8xf32>
    %210 = vector.shape_cast %209 : vector<2x8x8xf32> to vector<16x8xf32>
    %cst_48 = arith.constant dense<0.000000e+00> : vector<16x8xf32>
    %211 = tpu.matmul %210, %8, %cst_48 {dimension_numbers = #tpu.dot_dimension_numbers<[1], [0], [0], [1], [0, 0, 1, 1], [], []>} : vector<16x8xf32>, vector<8x8xf32>, vector<16x8xf32> -> vector<16x8xf32>
    %212 = vector.shape_cast %211 : vector<16x8xf32> to vector<2x8x8xf32>
    "tpu.trace_start"() <{level = 10 : i32, message = "bsl,ble->bse"}> : () -> ()
    %cst_49 = arith.constant dense<0.000000e+00> : vector<2x8x8xf32>
    %213 = tpu.matmul %115, %212, %cst_49 {dimension_numbers = #tpu.dot_dimension_numbers<[2], [1], [1], [2], [0, 0, 0, 1, 1, 2], [0], [0]>} : vector<2x8x8xf32>, vector<2x8x8xf32>, vector<2x8x8xf32> -> vector<2x8x8xf32>
    "tpu.trace_stop"() : () -> ()
    %214 = vector.shape_cast %11 : vector<1x8xf32> to vector<1x1x8xf32>
    %215 = vector.broadcast %214 : vector<1x1x8xf32> to vector<2x8x8xf32>
    %216 = arith.addf %213, %215 : vector<2x8x8xf32>
    %cst_50 = arith.constant 0.000000e+00 : f32
    %217 = vector.broadcast %cst_50 : f32 to vector<2x8x8xf32>
    %218 = arith.maximumf %216, %217 : vector<2x8x8xf32>
    %219 = arith.addf %218, %209 : vector<2x8x8xf32>
    %c0_51 = arith.constant 0 : index
    %c0_52 = arith.constant 0 : index
    %c0_53 = arith.constant 0 : index
    %c0_54 = arith.constant 0 : index
    %220 = vector.load %arg4[%c0_51, %c0_52, %c0_53, %c0_54] : memref<1x2x8x8xf32, #tpu.memory_space<vmem>>, vector<1x2x8x8xf32>
    %221 = vector.shape_cast %220 : vector<1x2x8x8xf32> to vector<2x8x8xf32>
    %222 = vector.shape_cast %219 : vector<2x8x8xf32> to vector<1x2x8x8xf32>
    tpu.vector_store %arg4[%c0_51, %c0_52, %c0_53, %c0_54], %222 {strides = array<i32>} : memref<1x2x8x8xf32, #tpu.memory_space<vmem>>, vector<1x2x8x8xf32>,
    return
  }
  func.func @transform_0(%arg0: i32) -> (i32, i32, i32, i32) {
    %c0_i32 = arith.constant 0 : i32
    %c0_i32_0 = arith.constant 0 : i32
    %c0_i32_1 = arith.constant 0 : i32
    %c0_i32_2 = arith.constant 0 : i32
    return %arg0, %c0_i32, %c0_i32_0, %c0_i32_1 : i32, i32, i32, i32
  }
  func.func @transform_1(%arg0: i32) -> (i32, i32, i32) {
    %c0_i32 = arith.constant 0 : i32
    %c0_i32_0 = arith.constant 0 : i32
    %c0_i32_1 = arith.constant 0 : i32
    return %arg0, %c0_i32, %c0_i32_0 : i32, i32, i32
  }
  func.func @transform_2(%arg0: i32) -> (i32, i32, i32) {
    %c0_i32 = arith.constant 0 : i32
    %c0_i32_0 = arith.constant 0 : i32
    %c0_i32_1 = arith.constant 0 : i32
    return %arg0, %c0_i32, %c0_i32_0 : i32, i32, i32
  }
  func.func @transform_3(%arg0: i32) -> (i32, i32, i32, i32) {
    %c0_i32 = arith.constant 0 : i32
    %c0_i32_0 = arith.constant 0 : i32
    %c0_i32_1 = arith.constant 0 : i32
    %c0_i32_2 = arith.constant 0 : i32
    return %arg0, %c0_i32, %c0_i32_0, %c0_i32_1 : i32, i32, i32, i32
  }
}

</mosaic_0001>

<bundles_post_ra>
// kernel: forward.5
= control target key start
LH: loop header
LB: loop body
LE: loop exit
PB: predicated region body
PF: predicated region fallthrough
CT: control target
= control target key end

     0   :  { %vm95_vm0 = vcmask 64512   ;;  %vm421_vm1 = vcmask 31744   ;;  %s522_s0 = inlined_call_operand.vmem [shape: f32[2,2,8,8], index: 0, kind: input, shape index: {}]   ;;  %s523_s1 = inlined_call_operand.vmem [shape: f32[2,8,8], index: 1, kind: input, shape index: {}]   ;;  %s524_s2 = inlined_call_operand.vmem [shape: f32[2,1,8], index: 2, kind: input, shape index: {}]   ;;  %s525_s4 = inlined_call_operand.vmem [shape: f32[1,4], index: 4, kind: input, shape index: {}]   ;;  %s526_s3 = inlined_call_operand.vmem [shape: f32[2,8,4], index: 3, kind: input, shape index: {}]   ;;  %s527_s5 = inlined_call_operand.vmem [shape: f32[2,8,4], index: 5, kind: output, shape index: {}]  }
   0x1   :  { %v432_v0 = vld [vmem:[%s522_s0 + $0x10] sm:$0xff]  ;;  %v24_v1 = vld [vmem:[%s522_s0] sm:$0xff]  ;;  %v434_v2 = vld [vmem:[%s523_s1 + $0x8] sm:$0xff] }
   0x2   :  { %224 = vxpose.xlu0.b32.start.end [1/1] (short) (narrow) %v432_v0, 8  ;;  %26 = vxpose.xlu1.b32.start.end [1/1] (short) (narrow) %v24_v1, 8  ;;  %v433_v3 = vld [vmem:[%s522_s0 + $0x18] sm:$0xff]  ;;  %v25_v4 = vld [vmem:[%s522_s0 + $0x8] sm:$0xff]  ;;  %v90_v5 = vld [vmem:[%s523_s1] sm:$0xff] }
   0x3   :  { %316 = vmatpush.msra.mxu2 %v434_v2  ;;  %117 = vmatpush.msra.mxu0 %v90_v5  ;;  %v442_v11 = vld [vmem:[%s524_s2 + $0x1] ss:$0 sm:$0xff]  ;;  %v443_v14 = vld [vmem:[%s524_s2] ss:$0 sm:$0xff]  ;;  %v438_v20 = vld [vmem:[%s526_s3 + $0x8] sm:$0xff] }
   0x4   :  { %411 = vmatpush.msra.mxu3 %v438_v20  ;;  %v189_v21 = vld [vmem:[%s526_s3] sm:$0xff] }
   0x5   :  { %211 = vmatpush.msra.mxu1 %v189_v21  ;;  %v444_v26 = vld [vmem:[%s525_s4] ss:$0 sm:$0xff] }
   0xa   :  { %256 = vxpose.xlu0.b32.start.end [1/1] (short) (narrow) %v433_v3, 8  ;;  %58 = vxpose.xlu1.b32.start.end [1/1] (short) (narrow) %v25_v4, 8 }
  0xa6   :  { %v240_v6 = vpop.trf.xlu0  ;;  %v42_v7 = vpop.trf.xlu1 }
  0xa7   :  { %436 = vmatmul.msk.f32.vlgmr.msra.gmra.mxu2 %vm95_vm0, %v240_v6  ;;  %428 = vmatmul.msk.f32.vlgmr.msra.gmra.mxu0 %vm95_vm0, %v42_v7 }
  0xae   :  { %v272_v8 = vpop.trf.xlu0  ;;  %v74_v9 = vpop.trf.xlu1 }
  0xaf   :  { %437 = vmatmul.msk.f32.gmra.mxu2 %vm95_vm0, %v272_v8  ;;  %429 = vmatmul.msk.f32.gmra.mxu0 %vm95_vm0, %v74_v9 }
 0x124   :  { %v119_v10 = vpop.f32.mrf.mxu0 }
 0x125   :  { %v120_v18 = vadd.f32 %v443_v14, %v119_v10 }
 0x12a   :  { %v318_v12 = vpop.f32.mrf.mxu2 }
 0x12b   :  { %v319_v13 = vadd.f32 %v442_v11, %v318_v12 }
 0x12c   :  { %v122_v15 = vpop.f32.mrf.mxu0 }
 0x12d   :  { %324 = vxpose.xlu2.b32.start.end [1/1] (short) (narrow) %v319_v13, 8  ;;  %v123_v16 = vadd.f32 %v443_v14, %v122_v15 }
 0x12f   :  { %157 = vxpose.xlu1.b32.start.end [1/1] (short) (narrow) %v123_v16, 8 }
 0x132   :  { %v321_v17 = vpop.f32.mrf.mxu2 }
 0x133   :  { %v322_v19 = vadd.f32 %v442_v11, %v321_v17 }
 0x135   :  { %356 = vxpose.xlu0.b32.start.end [1/1] (short) (narrow) %v322_v19, 8  ;;  %125 = vxpose.xlu2.b32.start.end [1/1] (short) (narrow) %v120_v18, 8 }
 0x1c6   :  { %v340_v22 = vpop.trf.xlu2 }
 0x1c7   :  { %439 = vmatmul.msk.f32.vlgmr.msra.gmra.mxu3 %vm95_vm0, %v340_v22 }
 0x1ce   :  { %v141_v23 = vpop.trf.xlu2 }
 0x1cf   :  { %430 = vmatmul.msk.f32.vlgmr.msra.gmra.mxu1 %vm95_vm0, %v141_v23 }
 0x1d3   :  { %v173_v24 = vpop.trf.xlu1 }
 0x1d7   :  { %431 = vmatmul.msk.f32.gmra.mxu1 %vm95_vm0, %v173_v24 }
 0x1d9   :  { %v372_v25 = vpop.trf.xlu0 }
 0x1da   :  { %440 = vmatmul.msk.f32.gmra.mxu3 %vm95_vm0, %v372_v25 }
 0x24a   :  { %v413_v28 = vpop.f32.mrf.mxu3 }
 0x24c   :  { %v213_v27 = vpop.f32.mrf.mxu1 }
 0x24d   :  { %v219_v29 = vadd.f32 %v444_v26, %v213_v27 }
 0x24f   :  { %v419_v30 = vadd.f32 %v413_v28, %v219_v29 }
 0x251   :  { %422 = vst.msk [vmem:[%s527_s5] sm:$0xff] %vm421_vm1, %v419_v30 }
 0x254   :  { %v216_v31 = vpop.f32.mrf.mxu1 }
 0x255   :  { %v220_v32 = vadd.f32 %v444_v26, %v216_v31 }
 0x25d   :  { %v416_v33 = vpop.f32.mrf.mxu3 }
 0x25e   :  { %v420_v34 = vadd.f32 %v416_v33, %v220_v32 }
 0x260   :  { %423 = vst.msk [vmem:[%s527_s5 + $0x8] sm:$0xff] %vm421_vm1, %v420_v34 }

// kernel: forward.4
= control target key start
LH: loop header
LB: loop body
LE: loop exit
PB: predicated region body
PF: predicated region fallthrough
CT: control target
= control target key end

     0   :  { %s1588_s12 = smov 0   ;;  %s1791_s0 = inlined_call_operand.vmem [shape: f32[2,2,16,8], index: 0, kind: input, shape index: {}]   ;;  %s1792_s1 = inlined_call_operand.vmem [shape: f32[2,23,120], index: 1, kind: input, shape index: {}]   ;;  %s1793_s2 = inlined_call_operand.vmem [shape: f32[2,27,8], index: 2, kind: input, shape index: {}]   ;;  %s1794_s3 = inlined_call_operand.vmem [shape: f32[2,2,8,8], index: 3, kind: output, shape index: {}]  }
   0x1 LB: > { %s1444_s13 = sadd.s32 4294967295, %s1554_s12   ;;  %p1448_p0 = scmp.ge.s32.totalorder %s1554_s12, 1  ;;  %s1554_s12 = sphi %s1588_s12, %s13_s12  }
   0x2   : > { %p157_p1 = scmp.lt.s32.totalorder %s1554_s12, 3 }
   0x4   : > { %p158_p2 = pnand %p1448_p0, %p157_p1 }
   0x5   : > { %p191_p3 = scmp.lt.s32.totalorder (!%p158_p2), %s1444_s13, 1  ;;  %s1556_s22 = smov (!%p158_p2), 8  }
   0x6   : > { %161 = sbr.rel (%p158_p2) target bundleno = 1845 (0x735), region = 32  ;;  %s1557_s23 = smov (!%p158_p2), 104  }
   0x7   : > { %s1558_s24 = smov (!%p158_p2), 32   ;;  %s1559_s25 = smov (!%p158_p2), 56  }
   0x8   : > { %s1560_s26 = smov (!%p158_p2), 80   ;;  %s1562_s27 = smov (!%p158_p2), 112  }
   0x9   : > { %s1563_s28 = smov (!%p158_p2), 120   ;;  %s1564_s29 = smov (!%p158_p2), 114  }
   0xa   : > { %s1565_s30 = smov (!%p158_p2), 100   ;;  %s1566_s4 = smov (!%p158_p2), 121  }
   0xb   : > { %s1796_s13 = smov (!%p191_p3, %s1444_s13), 1  ;;  %vm230_vm0 = vcmask 64512   ;;  %vm233_vm1 = vcmask 130048   ;;  %v1561_v26 = vmov 8.0   ;;  %vm459_vm2 = vcmask 195712   ;;  %s1567_s8 = smov 107  }
   0xc   : > { %s1487_s14 = sshll.u32 %s1796_s13, 5  ;;  %s1490_s15 = smul.u32 24, %s1796_s13  ;;  %1512 = vrcp.f32 %v1561_v26  ;;  %vm398_vm3 = vcmask 130112  }
   0xd   : > { %s195_s18 = scalar_lea.vmem %s1791_s0, %s1487_s14  ;;  %s1715_s7 = scalar_lea.vmem %s1793_s2, %s1487_s14 }
   0xe   : > { %v212_v0 = vld [vmem:[%s195_s18 + $0x8] sm:$0xff]  ;;  %s1608_s21 = scalar_lea.vmem %s1792_s1, %s1490_s15  ;;  %v214_v2 = vld [vmem:[%s195_s18 + $0x18] sm:$0xff]  ;;  %v1612_v4 = vld [vmem:[%s195_s18] sm:$0xff]  ;;  %s1489_s9 = sshll.u32 %s1796_s13, 4 }
   0xf   : > { %224 = vrot.lane.b32.xlu0 %v212_v0, %s1556_s22  ;;  %v216_v1 = vld [vmem:[%s1608_s21 + $0x8] sm:$0xff]  ;;  %v215_v3 = vld [vmem:[%s1608_s21] sm:$0xff]  ;;  %v1616_v7 = vld [vmem:[%s195_s18 + $0x10] sm:$0xff]  ;;  %v688_v18 = vrot.slane %v1612_v4, 7  ;;  %s210_s14 = scalar_lea.vmem %s1794_s3, %s1489_s9 }
  0x10   : > { %254 = vmatpush.msra.mxu0 %v216_v1  ;;  %v689_v19 = vrot.slane %v1616_v7, 7 }
  0x11   : > { %v692_v21 = vsub.f32 %v1612_v4, %v688_v18 }
  0x12   : > { %255 = vmatpush.msra.mxu0 %v215_v3  ;;  %v693_v20 = vsub.f32 %v1616_v7, %v689_v19  ;;  %v1513_v28 = vpop.eup %1512 }
  0x13   : > { %v696_v23 = vrot.slane %v692_v21, 1  ;;  %v346_v33 = vmul.f32 8.0, %v1513_v28  ;;  %vm350_vm4 = vweird.f32 %v1513_v28 }
  0x14   : > { %v697_v22 = vrot.slane %v693_v20, 1 }
  0x15   : > { %v347_v38 = vsub.f32 1.0, %v346_v33 }
  0x17   : > { %226 = vrot.lane.b32.xlu0 %v214_v2, %s1556_s22  ;;  %v348_v48 = vmul.f32 %v1513_v28, %v347_v38 }
  0x19   : > { %v349_v59 = vadd.f32 %v1513_v28, %v348_v48 }
  0x81   : > { %v225_v5 = vpop.permute.xlu0 %224 }
  0x82   : > { %v231_v6 = vsel %vm230_vm0, %v1612_v4, %v225_v5 }
  0x83   : > { %1456 = vmatmul.msk.f32.vlgmr.msra.gmra.mxu0 %vm233_vm1, %v231_v6 }
  0x89   : > { %v227_v8 = vpop.permute.xlu0 %226 }
  0x8a   : > { %v232_v9 = vsel %vm230_vm0, %v1616_v7, %v227_v8  ;;  %v1630_v8 = vsel %vm350_vm4, %v1513_v28, %v349_v59 }
  0x8b   : > { %1457 = vmatmul.msk.f32.gmra.mxu0 %vm233_vm1, %v232_v9 }
 0x100   : > { %v257_v10 = vpop.f32.mrf.mxu0 }
 0x101   : > { %v272_v11 = vrot.slane %v257_v10, 7  ;;  %v314_v13 = vrot.slane %v257_v10, 2  ;;  %v297_v17 = vrot.slane %v257_v10, 1  ;;  %v265_v36 = vrot.slane %v257_v10, 6 }
 0x103   : > { %281 = vrot.lane.b32.xlu0 %v272_v11, %s1557_s23 }
 0x108   : > { %v260_v12 = vpop.f32.mrf.mxu0 }
 0x109   : > { %v298_v14 = vrot.slane %v260_v12, 1  ;;  %v273_v15 = vrot.slane %v260_v12, 7  ;;  %v315_v16 = vrot.slane %v260_v12, 2  ;;  %v266_v27 = vrot.slane %v260_v12, 6 }
 0x10b   : > { %323 = vrot.lane.b32.xlu0 %v314_v13, %s1558_s24  ;;  %308 = vrot.lane.b32.xlu2 %v298_v14, %s1559_s25 }
 0x10c   : > { %283 = vrot.lane.b32.xlu1 %v273_v15, %s1557_s23 }
 0x113   : > { %325 = vrot.lane.b32.xlu2 %v315_v16, %s1558_s24 }
 0x114   : > { %291 = vrot.lane.b32.xlu1 %v260_v12, %s1560_s26 }
 0x11b   : > { %306 = vrot.lane.b32.xlu2 %v297_v17, %s1559_s25 }
 0x11c   : > { %289 = vrot.lane.b32.xlu1 %v257_v10, %s1560_s26 }
 0x141   : > { %732 = vxpose.xlu2.b32.start.end [1/1] (short) (narrow) %v697_v22, 8 }
 0x151   : > { %700 = vxpose.xlu1.b32.start.end [1/1] (short) (narrow) %v696_v23, 8 }
 0x165   : > { %v309_v24 = vpop.permute.xlu2 %308 }
 0x16d   : > { %v326_v30 = vpop.permute.xlu2 %325 }
 0x175   : > { %v282_v34 = vpop.permute.xlu0 %281  ;;  %v307_v49 = vpop.permute.xlu2 %306 }
 0x176   : > { %v287_v39 = vadd.f32 %v282_v34, %v265_v36 }
 0x17d   : > { %v324_v54 = vpop.permute.xlu0 %323 }
 0x17e   : > { %v284_v25 = vpop.permute.xlu1 %283 }
 0x17f   : > { %v288_v29 = vadd.f32 %v284_v25, %v266_v27 }
 0x186   : > { %v292_v31 = vpop.permute.xlu1 %291 }
 0x187   : > { %v296_v32 = vadd.f32 %v292_v31, %v288_v29 }
 0x189   : > { %v313_v35 = vadd.f32 %v309_v24, %v296_v32 }
 0x18b   : > { %v330_v37 = vadd.f32 %v326_v30, %v313_v35 }
 0x18d   : > { %v338_v40 = vsel %vm230_vm0, %v330_v37, 0.0  ;;  %v467_v41 = vsel %vm459_vm2, %v330_v37, 0.0  ;;  %v406_v42 = vsel %vm398_vm3, %v330_v37, 0.0 }
 0x18e   : > { %v290_v43 = vpop.permute.xlu1 %289  ;;  %v339_v44 = vrot.slane %v338_v40, 4  ;;  %v468_v45 = vrot.slane %v467_v41, 4  ;;  %v407_v46 = vrot.slane %v406_v42, 4 }
 0x18f   : > { %v295_v47 = vadd.f32 %v290_v43, %v287_v39 }
 0x190   : > { %v340_v50 = vadd.f32 %v339_v44, %v338_v40  ;;  %v469_v51 = vadd.f32 %v468_v45, %v467_v41  ;;  %v408_v52 = vadd.f32 %v407_v46, %v406_v42 }
 0x191   : > { %v312_v53 = vadd.f32 %v307_v49, %v295_v47 }
 0x192   : > { %v341_v55 = vrot.slane %v340_v50, 2  ;;  %v470_v56 = vrot.slane %v469_v51, 2  ;;  %v409_v57 = vrot.slane %v408_v52, 2 }
 0x193   : > { %v329_v58 = vadd.f32 %v324_v54, %v312_v53 }
 0x194   : > { %v342_v60 = vadd.f32 %v341_v55, %v340_v50  ;;  %v471_v61 = vadd.f32 %v470_v56, %v469_v51  ;;  %v410_v62 = vadd.f32 %v409_v57, %v408_v52 }
 0x195   : > { %v460_v63 = vsel %vm459_vm2, %v329_v58, 0.0  ;;  %v331_v0 = vsel %vm230_vm0, %v329_v58, 0.0  ;;  %v399_v1 = vsel %vm398_vm3, %v329_v58, 0.0 }
 0x196   : > { %v343_v2 = vrot.slane %v342_v60, 1  ;;  %v461_v3 = vrot.slane %v460_v63, 4  ;;  %v332_v5 = vrot.slane %v331_v0, 4  ;;  %v400_v6 = vrot.slane %v399_v1, 4 }
 0x197   : > { %v472_v9 = vrot.slane %v471_v61, 1  ;;  %v411_v10 = vrot.slane %v410_v62, 1 }
 0x198   : > { %v344_v11 = vadd.f32 %v343_v2, %v342_v60  ;;  %v462_v12 = vadd.f32 %v461_v3, %v460_v63  ;;  %v333_v13 = vadd.f32 %v332_v5, %v331_v0  ;;  %v401_v14 = vadd.f32 %v400_v6, %v399_v1 }
 0x199   : > { %v473_v15 = vadd.f32 %v472_v9, %v471_v61  ;;  %v412_v16 = vadd.f32 %v411_v10, %v410_v62 }
 0x19a   : > { %v353_v17 = vmul.f32 %v1630_v8, %v344_v11  ;;  %v463_v18 = vrot.slane %v462_v12, 2  ;;  %v334_v19 = vrot.slane %v333_v13, 2  ;;  %v402_v20 = vrot.slane %v401_v14, 2 }
 0x19b   : > { %v475_v21 = vmul.f32 %v473_v15, %v1630_v8  ;;  %v414_v22 = vmul.f32 %v412_v16, %v1630_v8 }
 0x19c   : > { %v1635_v23 = vsub.f32 %v330_v37, %v353_v17  ;;  %v464_v24 = vadd.f32 %v463_v18, %v462_v12  ;;  %v335_v25 = vadd.f32 %v334_v19, %v333_v13  ;;  %v403_v26 = vadd.f32 %v402_v20, %v401_v14 }
 0x19d   : > { %v1637_v27 = vsub.f32 %v330_v37, %v475_v21  ;;  %v1639_v28 = vsub.f32 %v330_v37, %v414_v22 }
 0x19e   : > { %v357_v29 = vmul.f32 %v1635_v23, %v1635_v23  ;;  %v465_v30 = vrot.slane %v464_v24, 1  ;;  %v336_v31 = vrot.slane %v335_v25, 1  ;;  %v404_v32 = vrot.slane %v403_v26, 1 }
 0x19f   : > { %v479_v33 = vmul.f32 %v1637_v27, %v1637_v27  ;;  %v418_v34 = vmul.f32 %v1639_v28, %v1639_v28 }
 0x1a0   : > { %v365_v35 = vsel %vm230_vm0, %v357_v29, 0.0  ;;  %v466_v36 = vadd.f32 %v465_v30, %v464_v24  ;;  %v337_v38 = vadd.f32 %v336_v31, %v335_v25  ;;  %v405_v39 = vadd.f32 %v404_v32, %v403_v26 }
 0x1a1   : > { %v366_v40 = vrot.slane %v365_v35, 4  ;;  %v487_v37 = vsel %vm459_vm2, %v479_v33, 0.0  ;;  %v426_v41 = vsel %vm398_vm3, %v418_v34, 0.0 }
 0x1a2   : > { %v474_v42 = vmul.f32 %v466_v36, %v1630_v8  ;;  %v352_v43 = vmul.f32 %v1630_v8, %v337_v38  ;;  %v413_v44 = vmul.f32 %v405_v39, %v1630_v8  ;;  %v488_v45 = vrot.slane %v487_v37, 4 }
 0x1a3   : > { %v367_v46 = vadd.f32 %v366_v40, %v365_v35  ;;  %v427_v47 = vrot.slane %v426_v41, 4 }
 0x1a4   : > { %v1653_v48 = vsub.f32 %v329_v58, %v474_v42  ;;  %v1655_v49 = vsub.f32 %v329_v58, %v352_v43  ;;  %v1657_v50 = vsub.f32 %v329_v58, %v413_v44  ;;  %v489_v51 = vadd.f32 %v488_v45, %v487_v37 }
 0x1a5   : > { %v368_v52 = vrot.slane %v367_v46, 2  ;;  %v428_v53 = vadd.f32 %v427_v47, %v426_v41 }
 0x1a6   : > { %v478_v54 = vmul.f32 %v1653_v48, %v1653_v48  ;;  %v356_v55 = vmul.f32 %v1655_v49, %v1655_v49  ;;  %v417_v56 = vmul.f32 %v1657_v50, %v1657_v50  ;;  %v490_v57 = vrot.slane %v489_v51, 2 }
 0x1a7   : > { %v369_v59 = vadd.f32 %v368_v52, %v367_v46  ;;  %v429_v5 = vrot.slane %v428_v53, 2 }
 0x1a8   : > { %v480_v60 = vsel %vm459_vm2, %v478_v54, 0.0  ;;  %v358_v61 = vsel %vm230_vm0, %v356_v55, 0.0  ;;  %v419_v58 = vsel %vm398_vm3, %v417_v56, 0.0  ;;  %v491_v62 = vadd.f32 %v490_v57, %v489_v51 }
 0x1a9   : > { %v370_v63 = vrot.slane %v369_v59, 1  ;;  %v481_v0 = vrot.slane %v480_v60, 4  ;;  %v359_v1 = vrot.slane %v358_v61, 4  ;;  %v420_v2 = vrot.slane %v419_v58, 4 }
 0x1aa   : > { %v492_v3 = vrot.slane %v491_v62, 1  ;;  %v430_v17 = vadd.f32 %v429_v5, %v428_v53  ;;  %vm301_vm3 = vcmask 1046528  }
 0x1ab   : > { %v371_v6 = vadd.f32 %v370_v63, %v369_v59  ;;  %v482_v9 = vadd.f32 %v481_v0, %v480_v60  ;;  %v360_v10 = vadd.f32 %v359_v1, %v358_v61  ;;  %v421_v11 = vadd.f32 %v420_v2, %v419_v58 }
 0x1ac   : > { %v493_v12 = vadd.f32 %v492_v3, %v491_v62  ;;  %v431_v29 = vrot.slane %v430_v17, 1 }
 0x1ad   : > { %v373_v13 = vmul.f32 %v371_v6, %v1630_v8  ;;  %v483_v14 = vrot.slane %v482_v9, 2  ;;  %v361_v15 = vrot.slane %v360_v10, 2  ;;  %v422_v16 = vrot.slane %v421_v11, 2 }
 0x1ae   : > { %v495_v22 = vmul.f32 %v493_v12, %v1630_v8  ;;  %v432_v38 = vadd.f32 %v431_v29, %v430_v17 }
 0x1af   : > { %v375_v18 = vadd.f32 1e-05, %v373_v13  ;;  %v484_v19 = vadd.f32 %v483_v14, %v482_v9  ;;  %v362_v20 = vadd.f32 %v361_v15, %v360_v10  ;;  %v423_v21 = vadd.f32 %v422_v16, %v421_v11 }
 0x1b0   : > { %v1670_v33 = vadd.f32 1e-05, %v495_v22  ;;  %v434_v44 = vmul.f32 %v432_v38, %v1630_v8 }
 0x1b1   : > { %1514 = vrsqrt.f32 %v375_v18  ;;  %v485_v24 = vrot.slane %v484_v19, 1  ;;  %v363_v25 = vrot.slane %v362_v20, 1  ;;  %v424_v26 = vrot.slane %v423_v21, 1 }
 0x1b2   : > { %1516 = vrsqrt.f32 %v1670_v33  ;;  %v1679_v51 = vadd.f32 1e-05, %v434_v44  ;;  %vm392_vm6 = vweird.f32 %v375_v18  ;;  %vm514_vm4 = vweird.f32 %v1670_v33 }
 0x1b3   : > { %v486_v30 = vadd.f32 %v485_v24, %v484_v19  ;;  %v364_v31 = vadd.f32 %v363_v25, %v362_v20  ;;  %v425_v32 = vadd.f32 %v424_v26, %v423_v21  ;;  %v217_v25 = vld [vmem:[%s1608_s21 + $0x10] sm:$0x7f] }
 0x1b5   : > { %v494_v34 = vmul.f32 %v486_v30, %v1630_v8  ;;  %v372_v35 = vmul.f32 %v364_v31, %v1630_v8  ;;  %v433_v36 = vmul.f32 %v425_v32, %v1630_v8 }
 0x1b7   : > { %v1515_v39 = vpop.eup %1514  ;;  %v496_v40 = vadd.f32 1e-05, %v494_v34  ;;  %v374_v37 = vadd.f32 1e-05, %v372_v35  ;;  %v435_v42 = vadd.f32 1e-05, %v433_v36 }
 0x1b8   : > { %v387_v41 = vmul.f32 %v1515_v39, %v375_v18  ;;  %v1677_v46 = vpop.eup %1516  ;;  %vm393_vm5 = vweird.f32 %v1515_v39 }
 0x1b9   : > { %1518 = vrsqrt.f32 %v496_v40  ;;  %vm394_vm7 = vmor %vm392_vm6, %vm393_vm5  ;;  %v509_v1 = vmul.f32 %v1677_v46, %v1670_v33  ;;  %vm504_vm10 = vweird.f32 %v496_v40  ;;  %vm382_vm12 = vweird.f32 %v374_v37 }
 0x1ba   : > { %v388_v43 = vmul.f32 %v1515_v39, %v387_v41  ;;  %1520 = vrsqrt.f32 %v374_v37  ;;  %vm443_vm15 = vweird.f32 %v435_v42  ;;  %vm515_vm2 = vweird.f32 %v1677_v46 }
 0x1bb   : > { %1522 = vrsqrt.f32 %v435_v42  ;;  %v510_v11 = vmul.f32 %v1677_v46, %v509_v1  ;;  %vm516_vm5 = vmor %vm514_vm4, %vm515_vm2 }
 0x1bc   : > { %v389_v45 = vmul.f32 0.5, %v388_v43  ;;  %1524 = vrsqrt.f32 %v1679_v51 }
 0x1bd   : > { %v511_v19 = vmul.f32 0.5, %v510_v11 }
 0x1be   : > { %v390_v47 = vsub.f32 1.5, %v389_v45 }
 0x1bf   : > { %v1519_v52 = vpop.eup %1518  ;;  %v512_v21 = vsub.f32 1.5, %v511_v19 }
 0x1c0   : > { %v1521_v53 = vpop.eup %1520  ;;  %v391_v54 = vmul.f32 %v1515_v39, %v390_v47  ;;  %v499_v55 = vmul.f32 %v1519_v52, %v496_v40  ;;  %vm505_vm8 = vweird.f32 %v1519_v52 }
 0x1c1   : > { %v1523_v56 = vpop.eup %1522  ;;  %v377_v57 = vmul.f32 %v1521_v53, %v374_v37  ;;  %vm383_vm9 = vweird.f32 %v1521_v53  ;;  %vm506_vm11 = vmor %vm504_vm10, %vm505_vm8  ;;  %v513_v24 = vmul.f32 %v1677_v46, %v512_v21 }
 0x1c2   : > { %v395_v59 = vsel %vm394_vm7, %v1515_v39, %v391_v54  ;;  %v500_v60 = vmul.f32 %v1519_v52, %v499_v55  ;;  %v438_v61 = vmul.f32 %v1523_v56, %v435_v42  ;;  %v1525_v9 = vpop.eup %1524  ;;  %vm384_vm13 = vmor %vm382_vm12, %vm383_vm9  ;;  %vm444_vm14 = vweird.f32 %v1523_v56  ;;  %v220_v42 = vld [vmem:[%s1715_s7 + $0x10] sm:$0xff] }
 0x1c3   : > { %v397_v58 = vmul.f32 %v395_v59, %v1635_v23  ;;  %v378_v62 = vmul.f32 %v1521_v53, %v377_v57  ;;  %v448_v16 = vmul.f32 %v1525_v9, %v1679_v51  ;;  %vm445_vm1 = vmor %vm443_vm15, %vm444_vm14  ;;  %v517_v26 = vsel %vm516_vm5, %v1677_v46, %v513_v24 }
 0x1c4   : > { %v501_v63 = vmul.f32 0.5, %v500_v60  ;;  %v439_v0 = vmul.f32 %v1523_v56, %v438_v61  ;;  %v519_v30 = vmul.f32 %v517_v26, %v1637_v27  ;;  %vm454_vm6 = vweird.f32 %v1525_v9 }
 0x1c5   : > { %1460 = vmatpush.xpose.msk.msra.mxu2 %vm230_vm0, %v397_v58  ;;  %v379_v2 = vmul.f32 0.5, %v378_v62  ;;  %v449_v22 = vmul.f32 %v1525_v9, %v448_v16  ;;  %vm453_vm7 = vweird.f32 %v1679_v51  ;;  %vm764_vm9 = vcmask 56320  }
 0x1c6   : > { %v502_v3 = vsub.f32 1.5, %v501_v63  ;;  %v440_v5 = vmul.f32 0.5, %v439_v0  ;;  %vm455_vm8 = vmor %vm453_vm7, %vm454_vm6 }
 0x1c7   : > { %v380_v6 = vsub.f32 1.5, %v379_v2 }
 0x1c8   : > { %1461 = vmatmul.msk.f32.vlgmr.msra.gmra.mxu2 %vm230_vm0, %v397_v58  ;;  %v503_v10 = vmul.f32 %v1519_v52, %v502_v3  ;;  %v441_v23 = vsub.f32 1.5, %v440_v5 }
 0x1c9   : > { %v381_v12 = vmul.f32 %v1521_v53, %v380_v6  ;;  %1466 = vmatpush.msk.msrb.mxu2 %vm301_vm3, %v217_v25 }
 0x1ca   : > { %v507_v13 = vsel %vm506_vm11, %v1519_v52, %v503_v10  ;;  %v442_v18 = vmul.f32 %v1523_v56, %v441_v23 }
 0x1cb   : > { %v518_v14 = vmul.f32 %v507_v13, %v1653_v48  ;;  %v385_v15 = vsel %vm384_vm13, %v1521_v53, %v381_v12 }
 0x1cc   : > { %v396_v17 = vmul.f32 %v385_v15, %v1655_v49  ;;  %v446_v20 = vsel %vm445_vm1, %v1523_v56, %v442_v18  ;;  %v450_v49 = vmul.f32 0.5, %v449_v22 }
 0x1cd   : > { %600 = vrot.lane.b32.xlu0 %v518_v14, %s1562_s27  ;;  %v457_v48 = vmul.f32 %v446_v20, %v1657_v50 }
 0x1ce   : > { %1458 = vmatpush.xpose.msk.msra.mxu1 %vm230_vm0, %v396_v17  ;;  %v451_v29 = vsub.f32 1.5, %v450_v49 }
 0x1d0   : > { %v452_v31 = vmul.f32 %v1525_v9, %v451_v29 }
 0x1d1   : > { %1459 = vmatmul.msk.f32.vlgmr.msra.gmra.mxu1 %vm230_vm0, %v396_v17 }
 0x1d2   : > { %v456_v50 = vsel %vm455_vm8, %v1525_v9, %v452_v31 }
 0x1d3   : > { %v458_v32 = vmul.f32 %v456_v50, %v1639_v28 }
 0x1d5   : > { %597 = vrot.lane.b32.xlu0 %v457_v48, %s1563_s28 }
 0x1da   : > { %v748_v33 = vpop.trf.xlu2 }
 0x1dd   : > { %630 = vrot.lane.b32.xlu0 %v519_v30, %s1562_s27 }
 0x1e5   : > { %627 = vrot.lane.b32.xlu0 %v458_v32, %s1563_s28 }
 0x1f5   : > { %v716_v34 = vpop.trf.xlu1 }
 0x1f6   : > { %1467 = vmatmul.msk.f32.vlgmr.msrb.gmra.mxu2 %vm764_vm9, %v716_v34 }
 0x1fe   : > { %1468 = vmatmul.msk.f32.gmra.mxu2 %vm764_vm9, %v748_v33 }
 0x23f   : > { %v601_v35 = vpop.permute.xlu0 %600 }
 0x240   : > { %1462 = vmatpush.xpose.msk.msra.mxu3 %vm230_vm0, %v601_v35 }
 0x247   : > { %v598_v27 = vpop.permute.xlu0 %597 }
 0x248   : > { %1463 = vmatmul.msk.f32.vlgmr.msra.gmra.mxu3 %vm230_vm0, %v598_v27 }
 0x24b   : > { %v1708_v28 = vpop.f32.mrf.mxu2 }
 0x24e   : > { %v1722_v47 = vpop.f32.mrf.mxu1 }
 0x24f   : > { %v631_v36 = vpop.permute.xlu0 %630 }
 0x250   : > { %1464 = vmatpush.xpose.msk.msrb.mxu1 %vm230_vm0, %v631_v36 }
 0x254   : > { %1016 = vmatpush.msra.mxu1 %v220_v42 }
 0x257   : > { %v628_v38 = vpop.permute.xlu0 %627 }
 0x258   : > { %1465 = vmatmul.msk.f32.vlgmr.msrb.gmra.mxu1 %vm230_vm0, %v628_v38 }
 0x260   : > { %1473 = vmatmul.msk.f32.vlgmr.msra.gmra.mxu1 %vm230_vm0, %v1612_v4 }
 0x268   : > { %1474 = vmatmul.msk.f32.gmra.mxu1 %vm230_vm0, %v1616_v7 }
 0x279   : > { %v791_v39 = vpop.f32.mrf.mxu2 }
 0x27a   : > { %821 = vrot.lane.b32.xlu0 %v791_v39, %s1564_s29  ;;  %v845_v40 = vrot.slane %v791_v39, 2  ;;  %v805_v37 = vrot.slane %v791_v39, 7  ;;  %v829_v41 = vrot.slane %v791_v39, 1  ;;  %v799_v53 = vrot.slane %v791_v39, 6 }
 0x27c   : > { %853 = vrot.lane.b32.xlu1 %v845_v40, %s1565_s30  ;;  %813 = vrot.lane.b32.xlu2 %v805_v37, %s1566_s4 }
 0x281   : > { %v794_v43 = vpop.f32.mrf.mxu2 }
 0x282   : > { %837 = vrot.lane.b32.xlu0 %v829_v41, %s1567_s8  ;;  %v806_v44 = vrot.slane %v794_v43, 7  ;;  %v830_v45 = vrot.slane %v794_v43, 1  ;;  %v846_v46 = vrot.slane %v794_v43, 2  ;;  %v800_v21 = vrot.slane %v794_v43, 6 }
 0x28a   : > { %823 = vrot.lane.b32.xlu0 %v794_v43, %s1564_s29 }
 0x292   : > { %815 = vrot.lane.b32.xlu0 %v806_v44, %s1566_s4 }
 0x29a   : > { %839 = vrot.lane.b32.xlu0 %v830_v45, %s1567_s8 }
 0x2a2   : > { %855 = vrot.lane.b32.xlu0 %v846_v46, %s1565_s30 }
 0x2cb   : > { %v623_v60 = vpop.f32.mrf.mxu3 }
 0x2cc   : > { %v656_v63 = vmul.f32 0.35355338, %v623_v60 }
 0x2ce   : > { %v658_v6 = vsel %vm230_vm0, %v656_v63, -inf }
 0x2d5   : > { %v653_v56 = vpop.f32.mrf.mxu1 }
 0x2d6   : > { %v814_v52 = vpop.permute.xlu2 %813  ;;  %v657_v58 = vmul.f32 0.35355338, %v653_v56 }
 0x2d7   : > { %v819_v54 = vadd.f32 %v814_v52, %v799_v53 }
 0x2d8   : > { %v659_v2 = vsel %vm230_vm0, %v657_v58, -inf }
 0x2d9   : > { %v660_v9 = vmax.f32 %v658_v6, %v659_v2 }
 0x2db   : > { %v661_v11 = vsub.f32 %v656_v63, %v660_v9  ;;  %v662_v13 = vsub.f32 %v657_v58, %v660_v9 }
 0x2dd   : > { %v663_v16 = vmul.f32 1.442695, %v661_v11  ;;  %v665_v18 = vmul.f32 1.442695, %v662_v13 }
 0x2df   : > { %1526 = vpow2.f32 %v663_v16 }
 0x2e0   : > { %1528 = vpow2.f32 %v665_v18 }
 0x2e5   : > { %v1729_v26 = vpop.eup %1526 }
 0x2e6   : > { %v1731_v29 = vpop.eup %1528  ;;  %v667_v34 = vsel %vm230_vm0, %v1729_v26, 0.0 }
 0x2e7   : > { %v668_v33 = vsel %vm230_vm0, %v1731_v29, 0.0 }
 0x2e8   : > { %v669_v38 = vadd.f32 %v668_v33, %v667_v34  ;;  %v1751_v34 = vld [vmem:[%s1715_s7 + $0x18] sm:$0x7] }
 0x2e9   : > { %v1024_v33 = vperm.slane %v1751_v34, 2 }
 0x2ea   : > { %1530 = vrcp.f32 %v669_v38  ;;  %v681_v11 = vand.u32 2147483648, %v669_v38  ;;  %vm675_vm14 = vweird.f32 %v669_v38  ;;  %v679_v13 = vand.u32 2147483647, %v669_v38 }
 0x2ec   : > { %v822_v51 = vpop.permute.xlu0 %821  ;;  %v682_v16 = vor.u32 1.1754944e-38, %v681_v11  ;;  %vm680_vm1 = vcmp.eq.f32.partialorder %v679_v13, 8.507059e+37  ;;  %v1168_v13 = vperm.slane %v1751_v34, 1 }
 0x2ed   : > { %v827_v55 = vadd.f32 %v822_v51, %v819_v54 }
 0x2ee   : > { %v854_v61 = vpop.permute.xlu1 %853 }
 0x2f0   : > { %v1531_v51 = vpop.eup %1530 }
 0x2f1   : > { %v671_v54 = vmul.f32 %v1531_v51, %v669_v38  ;;  %vm676_vm13 = vweird.f32 %v1531_v51 }
 0x2f2   : > { %vm677_vm15 = vmor %vm675_vm14, %vm676_vm13 }
 0x2f3   : > { %v672_v60 = vsub.f32 1.0, %v671_v54 }
 0x2f4   : > { %v838_v57 = vpop.permute.xlu0 %837 }
 0x2f5   : > { %v843_v59 = vadd.f32 %v838_v57, %v827_v55 }
 0x2f7   : > { %v859_v62 = vadd.f32 %v854_v61, %v843_v59 }
 0x2f9   : > { %v861_v0 = vsel %vm764_vm9, %v859_v62, 0.0 }
 0x2fa   : > { %v862_v1 = vrot.slane %v861_v0, 4 }
 0x2fc   : > { %v863_v3 = vadd.f32 %v862_v1, %v861_v0  ;;  %v824_v5 = vpop.permute.xlu0 %823  ;;  %v673_v1 = vmul.f32 %v1531_v51, %v672_v60 }
 0x2fe   : > { %v864_v10 = vrot.slane %v863_v3, 2 }
 0x300   : > { %v865_v23 = vadd.f32 %v864_v10, %v863_v3  ;;  %v1018_v10 = vpop.f32.mrf.mxu1 }
 0x302   : > { %v866_v12 = vrot.slane %v865_v23, 1 }
 0x304   : > { %v867_v14 = vadd.f32 %v866_v12, %v865_v23  ;;  %v816_v15 = vpop.permute.xlu0 %815  ;;  %v674_v23 = vadd.f32 %v1531_v51, %v673_v1 }
 0x305   : > { %v820_v49 = vadd.f32 %v816_v15, %v800_v21 }
 0x306   : > { %v875_v17 = vmul.f32 %v867_v14, %v1630_v8  ;;  %v678_v15 = vsel %vm677_vm15, %v1531_v51, %v674_v23 }
 0x307   : > { %v828_v31 = vadd.f32 %v824_v5, %v820_v49  ;;  %v683_v18 = vsel %vm680_vm1, %v682_v16, %v678_v15 }
 0x308   : > { %v877_v19 = vsub.f32 %v859_v62, %v875_v17  ;;  %v684_v21 = vmul.f32 %v1729_v26, %v683_v18 }
 0x30a   : > { %v879_v20 = vmul.f32 %v877_v19, %v877_v19 }
 0x30c   : > { %v881_v22 = vsel %vm764_vm9, %v879_v20, 0.0  ;;  %v840_v48 = vpop.permute.xlu0 %839 }
 0x30d   : > { %v882_v24 = vrot.slane %v881_v22, 4  ;;  %v844_v32 = vadd.f32 %v840_v48, %v828_v31 }
 0x30f   : > { %v883_v25 = vadd.f32 %v882_v24, %v881_v22 }
 0x311   : > { %v884_v30 = vrot.slane %v883_v25, 2 }
 0x313   : > { %v885_v50 = vadd.f32 %v884_v30, %v883_v25 }
 0x314   : > { %v856_v35 = vpop.permute.xlu0 %855 }
 0x315   : > { %v886_v27 = vrot.slane %v885_v50, 1  ;;  %v860_v36 = vadd.f32 %v856_v35, %v844_v32  ;;  %v1021_v32 = vpop.f32.mrf.mxu1 }
 0x317   : > { %v887_v39 = vadd.f32 %v886_v27, %v885_v50  ;;  %v868_v40 = vsel %vm764_vm9, %v860_v36, 0.0 }
 0x318   : > { %v869_v37 = vrot.slane %v868_v40, 4 }
 0x319   : > { %v895_v41 = vmul.f32 %v887_v39, %v1630_v8 }
 0x31a   : > { %v870_v42 = vadd.f32 %v869_v37, %v868_v40 }
 0x31b   : > { %v897_v43 = vadd.f32 1e-05, %v895_v41 }
 0x31c   : > { %v871_v44 = vrot.slane %v870_v42, 2 }
 0x31d   : > { %1532 = vrsqrt.f32 %v897_v43  ;;  %vm905_vm11 = vweird.f32 %v897_v43 }
 0x31e   : > { %v872_v45 = vadd.f32 %v871_v44, %v870_v42 }
 0x320   : > { %v873_v46 = vrot.slane %v872_v45, 1 }
 0x322   : > { %v874_v52 = vadd.f32 %v873_v46, %v872_v45  ;;  %v219_v45 = vld [vmem:[%s1715_s7 + $0x8] sm:$0xff] }
 0x323   : > { %v1533_v53 = vpop.eup %1532  ;;  %1160 = vmatpush.msra.mxu2 %v219_v45 }
 0x324   : > { %v876_v55 = vmul.f32 %v874_v52, %v1630_v8  ;;  %v900_v56 = vmul.f32 %v1533_v53, %v897_v43  ;;  %vm906_vm10 = vweird.f32 %v1533_v53 }
 0x325   : > { %vm907_vm12 = vmor %vm905_vm11, %vm906_vm10 }
 0x326   : > { %v878_v57 = vsub.f32 %v860_v36, %v876_v55  ;;  %v901_v59 = vmul.f32 %v1533_v53, %v900_v56 }
 0x328   : > { %v880_v61 = vmul.f32 %v878_v57, %v878_v57  ;;  %v902_v58 = vmul.f32 0.5, %v901_v59 }
 0x32a   : > { %v888_v62 = vsel %vm764_vm9, %v880_v61, 0.0  ;;  %v903_v63 = vsub.f32 1.5, %v902_v58 }
 0x32b   : > { %v889_v0 = vrot.slane %v888_v62, 4 }
 0x32c   : > { %v904_v2 = vmul.f32 %v1533_v53, %v903_v63 }
 0x32d   : > { %v890_v3 = vadd.f32 %v889_v0, %v888_v62 }
 0x32e   : > { %v908_v5 = vsel %vm907_vm12, %v1533_v53, %v904_v2 }
 0x32f   : > { %v891_v6 = vrot.slane %v890_v3, 2  ;;  %v919_v9 = vmul.f32 %v908_v5, %v877_v19 }
 0x331   : > { %v892_v12 = vadd.f32 %v891_v6, %v890_v3  ;;  %1469 = vmatpush.xpose.msk.msrb.mxu3 %vm764_vm9, %v919_v9 }
 0x333   : > { %v893_v14 = vrot.slane %v892_v12, 1 }
 0x334   : > { %1470 = vmatmul.msk.f32.vlgmr.msrb.gmra.mxu3 %vm764_vm9, %v919_v9 }
 0x335   : > { %1043 = vmatpush.msra.mxu3 %v1018_v10  ;;  %v894_v17 = vadd.f32 %v893_v14, %v892_v12 }
 0x337   : > { %v896_v19 = vmul.f32 %v894_v17, %v1630_v8  ;;  %v685_v8 = vmul.f32 %v1731_v29, %v683_v18 }
 0x339   : > { %v898_v20 = vadd.f32 1e-05, %v896_v19 }
 0x33b   : > { %1534 = vrsqrt.f32 %v898_v20  ;;  %vm915_vm3 = vweird.f32 %v898_v20 }
 0x33c   : > { %1475 = vmatmul.msk.f32.vlgmr.msra.gmra.mxu3 %vm230_vm0, %v684_v21 }
 0x341   : > { %v1535_v22 = vpop.eup %1534 }
 0x342   : > { %v910_v48 = vmul.f32 %v1535_v22, %v898_v20  ;;  %vm916_vm2 = vweird.f32 %v1535_v22  ;;  %v218_v20 = vld [vmem:[%s1715_s7] sm:$0xff] }
 0x343   : > { %vm917_vm4 = vmor %vm915_vm3, %vm916_vm2  ;;  %1304 = vmatpush.msrb.mxu1 %v218_v20 }
 0x344   : > { %v911_v24 = vmul.f32 %v1535_v22, %v910_v48 }
 0x346   : > { %v912_v49 = vmul.f32 0.5, %v911_v24 }
 0x348   : > { %v913_v25 = vsub.f32 1.5, %v912_v49  ;;  %v566_v49 = vmul.f32 0.35355338, %v1722_v47 }
 0x34a   : > { %v914_v30 = vmul.f32 %v1535_v22, %v913_v25  ;;  %v567_v25 = vmul.f32 0.35355338, %v1708_v28 }
 0x34c   : > { %v918_v31 = vsel %vm917_vm4, %v1535_v22, %v914_v30  ;;  %v568_v30 = vsel %vm230_vm0, %v566_v49, -inf }
 0x34d   : > { %v920_v50 = vmul.f32 %v918_v31, %v878_v57  ;;  %v569_v31 = vsel %vm230_vm0, %v567_v25, -inf }
 0x34f   : > { %1471 = vmatpush.xpose.msk.msrb.mxu0 %vm764_vm9, %v920_v50 }
 0x352   : > { %1472 = vmatmul.msk.f32.vlgmr.msrb.gmra.mxu0 %vm764_vm9, %v920_v50  ;;  %v570_v50 = vmax.f32 %v568_v30, %v569_v31 }
 0x353   : > { %1066 = vmatpush.msra.mxu0 %v1021_v32 }
 0x354   : > { %v571_v32 = vsub.f32 %v566_v49, %v570_v50 }
 0x35a   : > { %1476 = vmatmul.msk.f32.vlgmr.msra.gmra.mxu0 %vm230_vm0, %v685_v8  ;;  %v572_v8 = vsub.f32 %v567_v25, %v570_v50 }
 0x3b7   : > { %v941_v26 = vpop.f32.mrf.mxu3 }
 0x3b8   : > { %v967_v39 = vmul.f32 0.37796447, %v941_v26  ;;  %v573_v26 = vmul.f32 1.442695, %v571_v32 }
 0x3ba   : > { %v969_v29 = vsel %vm230_vm0, %v967_v39, -inf }
 0x3bf   : > { %v1045_v35 = vpop.f32.mrf.mxu3 }
 0x3c0   : > { %v1046_v27 = vadd.f32 %v1045_v35, %v1024_v33 }
 0x3c2   : > { %v1071_v36 = vmax.f32 %v1046_v27, 0.0 }
 0x3c4   : > { %v1755_v38 = vadd.f32 %v1071_v36, %v1612_v4 }
 0x3c6   : > { %1075 = vxpose.xlu0.b32.start.end [1/1] (short) (narrow) %v1755_v38, 8 }
 0x3cf   : > { %v964_v40 = vpop.f32.mrf.mxu0 }
 0x3d0   : > { %v968_v37 = vmul.f32 0.37796447, %v964_v40 }
 0x3d2   : > { %v970_v41 = vsel %vm230_vm0, %v968_v37, -inf }
 0x3d3   : > { %v971_v42 = vmax.f32 %v969_v29, %v970_v41 }
 0x3d5   : > { %v972_v43 = vsub.f32 %v967_v39, %v971_v42  ;;  %v973_v44 = vsub.f32 %v968_v37, %v971_v42 }
 0x3d7   : > { %v974_v46 = vmul.f32 1.442695, %v972_v43  ;;  %v976_v51 = vmul.f32 1.442695, %v973_v44  ;;  %v1068_v52 = vpop.f32.mrf.mxu0 }
 0x3d8   : > { %v1069_v53 = vadd.f32 %v1068_v52, %v1024_v33  ;;  %v575_v33 = vmul.f32 1.442695, %v572_v8 }
 0x3d9   : > { %1536 = vpow2.f32 %v974_v46 }
 0x3da   : > { %1538 = vpow2.f32 %v976_v51  ;;  %v1072_v4 = vmax.f32 %v1069_v53, 0.0 }
 0x3dc   : > { %v1074_v54 = vadd.f32 %v1072_v4, %v1616_v7  ;;  %v1312_v4 = vperm.slane %v1751_v34, 0 }
 0x3de   : > { %1107 = vxpose.xlu0.b32.start.end [1/1] (short) (narrow) %v1074_v54, 8 }
 0x3df   : > { %v1537_v55 = vpop.eup %1536 }
 0x3e0   : > { %v1539_v56 = vpop.eup %1538  ;;  %v978_v57 = vsel %vm230_vm0, %v1537_v55, 0.0 }
 0x3e1   : > { %v979_v59 = vsel %vm230_vm0, %v1539_v56, 0.0 }
 0x3e2   : > { %v980_v60 = vadd.f32 %v979_v59, %v978_v57 }
 0x3e4   : > { %1540 = vrcp.f32 %v980_v60  ;;  %v992_v63 = vand.u32 2147483648, %v980_v60  ;;  %v990_v1 = vand.u32 2147483647, %v980_v60  ;;  %vm986_vm6 = vweird.f32 %v980_v60 }
 0x3e5   : > { %1542 = vpow2.f32 %v573_v26 }
 0x3e6   : > { %v993_v7 = vor.u32 1.1754944e-38, %v992_v63  ;;  %vm991_vm8 = vcmp.eq.f32.partialorder %v990_v1, 8.507059e+37  ;;  %1544 = vpow2.f32 %v575_v33 }
 0x3ea   : > { %v1541_v61 = vpop.eup %1540 }
 0x3eb   : > { %v982_v58 = vmul.f32 %v1541_v61, %v980_v60  ;;  %vm987_vm5 = vweird.f32 %v1541_v61  ;;  %v1543_v35 = vpop.eup %1542 }
 0x3ec   : > { %vm988_vm7 = vmor %vm986_vm6, %vm987_vm5  ;;  %v1545_v27 = vpop.eup %1544  ;;  %v577_v36 = vsel %vm230_vm0, %v1543_v35, 0.0 }
 0x3ed   : > { %v983_v62 = vsub.f32 1.0, %v982_v58 }
 0x3ef   : > { %v984_v0 = vmul.f32 %v1541_v61, %v983_v62 }
 0x3f1   : > { %v985_v2 = vadd.f32 %v1541_v61, %v984_v0 }
 0x3f3   : > { %v989_v3 = vsel %vm988_vm7, %v1541_v61, %v985_v2 }
 0x3f4   : > { %v994_v5 = vsel %vm991_vm8, %v993_v7, %v989_v3 }
 0x3f5   : > { %v996_v6 = vmul.f32 %v1539_v56, %v994_v5  ;;  %v995_v9 = vmul.f32 %v1537_v55, %v994_v5 }
 0x46a   : > { %v1091_v10 = vpop.trf.xlu0 }
 0x46b   : > { %1477 = vmatmul.msk.f32.vlgmr.msra.gmra.mxu2 %vm230_vm0, %v1091_v10 }
 0x482   : > { %v1123_v23 = vpop.trf.xlu0 }
 0x483   : > { %1478 = vmatmul.msk.f32.gmra.mxu2 %vm230_vm0, %v1123_v23 }
 0x4ee   : > { %v1162_v11 = vpop.f32.mrf.mxu2 }
 0x4ef   : > { %1187 = vmatpush.msrb.mxu3 %v1162_v11 }
 0x4f0   : > { %1479 = vmatmul.msk.f32.vlgmr.msrb.gmra.mxu3 %vm230_vm0, %v995_v9 }
 0x506   : > { %v1165_v12 = vpop.f32.mrf.mxu2 }
 0x507   : > { %1210 = vmatpush.msrb.mxu0 %v1165_v12 }
 0x508   : > { %1480 = vmatmul.msk.f32.vlgmr.msrb.gmra.mxu0 %vm230_vm0, %v996_v6 }
 0x573   : > { %v1189_v14 = vpop.f32.mrf.mxu3 }
 0x574   : > { %v1190_v15 = vadd.f32 %v1189_v14, %v1168_v13 }
 0x576   : > { %v1215_v16 = vmax.f32 %v1190_v15, 0.0 }
 0x578   : > { %1217 = vxpose.xlu0.b32.start.end [1/1] (short) (narrow) %v1215_v16, 8 }
 0x585   : > { %v1212_v17 = vpop.f32.mrf.mxu0 }
 0x586   : > { %v1213_v18 = vadd.f32 %v1212_v17, %v1168_v13 }
 0x588   : > { %v1216_v19 = vmax.f32 %v1213_v18, 0.0 }
 0x58a   : > { %1249 = vxpose.xlu0.b32.start.end [1/1] (short) (narrow) %v1216_v19, 8 }
 0x61c   : > { %v1233_v21 = vpop.trf.xlu0 }
 0x61d   : > { %v1281_v22 = vadd.f32 %v1233_v21, %v1755_v38  ;;  %v578_v38 = vsel %vm230_vm0, %v1545_v27, 0.0 }
 0x61e   : > { %v579_v47 = vadd.f32 %v578_v38, %v577_v36 }
 0x61f   : > { %1481 = vmatmul.msk.f32.vlgmr.msrb.gmra.mxu1 %vm230_vm0, %v1281_v22 }
 0x620   : > { %1546 = vrcp.f32 %v579_v47  ;;  %v591_v41 = vand.u32 2147483648, %v579_v47  ;;  %vm585_vm10 = vweird.f32 %v579_v47  ;;  %v589_v42 = vand.u32 2147483647, %v579_v47 }
 0x622   : > { %v592_v44 = vor.u32 1.1754944e-38, %v591_v41  ;;  %vm590_vm12 = vcmp.eq.f32.partialorder %v589_v42, 8.507059e+37 }
 0x626   : > { %v1547_v28 = vpop.eup %1546 }
 0x627   : > { %v581_v39 = vmul.f32 %v1547_v28, %v579_v47  ;;  %vm586_vm9 = vweird.f32 %v1547_v28 }
 0x628   : > { %vm587_vm11 = vmor %vm585_vm10, %vm586_vm9 }
 0x629   : > { %v582_v40 = vsub.f32 1.0, %v581_v39 }
 0x62b   : > { %v583_v37 = vmul.f32 %v1547_v28, %v582_v40 }
 0x62d   : > { %v584_v29 = vadd.f32 %v1547_v28, %v583_v37 }
 0x62e   : > { %v1265_v48 = vpop.trf.xlu0 }
 0x62f   : > { %v1282_v24 = vadd.f32 %v1265_v48, %v1074_v54  ;;  %v588_v43 = vsel %vm587_vm11, %v1547_v28, %v584_v29 }
 0x630   : > { %v593_v45 = vsel %vm590_vm12, %v592_v44, %v588_v43 }
 0x631   : > { %1482 = vmatmul.msk.f32.gmra.mxu1 %vm230_vm0, %v1282_v24  ;;  %v594_v46 = vmul.f32 %v1543_v35, %v593_v45  ;;  %v595_v53 = vmul.f32 %v1545_v27, %v593_v45 }
 0x69c   : > { %v1306_v51 = vpop.f32.mrf.mxu1 }
 0x69d   : > { %1331 = vmatpush.msra.mxu3 %v1306_v51 }
 0x69e   : > { %1483 = vmatmul.msk.f32.vlgmr.msra.gmra.mxu3 %vm230_vm0, %v594_v46 }
 0x6ae   : > { %v1309_v52 = vpop.f32.mrf.mxu1 }
 0x6af   : > { %1354 = vmatpush.msra.mxu0 %v1309_v52 }
 0x6b0   : > { %1484 = vmatmul.msk.f32.vlgmr.msra.gmra.mxu0 %vm230_vm0, %v595_v53 }
 0x721   : > { %v1333_v54 = vpop.f32.mrf.mxu3 }
 0x722   : > { %v1334_v55 = vadd.f32 %v1333_v54, %v1312_v4 }
 0x724   : > { %v1359_v56 = vmax.f32 %v1334_v55, 0.0 }
 0x726   : > { %v1361_v57 = vadd.f32 %v1359_v56, %v1281_v22 }
 0x728   : > { %1363 = vst.msk [vmem:[%s210_s14] sm:$0xff] %vm230_vm0, %v1361_v57 }
 0x72d   : > { %v1356_v59 = vpop.f32.mrf.mxu0 }
 0x72e   : > { %v1357_v60 = vadd.f32 %v1356_v59, %v1312_v4 }
 0x730   : > { %v1360_v61 = vmax.f32 %v1357_v60, 0.0 }
 0x732   : > { %v1362_v58 = vadd.f32 %v1360_v61, %v1282_v24 }
 0x734   : > { %1364 = vst.msk [vmem:[%s210_s14 + $0x8] sm:$0xff] %vm230_vm0, %v1362_v58 }
 0x735 PF: > { %s13_s12 = sadd.s32 1, %s1554_s12  }
 0x736   : > { %p10_p4 = scmp.ge.s32.totalorder %s13_s12, 4  }
 0x738   :  { %12 = sbr.rel (!%p10_p4) target bundleno = 1 (0x1), region = 68 }

// kernel: forward.3
= control target key start
LH: loop header
LB: loop body
LE: loop exit
PB: predicated region body
PF: predicated region fallthrough
CT: control target
= control target key end

     0   :  { %s2938_s18 = smov 0   ;;  %s3472_s0 = inlined_call_operand.vmem [shape: f32[2,16,4], index: 0, kind: input, shape index: {}]   ;;  %s3473_s1 = inlined_call_operand.vmem [shape: f32[2,4,8], index: 1, kind: input, shape index: {}]   ;;  %s3474_s2 = inlined_call_operand.vmem [shape: f32[2,1,8], index: 2, kind: input, shape index: {}]   ;;  %s3475_s3 = inlined_call_operand.vmem [shape: f32[2,23,120], index: 3, kind: input, shape index: {}]   ;;  %s3476_s4 = inlined_call_operand.vmem [shape: f32[2,27,8], index: 4, kind: input, shape index: {}]   ;;  %s3477_s5 = inlined_call_operand.vmem [shape: f32[2,2,16,8], index: 5, kind: output, shape index: {}]  }
   0x1 LB: > { %s2715_s19 = sadd.s32 4294967295, %s2894_s18   ;;  %p2719_p0 = scmp.ge.s32.totalorder %s2894_s18, 1  ;;  %s2894_s18 = sphi %s2938_s18, %s15_s18  }
   0x2   : > { %p214_p1 = scmp.lt.s32.totalorder %s2894_s18, 3 }
   0x4   : > { %p215_p2 = pnand %p2719_p0, %p214_p1 }
   0x5   : > { %p254_p3 = scmp.lt.s32.totalorder (!%p215_p2), %s2715_s19, 1  ;;  %s2896_s14 = smov (!%p215_p2), 8  }
   0x6   : > { %218 = sbr.rel (%p215_p2) target bundleno = 3152 (0xc50), region = 40  ;;  %s2897_s15 = smov (!%p215_p2), 80  }
   0x7   : > { %s2898_s16 = smov (!%p215_p2), 104   ;;  %s2899_s17 = smov (!%p215_p2), 56  }
   0x8   : > { %s2901_s21 = smov (!%p215_p2), 114   ;;  %s2902_s22 = smov (!%p215_p2), 121  }
   0x9   : > { %s2904_s24 = smov (!%p215_p2), 100   ;;  %s2906_s25 = smov (!%p215_p2), 120  }
   0xb   : > { %s3479_s19 = smov (!%p254_p3, %s2715_s19), 1  ;;  %vm298_vm0 = vcmask 1043456   ;;  %v276_v0 = vld [vmem:[%s3472_s0] sm:$0xff]  ;;  %vm285_vm1 = vcmask 31744   ;;  %v277_v2 = vld [vmem:[%s3472_s0 + $0x8] sm:$0xff]  ;;  %v278_v3 = vld [vmem:[%s3472_s0 + $0x10] sm:$0xff] }
   0xc   : > { %s2720_s20 = sshll.u32 %s3479_s19, 2  ;;  %s260_s23 = scalar_lea.vmem %s3474_s2, %s3479_s19  ;;  %v279_v4 = vld [vmem:[%s3472_s0 + $0x18] sm:$0xff]  ;;  %vm404_vm2 = vcmask 1040384   ;;  %vm1956_vm3 = vcmask 1042432   ;;  %vm429_vm4 = vcmask 1046528   ;;  %vm358_vm5 = vcmask 64512  }
   0xd   : > { %s257_s26 = scalar_lea.vmem %s3473_s1, %s2720_s20  ;;  %s2793_s10 = smul.u32 24, %s3479_s19  ;;  %v2815_v5 = vld [vmem:[%s260_s23] ss:$0 sm:$0xff]  ;;  %vm361_vm6 = vcmask 130048   ;;  %vm890_vm7 = vcmask 56320   ;;  %v2905_v63 = vmov 8.0  }
   0xe   : > { %v280_v1 = vld [vmem:[%s257_s26] sm:$0xf]  ;;  %s2900_s20 = smov 32   ;;  %s2903_s23 = smov 107   ;;  %2816 = vrcp.f32 %v2905_v63  ;;  %vm526_vm8 = vcmask 130112   ;;  %vm587_vm9 = vcmask 195712  }
   0xf   : > { %2726 = vmatpush.msk.msra.mxu0 %vm298_vm0, %v280_v1  ;;  %s2973_s13 = scalar_lea.vmem %s3475_s3, %s2793_s10  ;;  %s2907_s26 = smov 112  }
  0x10   : > { %2727 = vmatmul.msk.f32.vlgmr.msra.gmra.mxu0 %vm285_vm1, %v276_v0  ;;  %v336_v7 = vld [vmem:[%s2973_s13 + $0x8] sm:$0xff]  ;;  %v3019_v42 = vld [vmem:[%s2973_s13] sm:$0xff]  ;;  %v337_v43 = vld [vmem:[%s2973_s13 + $0x10] sm:$0x7f]  ;;  %s2791_s27 = sshll.u32 %s3479_s19, 5 }
  0x11   : > { %382 = vmatpush.msra.mxu1 %v336_v7  ;;  %s3148_s30 = scalar_lea.vmem %s3476_s4, %s2791_s27  ;;  %s3388_s8 = scalar_lea.vmem %s3477_s5, %s2791_s27 }
  0x13   : > { %383 = vmatpush.msra.mxu1 %v3019_v42 }
  0x15   : > { %2741 = vmatpush.msk.msrb.mxu1 %vm429_vm4, %v337_v43 }
  0x18   : > { %2728 = vmatmul.msk.f32.gmra.mxu0 %vm285_vm1, %v277_v2  ;;  %v2817_v2 = vpop.eup %2816 }
  0x19   : > { %vm478_vm10 = vweird.f32 %v2817_v2 }
  0x20   : > { %2729 = vmatmul.msk.f32.gmra.mxu0 %vm285_vm1, %v278_v3 }
  0x28   : > { %2730 = vmatmul.msk.f32.gmra.mxu0 %vm285_vm1, %v279_v4 }
  0x8d   : > { %v319_v6 = vpop.f32.mrf.mxu0 }
  0x8e   : > { %v320_v8 = vadd.f32 %v2815_v5, %v319_v6  ;;  %v474_v6 = vmul.f32 8.0, %v2817_v2 }
  0x90   : > { %v2976_v9 = vmax.f32 %v320_v8, 0.0 }
  0x92   : > { %v814_v10 = vrot.slane %v2976_v9, 7  ;;  %v346_v17 = vrot.slane %v2976_v9, 4 }
  0x94   : > { %v818_v11 = vsub.f32 %v2976_v9, %v814_v10 }
  0x95   : > { %v322_v12 = vpop.f32.mrf.mxu0 }
  0x96   : > { %v323_v13 = vadd.f32 %v2815_v5, %v322_v12  ;;  %v822_v14 = vrot.slane %v818_v11, 1  ;;  %v1957_v23 = vrot.slane %v818_v11, 5  ;;  %v475_v11 = vsub.f32 1.0, %v474_v6 }
  0x98   : > { %v2980_v15 = vmax.f32 %v323_v13, 0.0  ;;  %826 = vxpose.xlu1.b32.start.end [1/1] (short) (narrow) %v822_v14, 8 }
  0x9a   : > { %v1946_v16 = vrot.slane %v2980_v15, 7  ;;  %v347_v18 = vrot.slane %v2980_v15, 4 }
  0x9c   : > { %v2988_v19 = vsel %vm298_vm0, %v346_v17, %v347_v18  ;;  %v1947_v20 = vsel %vm404_vm2, %v814_v10, %v1946_v16 }
  0x9d   : > { %v325_v21 = vpop.f32.mrf.mxu0  ;;  %352 = vrot.lane.b32.xlu0 %v2988_v19, %s2896_s14  ;;  %v1952_v22 = vsub.f32 %v2980_v15, %v1947_v20 }
  0x9e   : > { %v326_v24 = vadd.f32 %v2815_v5, %v325_v21  ;;  %v476_v21 = vmul.f32 %v2817_v2, %v475_v11 }
  0x9f   : > { %v1958_v25 = vrot.slane %v1952_v22, 5 }
  0xa0   : > { %v2997_v27 = vmax.f32 %v326_v24, 0.0 }
  0xa1   : > { %v2995_v26 = vsel %vm1956_vm3, %v1957_v23, %v1958_v25 }
  0xa2   : > { %v815_v30 = vrot.slane %v2997_v27, 7  ;;  %v349_v33 = vrot.slane %v2997_v27, 4 }
  0xa4   : > { %v819_v35 = vsub.f32 %v2997_v27, %v815_v30 }
  0xa5   : > { %v328_v28 = vpop.f32.mrf.mxu0 }
  0xa6   : > { %v329_v29 = vadd.f32 %v2815_v5, %v328_v28  ;;  %v1960_v39 = vrot.slane %v819_v35, 5  ;;  %v823_v60 = vrot.slane %v819_v35, 1 }
  0xa8   : > { %v3000_v31 = vmax.f32 %v329_v29, 0.0 }
  0xaa   : > { %v1948_v32 = vrot.slane %v3000_v31, 7  ;;  %v350_v34 = vrot.slane %v3000_v31, 4 }
  0xac   : > { %v3009_v36 = vsel %vm298_vm0, %v349_v33, %v350_v34  ;;  %v1949_v37 = vsel %vm404_vm2, %v815_v30, %v1948_v32  ;;  %v477_v32 = vadd.f32 %v2817_v2, %v476_v21 }
  0xad   : > { %354 = vrot.lane.b32.xlu0 %v3009_v36, %s2896_s14  ;;  %v1953_v38 = vsub.f32 %v3000_v31, %v1949_v37 }
  0xae   : > { %v3058_v43 = vsel %vm478_vm10, %v2817_v2, %v477_v32 }
  0xaf   : > { %v1961_v40 = vrot.slane %v1953_v38, 5 }
  0xb1   : > { %v3016_v41 = vsel %vm1956_vm3, %v1960_v39, %v1961_v40 }
 0x10f   : > { %v353_v44 = vpop.permute.xlu0 %352 }
 0x110   : > { %v359_v45 = vsel %vm358_vm5, %v2976_v9, %v353_v44 }
 0x111   : > { %2731 = vmatmul.msk.f32.vlgmr.msra.gmra.mxu1 %vm361_vm6, %v359_v45 }
 0x11f   : > { %v355_v46 = vpop.permute.xlu0 %354 }
 0x120   : > { %v360_v47 = vsel %vm358_vm5, %v2997_v27, %v355_v46 }
 0x121   : > { %2732 = vmatmul.msk.f32.gmra.mxu1 %vm361_vm6, %v360_v47 }
 0x13c   : > { %v842_v48 = vpop.trf.xlu1 }
 0x13d   : > { %2742 = vmatmul.msk.f32.vlgmr.msrb.gmra.mxu1 %vm890_vm7, %v842_v48 }
 0x18e   : > { %v385_v49 = vpop.f32.mrf.mxu1 }
 0x18f   : > { %417 = vrot.lane.b32.xlu2 %v385_v49, %s2897_s15  ;;  %v400_v50 = vrot.slane %v385_v49, 7  ;;  %v425_v51 = vrot.slane %v385_v49, 1  ;;  %v442_v52 = vrot.slane %v385_v49, 2  ;;  %v393_v1 = vrot.slane %v385_v49, 6 }
 0x191   : > { %409 = vrot.lane.b32.xlu1 %v400_v50, %s2898_s16 }
 0x197   : > { %434 = vrot.lane.b32.xlu2 %v425_v51, %s2899_s17 }
 0x19e   : > { %v3034_v53 = vpop.f32.mrf.mxu1 }
 0x19f   : > { %451 = vrot.lane.b32.xlu2 %v442_v52, %s2900_s20  ;;  %419 = vrot.lane.b32.xlu0 %v3034_v53, %s2897_s15  ;;  %v426_v54 = vrot.slane %v3034_v53, 1  ;;  %v401_v55 = vrot.slane %v3034_v53, 7  ;;  %v443_v56 = vrot.slane %v3034_v53, 2  ;;  %v394_v52 = vrot.slane %v3034_v53, 6 }
 0x1a7   : > { %436 = vrot.lane.b32.xlu0 %v426_v54, %s2899_s17  ;;  %411 = vrot.lane.b32.xlu2 %v401_v55, %s2898_s16 }
 0x1af   : > { %453 = vrot.lane.b32.xlu0 %v443_v56, %s2900_s20 }
 0x1ba   : > { %v3045_v57 = vpop.f32.mrf.mxu1 }
 0x1bb   : > { %947 = vrot.lane.b32.xlu0 %v3045_v57, %s2901_s21  ;;  %v931_v58 = vrot.slane %v3045_v57, 7  ;;  %v955_v59 = vrot.slane %v3045_v57, 1  ;;  %v971_v61 = vrot.slane %v3045_v57, 2 }
 0x1c3   : > { %939 = vrot.lane.b32.xlu0 %v931_v58, %s2902_s22 }
 0x1cb   : > { %963 = vrot.lane.b32.xlu0 %v955_v59, %s2903_s23 }
 0x1cd   : > { %858 = vxpose.xlu2.b32.start.end [1/1] (short) (narrow) %v823_v60, 8 }
 0x1d3   : > { %979 = vrot.lane.b32.xlu0 %v971_v61, %s2904_s24 }
 0x1e9   : > { %v418_v62 = vpop.permute.xlu2 %417 }
 0x1f1   : > { %v435_v0 = vpop.permute.xlu2 %434 }
 0x1f9   : > { %v452_v8 = vpop.permute.xlu2 %451 }
 0x201   : > { %v412_v47 = vpop.permute.xlu2 %411 }
 0x202   : > { %v416_v58 = vadd.f32 %v412_v47, %v394_v52 }
 0x203   : > { %v410_v3 = vpop.permute.xlu1 %409 }
 0x204   : > { %v415_v4 = vadd.f32 %v410_v3, %v393_v1 }
 0x206   : > { %v423_v5 = vadd.f32 %v418_v62, %v415_v4 }
 0x208   : > { %v440_v7 = vadd.f32 %v435_v0, %v423_v5 }
 0x20a   : > { %v457_v10 = vadd.f32 %v452_v8, %v440_v7 }
 0x20c   : > { %v459_v12 = vsel %vm358_vm5, %v457_v10, 0.0  ;;  %v527_v13 = vsel %vm526_vm8, %v457_v10, 0.0  ;;  %v588_v14 = vsel %vm587_vm9, %v457_v10, 0.0 }
 0x20d   : > { %v460_v16 = vrot.slane %v459_v12, 4  ;;  %v528_v17 = vrot.slane %v527_v13, 4  ;;  %v589_v20 = vrot.slane %v588_v14, 4 }
 0x20f   : > { %v461_v22 = vadd.f32 %v460_v16, %v459_v12  ;;  %v529_v23 = vadd.f32 %v528_v17, %v527_v13  ;;  %v590_v24 = vadd.f32 %v589_v20, %v588_v14 }
 0x211   : > { %v420_v25 = vpop.permute.xlu0 %419  ;;  %v462_v28 = vrot.slane %v461_v22, 2  ;;  %v530_v29 = vrot.slane %v529_v23, 2  ;;  %v591_v30 = vrot.slane %v590_v24, 2 }
 0x212   : > { %v424_v62 = vadd.f32 %v420_v25, %v416_v58 }
 0x213   : > { %v463_v33 = vadd.f32 %v462_v28, %v461_v22  ;;  %v531_v35 = vadd.f32 %v530_v29, %v529_v23  ;;  %v592_v37 = vadd.f32 %v591_v30, %v590_v24 }
 0x215   : > { %v464_v38 = vrot.slane %v463_v33, 1  ;;  %v532_v39 = vrot.slane %v531_v35, 1  ;;  %v593_v40 = vrot.slane %v592_v37, 1 }
 0x217   : > { %v465_v44 = vadd.f32 %v464_v38, %v463_v33  ;;  %v533_v45 = vadd.f32 %v532_v39, %v531_v35  ;;  %v594_v46 = vadd.f32 %v593_v40, %v592_v37 }
 0x219   : > { %v437_v48 = vpop.permute.xlu0 %436  ;;  %v480_v49 = vmul.f32 %v3058_v43, %v465_v44  ;;  %v541_v50 = vmul.f32 %v533_v45, %v3058_v43  ;;  %v602_v51 = vmul.f32 %v594_v46, %v3058_v43 }
 0x21a   : > { %v441_v1 = vadd.f32 %v437_v48, %v424_v62 }
 0x21b   : > { %v3064_v54 = vsub.f32 %v457_v10, %v480_v49  ;;  %v3066_v55 = vsub.f32 %v457_v10, %v541_v50  ;;  %v3068_v56 = vsub.f32 %v457_v10, %v602_v51 }
 0x21d   : > { %v484_v59 = vmul.f32 %v3064_v54, %v3064_v54  ;;  %v545_v60 = vmul.f32 %v3066_v55, %v3066_v55  ;;  %v606_v61 = vmul.f32 %v3068_v56, %v3068_v56 }
 0x21f   : > { %v486_v63 = vsel %vm358_vm5, %v484_v59, 0.0  ;;  %v547_v53 = vsel %vm526_vm8, %v545_v60, 0.0  ;;  %v608_v0 = vsel %vm587_vm9, %v606_v61, 0.0 }
 0x220   : > { %v487_v2 = vrot.slane %v486_v63, 4  ;;  %v548_v3 = vrot.slane %v547_v53, 4  ;;  %v609_v4 = vrot.slane %v608_v0, 4 }
 0x221   : > { %v454_v5 = vpop.permute.xlu0 %453 }
 0x222   : > { %v458_v6 = vadd.f32 %v454_v5, %v441_v1  ;;  %v488_v7 = vadd.f32 %v487_v2, %v486_v63  ;;  %v549_v8 = vadd.f32 %v548_v3, %v547_v53  ;;  %v610_v10 = vadd.f32 %v609_v4, %v608_v0 }
 0x224   : > { %v489_v11 = vrot.slane %v488_v7, 2  ;;  %v550_v12 = vrot.slane %v549_v8, 2  ;;  %v611_v13 = vrot.slane %v610_v10, 2  ;;  %v595_v14 = vsel %vm587_vm9, %v458_v6, 0.0 }
 0x225   : > { %v596_v16 = vrot.slane %v595_v14, 4  ;;  %v466_v17 = vsel %vm358_vm5, %v458_v6, 0.0  ;;  %v534_v20 = vsel %vm526_vm8, %v458_v6, 0.0 }
 0x226   : > { %v490_v21 = vadd.f32 %v489_v11, %v488_v7  ;;  %v551_v22 = vadd.f32 %v550_v12, %v549_v8  ;;  %v612_v23 = vadd.f32 %v611_v13, %v610_v10  ;;  %v467_v24 = vrot.slane %v466_v17, 4 }
 0x227   : > { %v597_v25 = vadd.f32 %v596_v16, %v595_v14  ;;  %v535_v28 = vrot.slane %v534_v20, 4  ;;  %v925_v7 = vrot.slane %v3045_v57, 6 }
 0x228   : > { %v491_v29 = vrot.slane %v490_v21, 1  ;;  %v552_v30 = vrot.slane %v551_v22, 1  ;;  %v613_v32 = vrot.slane %v612_v23, 1  ;;  %v468_v33 = vadd.f32 %v467_v24, %v466_v17 }
 0x229   : > { %v598_v35 = vrot.slane %v597_v25, 2  ;;  %v536_v37 = vadd.f32 %v535_v28, %v534_v20 }
 0x22a   : > { %v492_v38 = vadd.f32 %v491_v29, %v490_v21  ;;  %v553_v39 = vadd.f32 %v552_v30, %v551_v22  ;;  %v614_v40 = vadd.f32 %v613_v32, %v612_v23  ;;  %v469_v44 = vrot.slane %v468_v33, 2 }
 0x22b   : > { %v599_v45 = vadd.f32 %v598_v35, %v597_v25  ;;  %v537_v46 = vrot.slane %v536_v37, 2 }
 0x22c   : > { %v500_v47 = vmul.f32 %v492_v38, %v3058_v43  ;;  %v561_v48 = vmul.f32 %v553_v39, %v3058_v43  ;;  %v622_v49 = vmul.f32 %v614_v40, %v3058_v43  ;;  %v470_v50 = vadd.f32 %v469_v44, %v468_v33 }
 0x22d   : > { %v948_v51 = vpop.permute.xlu0 %947  ;;  %v600_v52 = vrot.slane %v599_v45, 1  ;;  %v538_v58 = vadd.f32 %v537_v46, %v536_v37 }
 0x22e   : > { %v502_v59 = vadd.f32 1e-05, %v500_v47  ;;  %v3085_v60 = vadd.f32 1e-05, %v561_v48  ;;  %v3087_v61 = vadd.f32 1e-05, %v622_v49 }
 0x22f   : > { %v601_v62 = vadd.f32 %v600_v52, %v599_v45  ;;  %v471_v63 = vrot.slane %v470_v50, 1  ;;  %v539_v53 = vrot.slane %v538_v58, 1 }
 0x230   : > { %2818 = vrsqrt.f32 %v502_v59  ;;  %vm510_vm11 = vweird.f32 %v502_v59  ;;  %vm571_vm13 = vweird.f32 %v3085_v60  ;;  %vm632_vm2 = vweird.f32 %v3087_v61 }
 0x231   : > { %2820 = vrsqrt.f32 %v3085_v60  ;;  %v603_v0 = vmul.f32 %v601_v62, %v3058_v43  ;;  %v472_v1 = vadd.f32 %v471_v63, %v470_v50  ;;  %v540_v2 = vadd.f32 %v539_v53, %v538_v58 }
 0x232   : > { %2822 = vrsqrt.f32 %v3087_v61 }
 0x233   : > { %v3092_v3 = vsub.f32 %v458_v6, %v603_v0  ;;  %v481_v4 = vmul.f32 %v3058_v43, %v472_v1  ;;  %v542_v5 = vmul.f32 %v540_v2, %v3058_v43 }
 0x235   : > { %v940_v8 = vpop.permute.xlu0 %939  ;;  %v607_v10 = vmul.f32 %v3092_v3, %v3092_v3  ;;  %v3099_v11 = vsub.f32 %v458_v6, %v481_v4  ;;  %v3101_v13 = vsub.f32 %v458_v6, %v542_v5 }
 0x236   : > { %v2819_v12 = vpop.eup %2818  ;;  %v945_v23 = vadd.f32 %v940_v8, %v925_v7 }
 0x237   : > { %v2821_v14 = vpop.eup %2820  ;;  %v505_v16 = vmul.f32 %v2819_v12, %v502_v59  ;;  %v615_v17 = vsel %vm587_vm9, %v607_v10, 0.0  ;;  %v485_v20 = vmul.f32 %v3099_v11, %v3099_v11  ;;  %v546_v32 = vmul.f32 %v3101_v13, %v3101_v13 }
 0x238   : > { %v2823_v21 = vpop.eup %2822  ;;  %v566_v57 = vmul.f32 %v2821_v14, %v3085_v60  ;;  %v616_v22 = vrot.slane %v615_v17, 4  ;;  %vm511_vm12 = vweird.f32 %v2819_v12  ;;  %v953_v44 = vadd.f32 %v948_v51, %v945_v23 }
 0x239   : > { %v506_v24 = vmul.f32 %v2819_v12, %v505_v16  ;;  %v627_v25 = vmul.f32 %v2823_v21, %v3087_v61  ;;  %v493_v28 = vsel %vm358_vm5, %v485_v20, 0.0  ;;  %v554_v40 = vsel %vm526_vm8, %v546_v32, 0.0  ;;  %vm512_vm1 = vmor %vm510_vm11, %vm511_vm12 }
 0x23a   : > { %v567_v6 = vmul.f32 %v2821_v14, %v566_v57  ;;  %v617_v29 = vadd.f32 %v616_v22, %v615_v17  ;;  %v494_v30 = vrot.slane %v493_v28, 4  ;;  %v555_v48 = vrot.slane %v554_v40, 4 }
 0x23b   : > { %v507_v33 = vmul.f32 0.5, %v506_v24  ;;  %v628_v35 = vmul.f32 %v2823_v21, %v627_v25  ;;  %vm572_vm14 = vweird.f32 %v2821_v14  ;;  %vm633_vm15 = vweird.f32 %v2823_v21 }
 0x23c   : > { %v568_v37 = vmul.f32 0.5, %v567_v6  ;;  %v618_v38 = vrot.slane %v617_v29, 2  ;;  %v495_v39 = vadd.f32 %v494_v30, %v493_v28  ;;  %v556_v63 = vadd.f32 %v555_v48, %v554_v40  ;;  %vm573_vm3 = vmor %vm571_vm13, %vm572_vm14 }
 0x23d   : > { %v964_v45 = vpop.permute.xlu0 %963  ;;  %v508_v46 = vsub.f32 1.5, %v507_v33  ;;  %v629_v47 = vmul.f32 0.5, %v628_v35  ;;  %vm634_vm10 = vmor %vm632_vm2, %vm633_vm15 }
 0x23e   : > { %v569_v49 = vsub.f32 1.5, %v568_v37  ;;  %v619_v50 = vadd.f32 %v618_v38, %v617_v29  ;;  %v496_v52 = vrot.slane %v495_v39, 2  ;;  %v969_v1 = vadd.f32 %v964_v45, %v953_v44 }
 0x23f   : > { %v509_v58 = vmul.f32 %v2819_v12, %v508_v46  ;;  %v630_v62 = vsub.f32 1.5, %v629_v47  ;;  %v557_v5 = vrot.slane %v556_v63, 2 }
 0x240   : > { %v570_v53 = vmul.f32 %v2821_v14, %v569_v49  ;;  %v620_v0 = vrot.slane %v619_v50, 1  ;;  %v497_v51 = vadd.f32 %v496_v52, %v495_v39 }
 0x241   : > { %v513_v2 = vsel %vm512_vm1, %v2819_v12, %v509_v58  ;;  %v631_v4 = vmul.f32 %v2823_v21, %v630_v62  ;;  %v558_v20 = vadd.f32 %v557_v5, %v556_v63 }
 0x242   : > { %v524_v7 = vmul.f32 %v513_v2, %v3064_v54  ;;  %v574_v8 = vsel %vm573_vm3, %v2821_v14, %v570_v53  ;;  %v621_v10 = vadd.f32 %v620_v0, %v619_v50  ;;  %v498_v16 = vrot.slane %v497_v51, 1 }
 0x243   : > { %v585_v59 = vmul.f32 %v574_v8, %v3066_v55  ;;  %v635_v17 = vsel %vm634_vm10, %v2823_v21, %v631_v4  ;;  %v559_v54 = vrot.slane %v558_v20, 1 }
 0x244   : > { %2733 = vmatpush.xpose.msk.msra.mxu2 %vm358_vm5, %v524_v7  ;;  %v646_v61 = vmul.f32 %v635_v17, %v3068_v56  ;;  %v623_v12 = vmul.f32 %v621_v10, %v3058_v43  ;;  %v499_v60 = vadd.f32 %v498_v16, %v497_v51 }
 0x245   : > { %725 = vrot.lane.b32.xlu0 %v585_v59, %s2906_s25  ;;  %v980_v57 = vpop.permute.xlu0 %979  ;;  %v560_v21 = vadd.f32 %v559_v54, %v558_v20 }
 0x246   : > { %728 = vrot.lane.b32.xlu2 %v646_v61, %s2907_s26  ;;  %v985_v14 = vadd.f32 %v980_v57, %v969_v1  ;;  %v625_v22 = vadd.f32 1e-05, %v623_v12  ;;  %v501_v55 = vmul.f32 %v499_v60, %v3058_v43 }
 0x247   : > { %2734 = vmatmul.msk.f32.vlgmr.msra.gmra.mxu2 %vm358_vm5, %v524_v7  ;;  %v562_v25 = vmul.f32 %v560_v21, %v3058_v43 }
 0x248   : > { %v987_v56 = vsel %vm890_vm7, %v985_v14, 0.0  ;;  %2824 = vrsqrt.f32 %v625_v22  ;;  %v503_v23 = vadd.f32 1e-05, %v501_v55  ;;  %vm642_vm12 = vweird.f32 %v625_v22 }
 0x249   : > { %v988_v24 = vrot.slane %v987_v56, 4  ;;  %v564_v6 = vadd.f32 1e-05, %v562_v25 }
 0x24a   : > { %2826 = vrsqrt.f32 %v503_v23  ;;  %vm520_vm15 = vweird.f32 %v503_v23 }
 0x24b   : > { %v989_v28 = vadd.f32 %v988_v24, %v987_v56  ;;  %2828 = vrsqrt.f32 %v564_v6  ;;  %vm581_vm3 = vweird.f32 %v564_v6 }
 0x24d   : > { %v990_v29 = vrot.slane %v989_v28, 2 }
 0x24e   : > { %v2825_v30 = vpop.eup %2824 }
 0x24f   : > { %v991_v32 = vadd.f32 %v990_v29, %v989_v28  ;;  %v637_v33 = vmul.f32 %v2825_v30, %v625_v22  ;;  %vm643_vm11 = vweird.f32 %v2825_v30  ;;  %v3151_v28 = vld [vmem:[%s3148_s30 + $0x10] sm:$0xff] }
 0x250   : > { %v2827_v35 = vpop.eup %2826  ;;  %vm644_vm14 = vmor %vm642_vm12, %vm643_vm11 }
 0x251   : > { %v992_v37 = vrot.slane %v991_v32, 1  ;;  %v638_v38 = vmul.f32 %v2825_v30, %v637_v33  ;;  %v515_v39 = vmul.f32 %v2827_v35, %v503_v23  ;;  %v2829_v40 = vpop.eup %2828  ;;  %vm521_vm13 = vweird.f32 %v2827_v35 }
 0x252   : > { %v576_v47 = vmul.f32 %v2829_v40, %v564_v6  ;;  %vm522_vm1 = vmor %vm520_vm15, %vm521_vm13  ;;  %vm582_vm2 = vweird.f32 %v2829_v40 }
 0x253   : > { %v993_v44 = vadd.f32 %v992_v37, %v991_v32  ;;  %v639_v45 = vmul.f32 0.5, %v638_v38  ;;  %v516_v46 = vmul.f32 %v2827_v35, %v515_v39  ;;  %vm583_vm10 = vmor %vm581_vm3, %vm582_vm2 }
 0x254   : > { %v577_v52 = vmul.f32 %v2829_v40, %v576_v47 }
 0x255   : > { %v1001_v48 = vmul.f32 %v993_v44, %v3058_v43  ;;  %v640_v49 = vsub.f32 1.5, %v639_v45  ;;  %v517_v50 = vmul.f32 0.5, %v516_v46 }
 0x256   : > { %v578_v53 = vmul.f32 0.5, %v577_v52 }
 0x257   : > { %v1003_v58 = vsub.f32 %v985_v14, %v1001_v48  ;;  %v641_v62 = vmul.f32 %v2825_v30, %v640_v49  ;;  %v518_v63 = vsub.f32 1.5, %v517_v50 }
 0x258   : > { %v579_v4 = vsub.f32 1.5, %v578_v53 }
 0x259   : > { %v1005_v0 = vmul.f32 %v1003_v58, %v1003_v58  ;;  %v645_v51 = vsel %vm644_vm14, %v2825_v30, %v641_v62  ;;  %v519_v1 = vmul.f32 %v2827_v35, %v518_v63 }
 0x25a   : > { %v647_v2 = vmul.f32 %v645_v51, %v3092_v3  ;;  %v580_v8 = vmul.f32 %v2829_v40, %v579_v4 }
 0x25b   : > { %v523_v5 = vsel %vm522_vm1, %v2827_v35, %v519_v1  ;;  %v1007_v10 = vsel %vm890_vm7, %v1005_v0, 0.0 }
 0x25c   : > { %758 = vrot.lane.b32.xlu0 %v647_v2, %s2907_s26  ;;  %v525_v7 = vmul.f32 %v523_v5, %v3099_v11  ;;  %v584_v16 = vsel %vm583_vm10, %v2829_v40, %v580_v8  ;;  %v1008_v59 = vrot.slane %v1007_v10, 4 }
 0x25d   : > { %v586_v3 = vmul.f32 %v584_v16, %v3101_v13 }
 0x25e   : > { %2735 = vmatpush.xpose.msk.msra.mxu3 %vm358_vm5, %v525_v7  ;;  %v1009_v17 = vadd.f32 %v1008_v59, %v1007_v10 }
 0x260   : > { %v1010_v11 = vrot.slane %v1009_v17, 2 }
 0x261   : > { %2736 = vmatmul.msk.f32.vlgmr.msra.gmra.mxu3 %vm358_vm5, %v525_v7 }
 0x262   : > { %v1011_v61 = vadd.f32 %v1010_v11, %v1009_v17 }
 0x264   : > { %755 = vrot.lane.b32.xlu0 %v586_v3, %s2906_s25  ;;  %v1012_v12 = vrot.slane %v1011_v61, 1 }
 0x266   : > { %v874_v20 = vpop.trf.xlu2  ;;  %v1013_v60 = vadd.f32 %v1012_v12, %v1011_v61 }
 0x267   : > { %2743 = vmatmul.msk.f32.gmra.mxu1 %vm890_vm7, %v874_v20 }
 0x268   : > { %v1021_v57 = vmul.f32 %v1013_v60, %v3058_v43 }
 0x26a   : > { %v1023_v54 = vadd.f32 1e-05, %v1021_v57 }
 0x26c   : > { %2830 = vrsqrt.f32 %v1023_v54  ;;  %vm1031_vm12 = vweird.f32 %v1023_v54 }
 0x272   : > { %v2831_v14 = vpop.eup %2830 }
 0x273   : > { %v1026_v22 = vmul.f32 %v2831_v14, %v1023_v54  ;;  %vm1032_vm11 = vweird.f32 %v2831_v14 }
 0x274   : > { %vm1033_vm13 = vmor %vm1031_vm12, %vm1032_vm11 }
 0x275   : > { %v1027_v55 = vmul.f32 %v2831_v14, %v1026_v22 }
 0x277   : > { %v1028_v13 = vmul.f32 0.5, %v1027_v55 }
 0x279   : > { %v1029_v21 = vsub.f32 1.5, %v1028_v13 }
 0x27b   : > { %v1030_v56 = vmul.f32 %v2831_v14, %v1029_v21 }
 0x27d   : > { %v1034_v23 = vsel %vm1033_vm13, %v2831_v14, %v1030_v56 }
 0x27e   : > { %v1045_v24 = vmul.f32 %v1034_v23, %v1003_v58 }
 0x2a0   : > { %v729_v25 = vpop.permute.xlu2 %728 }
 0x2a1   : > { %2737 = vmatpush.xpose.msk.msrb.mxu2 %vm358_vm5, %v729_v25 }
 0x2a5   : > { %2744 = vmatpush.xpose.msk.msra.mxu2 %vm890_vm7, %v1045_v24 }
 0x2b7   : > { %v726_v6 = vpop.permute.xlu0 %725 }
 0x2b8   : > { %2738 = vmatmul.msk.f32.vlgmr.msrb.gmra.mxu2 %vm358_vm5, %v726_v6 }
 0x2b9   : > { %1142 = vmatpush.msrb.mxu2 %v3151_v28 }
 0x2c0   : > { %2745 = vmatmul.msk.f32.vlgmr.msra.gmra.mxu2 %vm890_vm7, %v1045_v24 }
 0x2c8   : > { %2748 = vmatmul.msk.f32.vlgmr.msrb.gmra.mxu2 %vm358_vm5, %v2976_v9 }
 0x2ca   : > { %v3166_v38 = vpop.f32.mrf.mxu2 }
 0x2ce   : > { %v759_v29 = vpop.permute.xlu0 %758 }
 0x2cf   : > { %2739 = vmatpush.xpose.msk.msrb.mxu3 %vm358_vm5, %v759_v29 }
 0x2d0   : > { %2749 = vmatmul.msk.f32.gmra.mxu2 %vm358_vm5, %v2997_v27 }
 0x2d6   : > { %v756_v30 = vpop.permute.xlu0 %755 }
 0x2d7   : > { %2740 = vmatmul.msk.f32.vlgmr.msrb.gmra.mxu3 %vm358_vm5, %v756_v30 }
 0x2e4   : > { %v920_v32 = vpop.f32.mrf.mxu1  ;;  %v3172_v45 = vpop.f32.mrf.mxu3 }
 0x2e5   : > { %949 = vrot.lane.b32.xlu1 %v920_v32, %s2901_s21  ;;  %v932_v33 = vrot.slane %v920_v32, 7  ;;  %v972_v35 = vrot.slane %v920_v32, 2  ;;  %v956_v37 = vrot.slane %v920_v32, 1  ;;  %v926_v50 = vrot.slane %v920_v32, 6 }
 0x2e7   : > { %941 = vrot.lane.b32.xlu0 %v932_v33, %s2902_s22 }
 0x2ed   : > { %981 = vrot.lane.b32.xlu1 %v972_v35, %s2904_s24 }
 0x2ef   : > { %965 = vrot.lane.b32.xlu0 %v956_v37, %s2903_s23 }
 0x33b   : > { %v751_v39 = vpop.f32.mrf.mxu2 }
 0x33c   : > { %v784_v47 = vmul.f32 0.35355338, %v751_v39 }
 0x33e   : > { %v786_v63 = vsel %vm358_vm5, %v784_v47, -inf }
 0x343   : > { %v3168_v40 = vpop.f32.mrf.mxu2 }
 0x34b   : > { %v3170_v44 = vpop.f32.mrf.mxu2 }
 0x353   : > { %v1147_v46 = vpop.f32.mrf.mxu2 }
 0x354   : > { %1192 = vmatpush.msrb.mxu0 %v1147_v46 }
 0x357   : > { %v950_v48 = vpop.permute.xlu1 %949 }
 0x359   : > { %v942_v49 = vpop.permute.xlu0 %941 }
 0x35a   : > { %v781_v52 = vpop.f32.mrf.mxu3  ;;  %v946_v62 = vadd.f32 %v942_v49, %v926_v50 }
 0x35b   : > { %v785_v58 = vmul.f32 0.35355338, %v781_v52 }
 0x35c   : > { %v954_v2 = vadd.f32 %v950_v48, %v946_v62 }
 0x35d   : > { %v787_v53 = vsel %vm358_vm5, %v785_v58, -inf }
 0x35e   : > { %v788_v0 = vmax.f32 %v786_v63, %v787_v53 }
 0x35f   : > { %v982_v10 = vpop.permute.xlu1 %981 }
 0x360   : > { %v789_v51 = vsub.f32 %v784_v47, %v788_v0  ;;  %v790_v1 = vsub.f32 %v785_v58, %v788_v0 }
 0x361   : > { %v966_v4 = vpop.permute.xlu0 %965 }
 0x362   : > { %v791_v5 = vmul.f32 1.442695, %v789_v51  ;;  %v793_v7 = vmul.f32 1.442695, %v790_v1  ;;  %v970_v8 = vadd.f32 %v966_v4, %v954_v2 }
 0x364   : > { %2832 = vpow2.f32 %v791_v5  ;;  %v986_v16 = vadd.f32 %v982_v10, %v970_v8  ;;  %v3188_v8 = vld [vmem:[%s3148_s30 + $0x18] sm:$0x7] }
 0x365   : > { %2834 = vpow2.f32 %v793_v7  ;;  %v3191_v10 = vperm.slane %v3188_v8, 2 }
 0x366   : > { %v994_v59 = vsel %vm890_vm7, %v986_v16, 0.0 }
 0x367   : > { %v995_v3 = vrot.slane %v994_v59, 4 }
 0x369   : > { %v996_v17 = vadd.f32 %v995_v3, %v994_v59 }
 0x36a   : > { %v2833_v20 = vpop.eup %2832 }
 0x36b   : > { %v2835_v11 = vpop.eup %2834  ;;  %v795_v61 = vsel %vm358_vm5, %v2833_v20, 0.0  ;;  %v997_v12 = vrot.slane %v996_v17, 2 }
 0x36c   : > { %v796_v60 = vsel %vm358_vm5, %v2835_v11, 0.0 }
 0x36d   : > { %v797_v57 = vadd.f32 %v796_v60, %v795_v61  ;;  %v998_v54 = vadd.f32 %v997_v12, %v996_v17 }
 0x36f   : > { %2836 = vrcp.f32 %v797_v57  ;;  %v999_v14 = vrot.slane %v998_v54, 1  ;;  %v809_v6 = vand.u32 2147483648, %v797_v57  ;;  %v807_v32 = vand.u32 2147483647, %v797_v57 }
 0x370   : > { %vm803_vm15 = vweird.f32 %v797_v57 }
 0x371   : > { %v1000_v22 = vadd.f32 %v999_v14, %v998_v54  ;;  %v810_v37 = vor.u32 1.1754944e-38, %v809_v6  ;;  %vm808_vm2 = vcmp.eq.f32.partialorder %v807_v32, 8.507059e+37 }
 0x373   : > { %v1002_v55 = vmul.f32 %v1000_v22, %v3058_v43 }
 0x375   : > { %v2837_v13 = vpop.eup %2836  ;;  %v1004_v21 = vsub.f32 %v986_v16, %v1002_v55 }
 0x376   : > { %v799_v56 = vmul.f32 %v2837_v13, %v797_v57  ;;  %vm804_vm14 = vweird.f32 %v2837_v13 }
 0x377   : > { %v1006_v23 = vmul.f32 %v1004_v21, %v1004_v21  ;;  %vm805_vm1 = vmor %vm803_vm15, %vm804_vm14 }
 0x378   : > { %v800_v24 = vsub.f32 1.0, %v799_v56 }
 0x379   : > { %v1014_v25 = vsel %vm890_vm7, %v1006_v23, 0.0 }
 0x37a   : > { %v1015_v29 = vrot.slane %v1014_v25, 4  ;;  %v801_v30 = vmul.f32 %v2837_v13, %v800_v24 }
 0x37c   : > { %v1016_v33 = vadd.f32 %v1015_v29, %v1014_v25  ;;  %v802_v35 = vadd.f32 %v2837_v13, %v801_v30 }
 0x37e   : > { %v1017_v39 = vrot.slane %v1016_v33, 2  ;;  %v806_v46 = vsel %vm805_vm1, %v2837_v13, %v802_v35 }
 0x37f   : > { %v811_v47 = vsel %vm808_vm2, %v810_v37, %v806_v46 }
 0x380   : > { %v1018_v48 = vadd.f32 %v1017_v39, %v1016_v33  ;;  %v813_v49 = vmul.f32 %v2835_v11, %v811_v47  ;;  %v812_v7 = vmul.f32 %v2833_v20, %v811_v47 }
 0x382   : > { %v1019_v50 = vrot.slane %v1018_v48, 1  ;;  %2751 = vmatmul.msk.f32.vlgmr.msrb.gmra.mxu0 %vm358_vm5, %v813_v49 }
 0x384   : > { %v1020_v52 = vadd.f32 %v1019_v50, %v1018_v48 }
 0x386   : > { %v1022_v58 = vmul.f32 %v1020_v52, %v3058_v43  ;;  %v3212_v52 = vld [vmem:[%s3148_s30 + $0x8] sm:$0xff] }
 0x387   : > { %1286 = vmatpush.msra.mxu1 %v3212_v52 }
 0x388   : > { %v1024_v62 = vadd.f32 1e-05, %v1022_v58  ;;  %v2886_v58 = vld [vmem:[%s2973_s13 + $0x8] sm:$0xff] }
 0x389   : > { %1527 = vmatpush.msrb.mxu1 %v2886_v58 }
 0x38a   : > { %2838 = vrsqrt.f32 %v1024_v62  ;;  %vm1041_vm10 = vweird.f32 %v1024_v62 }
 0x38b   : > { %1528 = vmatpush.msrb.mxu1 %v3019_v42 }
 0x390   : > { %v2839_v63 = vpop.eup %2838 }
 0x391   : > { %v1036_v53 = vmul.f32 %v2839_v63, %v1024_v62  ;;  %vm1042_vm3 = vweird.f32 %v2839_v63 }
 0x392   : > { %vm1043_vm11 = vmor %vm1041_vm10, %vm1042_vm3 }
 0x393   : > { %v1037_v0 = vmul.f32 %v2839_v63, %v1036_v53 }
 0x395   : > { %v1038_v51 = vmul.f32 0.5, %v1037_v0 }
 0x397   : > { %v1039_v1 = vsub.f32 1.5, %v1038_v51 }
 0x399   : > { %v1040_v2 = vmul.f32 %v2839_v63, %v1039_v1 }
 0x39b   : > { %v1044_v4 = vsel %vm1043_vm11, %v2839_v63, %v1040_v2 }
 0x39c   : > { %v1046_v5 = vmul.f32 %v1044_v4, %v1004_v21 }
 0x39e   : > { %2746 = vmatpush.xpose.msk.msra.mxu3 %vm890_vm7, %v1046_v5 }
 0x3a1   : > { %2747 = vmatmul.msk.f32.vlgmr.msra.gmra.mxu3 %vm890_vm7, %v1046_v5 }
 0x3a2   : > { %1169 = vmatpush.msrb.mxu3 %v3170_v44  ;;  %v1093_v44 = vmul.f32 0.37796447, %v3168_v40 }
 0x3a4   : > { %v1095_v61 = vsel %vm358_vm5, %v1093_v44, -inf }
 0x3a9   : > { %2750 = vmatmul.msk.f32.vlgmr.msrb.gmra.mxu3 %vm358_vm5, %v812_v7 }
 0x3ff   : > { %v1194_v16 = vpop.f32.mrf.mxu0 }
 0x400   : > { %v1195_v59 = vadd.f32 %v1194_v16, %v3191_v10 }
 0x402   : > { %v1198_v3 = vmax.f32 %v1195_v59, 0.0 }
 0x404   : > { %v3195_v17 = vadd.f32 %v1198_v3, %v2997_v27 }
 0x406   : > { %1233 = vxpose.xlu1.b32.start.end [1/1] (short) (narrow) %v3195_v17, 8 }
 0x424   : > { %v1090_v11 = vpop.f32.mrf.mxu3 }
 0x425   : > { %v1094_v20 = vmul.f32 0.37796447, %v1090_v11 }
 0x427   : > { %v1096_v12 = vsel %vm358_vm5, %v1094_v20, -inf }
 0x428   : > { %v1097_v60 = vmax.f32 %v1095_v61, %v1096_v12  ;;  %v3249_v61 = vperm.slane %v3188_v8, 1 }
 0x42a   : > { %v1098_v57 = vsub.f32 %v1093_v44, %v1097_v60  ;;  %v1099_v54 = vsub.f32 %v1094_v20, %v1097_v60 }
 0x42c   : > { %v1100_v14 = vmul.f32 1.442695, %v1098_v57  ;;  %v1102_v22 = vmul.f32 1.442695, %v1099_v54  ;;  %v1171_v55 = vpop.f32.mrf.mxu3 }
 0x42d   : > { %v1172_v13 = vadd.f32 %v1171_v55, %v3191_v10 }
 0x42e   : > { %2840 = vpow2.f32 %v1100_v14 }
 0x42f   : > { %2842 = vpow2.f32 %v1102_v22  ;;  %v1197_v21 = vmax.f32 %v1172_v13, 0.0 }
 0x431   : > { %v3203_v56 = vadd.f32 %v1197_v21, %v2976_v9 }
 0x433   : > { %1201 = vxpose.xlu0.b32.start.end [1/1] (short) (narrow) %v3203_v56, 8 }
 0x434   : > { %v2841_v40 = vpop.eup %2840 }
 0x435   : > { %v2843_v23 = vpop.eup %2842  ;;  %v1104_v24 = vsel %vm358_vm5, %v2841_v40, 0.0 }
 0x436   : > { %v1105_v25 = vsel %vm358_vm5, %v2843_v23, 0.0 }
 0x437   : > { %v1106_v6 = vadd.f32 %v1105_v25, %v1104_v24 }
 0x439   : > { %2844 = vrcp.f32 %v1106_v6  ;;  %v1118_v33 = vand.u32 2147483648, %v1106_v6  ;;  %v1116_v37 = vand.u32 2147483647, %v1106_v6  ;;  %vm1112_vm13 = vweird.f32 %v1106_v6 }
 0x43b   : > { %v1119_v46 = vor.u32 1.1754944e-38, %v1118_v33  ;;  %vm1117_vm15 = vcmp.eq.f32.partialorder %v1116_v37, 8.507059e+37 }
 0x43f   : > { %v2845_v29 = vpop.eup %2844 }
 0x440   : > { %v1108_v30 = vmul.f32 %v2845_v29, %v1106_v6  ;;  %vm1113_vm12 = vweird.f32 %v2845_v29 }
 0x441   : > { %vm1114_vm14 = vmor %vm1112_vm13, %vm1113_vm12 }
 0x442   : > { %v1109_v32 = vsub.f32 1.0, %v1108_v30 }
 0x444   : > { %v1110_v35 = vmul.f32 %v2845_v29, %v1109_v32 }
 0x446   : > { %v1111_v39 = vadd.f32 %v2845_v29, %v1110_v35 }
 0x448   : > { %v1115_v47 = vsel %vm1114_vm14, %v2845_v29, %v1111_v39 }
 0x449   : > { %v1120_v48 = vsel %vm1117_vm15, %v1119_v46, %v1115_v47 }
 0x44a   : > { %v1122_v49 = vmul.f32 %v2843_v23, %v1120_v48  ;;  %v1121_v50 = vmul.f32 %v2841_v40, %v1120_v48 }
 0x460   : > { %1491 = vrot.lane.b32.xlu1 %v350_v34, %s2896_s14 }
 0x4a1   : > { %1489 = vrot.lane.b32.xlu0 %v347_v18, %s2896_s14 }
 0x4aa   : > { %v1249_v63 = vpop.trf.xlu1 }
 0x4d2   : > { %v1492_v51 = vpop.permute.xlu1 %1491 }
 0x4d3   : > { %v1497_v18 = vsel %vm358_vm5, %v2997_v27, %v1492_v51  ;;  %v1498_v4 = vsel %vm358_vm5, %v3000_v31, %v1492_v51 }
 0x4d4   : > { %v1506_v5 = vrot.slane %v1497_v18, 4  ;;  %v1507_v7 = vrot.slane %v1498_v4, 4 }
 0x4d7   : > { %v1217_v62 = vpop.trf.xlu0 }
 0x4d8   : > { %2752 = vmatmul.msk.f32.vlgmr.msra.gmra.mxu1 %vm358_vm5, %v1217_v62 }
 0x4e0   : > { %2753 = vmatmul.msk.f32.gmra.mxu1 %vm358_vm5, %v1249_v63 }
 0x513   : > { %v1490_v53 = vpop.permute.xlu0 %1489 }
 0x514   : > { %v1495_v34 = vsel %vm358_vm5, %v2976_v9, %v1490_v53  ;;  %v1496_v0 = vsel %vm358_vm5, %v2980_v15, %v1490_v53  ;;  %v1508_v9 = vsel %vm298_vm0, %v1506_v5, %v1507_v7 }
 0x515   : > { %v1503_v1 = vrot.slane %v1495_v34, 4  ;;  %v1504_v42 = vrot.slane %v1496_v0, 4 }
 0x517   : > { %v1505_v2 = vsel %vm298_vm0, %v1503_v1, %v1504_v42 }
 0x518   : > { %2760 = vmatmul.msk.f32.vlgmr.msrb.gmra.mxu1 %vm361_vm6, %v1505_v2 }
 0x520   : > { %2761 = vmatmul.msk.f32.gmra.mxu1 %vm361_vm6, %v1508_v9 }
 0x555   : > { %v1288_v15 = vpop.f32.mrf.mxu1 }
 0x556   : > { %1313 = vmatpush.msra.mxu3 %v1288_v15 }
 0x557   : > { %2754 = vmatmul.msk.f32.vlgmr.msra.gmra.mxu3 %vm358_vm5, %v1121_v50 }
 0x55d   : > { %v1291_v16 = vpop.f32.mrf.mxu1 }
 0x55e   : > { %1336 = vmatpush.msra.mxu0 %v1291_v16 }
 0x55f   : > { %2755 = vmatmul.msk.f32.vlgmr.msra.gmra.mxu0 %vm358_vm5, %v1122_v49 }
 0x595   : > { %v1530_v27 = vpop.f32.mrf.mxu1 }
 0x596   : > { %v1544_v44 = vrot.slane %v1530_v27, 7  ;;  %v1568_v11 = vrot.slane %v1530_v27, 1  ;;  %v1584_v20 = vrot.slane %v1530_v27, 2 }
 0x59d   : > { %v3236_v59 = vpop.f32.mrf.mxu1 }
 0x59e   : > { %1562 = vrot.lane.b32.xlu0 %v3236_v59, %s2897_s15  ;;  %v1569_v31 = vrot.slane %v3236_v59, 1  ;;  %v1585_v3 = vrot.slane %v3236_v59, 2 }
 0x5a0   : > { %1578 = vrot.lane.b32.xlu1 %v1569_v31, %s2899_s17  ;;  %v3274_v31 = vld [vmem:[%s3148_s30] sm:$0xff] }
 0x5a1   : > { %1430 = vmatpush.msra.mxu2 %v3274_v31 }
 0x5a6   : > { %1594 = vrot.lane.b32.xlu0 %v1585_v3, %s2900_s20 }
 0x5a8   : > { %1552 = vrot.lane.b32.xlu1 %v1544_v44, %s2898_s16 }
 0x5ae   : > { %1560 = vrot.lane.b32.xlu0 %v1530_v27, %s2897_s15 }
 0x5b0   : > { %1576 = vrot.lane.b32.xlu1 %v1568_v11, %s2899_s17 }
 0x5b6   : > { %1592 = vrot.lane.b32.xlu0 %v1584_v20, %s2900_s20 }
 0x5d8   : > { %1997 = vxpose.xlu0.b32.start.end [1/1] (short) (narrow) %v3016_v41, 8  ;;  %v1538_v41 = vrot.slane %v1530_v27, 6 }
 0x5da   : > { %v1315_v12 = vpop.f32.mrf.mxu3 }
 0x5db   : > { %v1316_v60 = vadd.f32 %v1315_v12, %v3249_v61 }
 0x5dc   : > { %v1338_v54 = vpop.f32.mrf.mxu0 }
 0x5dd   : > { %v1341_v57 = vmax.f32 %v1316_v60, 0.0  ;;  %v1339_v14 = vadd.f32 %v1338_v54, %v3249_v61 }
 0x5df   : > { %1343 = vxpose.xlu2.b32.start.end [1/1] (short) (narrow) %v1341_v57, 8  ;;  %v1342_v22 = vmax.f32 %v1339_v14, 0.0 }
 0x5e5   : > { %1965 = vxpose.xlu1.b32.start.end [1/1] (short) (narrow) %v2995_v26, 8 }
 0x5e7   : > { %1375 = vxpose.xlu2.b32.start.end [1/1] (short) (narrow) %v1342_v22, 8 }
 0x610   : > { %v3255_v55 = vpop.permute.xlu0 %1562 }
 0x612   : > { %v3257_v13 = vpop.permute.xlu1 %1578 }
 0x618   : > { %v3259_v21 = vpop.permute.xlu0 %1594 }
 0x61a   : > { %v1553_v40 = vpop.permute.xlu1 %1552 }
 0x61b   : > { %v1558_v24 = vadd.f32 %v1553_v40, %v1538_v41  ;;  %v1545_v40 = vrot.slane %v3236_v59, 7 }
 0x620   : > { %v1561_v23 = vpop.permute.xlu0 %1560 }
 0x621   : > { %v1566_v25 = vadd.f32 %v1561_v23, %v1558_v24 }
 0x622   : > { %v1577_v6 = vpop.permute.xlu1 %1576 }
 0x623   : > { %v1582_v29 = vadd.f32 %v1577_v6, %v1566_v25 }
 0x628   : > { %v1593_v30 = vpop.permute.xlu0 %1592 }
 0x629   : > { %v3261_v32 = vadd.f32 %v1593_v30, %v1582_v29 }
 0x62b   : > { %v1720_v26 = vsel %vm587_vm9, %v3261_v32, 0.0  ;;  %v1660_v33 = vsel %vm526_vm8, %v3261_v32, 0.0 }
 0x62c   : > { %v1721_v35 = vrot.slane %v1720_v26, 4  ;;  %v1661_v37 = vrot.slane %v1660_v33, 4 }
 0x62e   : > { %v1722_v39 = vadd.f32 %v1721_v35, %v1720_v26  ;;  %v1662_v46 = vadd.f32 %v1661_v37, %v1660_v33 }
 0x630   : > { %v1723_v47 = vrot.slane %v1722_v39, 2  ;;  %v1663_v48 = vrot.slane %v1662_v46, 2 }
 0x632   : > { %v1724_v49 = vadd.f32 %v1723_v47, %v1722_v39  ;;  %v1664_v50 = vadd.f32 %v1663_v48, %v1662_v46 }
 0x634   : > { %v1725_v58 = vrot.slane %v1724_v49, 1  ;;  %v1665_v62 = vrot.slane %v1664_v50, 1 }
 0x636   : > { %v1726_v63 = vadd.f32 %v1725_v58, %v1724_v49  ;;  %v1666_v53 = vadd.f32 %v1665_v62, %v1664_v50 }
 0x638   : > { %v1734_v34 = vmul.f32 %v1726_v63, %v3058_v43  ;;  %v1674_v0 = vmul.f32 %v1666_v53, %v3058_v43  ;;  %v1600_v53 = vsel %vm358_vm5, %v3261_v32, 0.0 }
 0x63a   : > { %v1736_v51 = vsub.f32 %v3261_v32, %v1734_v34  ;;  %v1676_v1 = vsub.f32 %v3261_v32, %v1674_v0  ;;  %v1601_v34 = vrot.slane %v1600_v53, 4 }
 0x63c   : > { %v1738_v42 = vmul.f32 %v1736_v51, %v1736_v51  ;;  %v1678_v2 = vmul.f32 %v1676_v1, %v1676_v1  ;;  %v1602_v0 = vadd.f32 %v1601_v34, %v1600_v53 }
 0x63e   : > { %v1740_v18 = vsel %vm587_vm9, %v1738_v42, 0.0  ;;  %v1680_v4 = vsel %vm526_vm8, %v1678_v2, 0.0 }
 0x63f   : > { %v1741_v5 = vrot.slane %v1740_v18, 4  ;;  %v1681_v7 = vrot.slane %v1680_v4, 4 }
 0x641   : > { %v1742_v9 = vadd.f32 %v1741_v5, %v1740_v18  ;;  %v1682_v15 = vadd.f32 %v1681_v7, %v1680_v4 }
 0x643   : > { %v1743_v16 = vrot.slane %v1742_v9, 2  ;;  %v1683_v27 = vrot.slane %v1682_v15, 2 }
 0x645   : > { %v1744_v3 = vadd.f32 %v1743_v16, %v1742_v9  ;;  %v1684_v44 = vadd.f32 %v1683_v27, %v1682_v15 }
 0x647   : > { %v1745_v11 = vrot.slane %v1744_v3, 1  ;;  %v1685_v20 = vrot.slane %v1684_v44, 1 }
 0x649   : > { %v1746_v12 = vadd.f32 %v1745_v11, %v1744_v3  ;;  %v1686_v60 = vadd.f32 %v1685_v20, %v1684_v44 }
 0x64b   : > { %v1754_v57 = vmul.f32 %v1746_v12, %v3058_v43  ;;  %v1694_v54 = vmul.f32 %v1686_v60, %v3058_v43 }
 0x64d   : > { %v1756_v14 = vadd.f32 1e-05, %v1754_v57  ;;  %v1696_v22 = vadd.f32 1e-05, %v1694_v54  ;;  %v695_v54 = vmul.f32 0.35355338, %v3172_v45 }
 0x64f   : > { %2846 = vrsqrt.f32 %v1756_v14  ;;  %vm1764_vm1 = vweird.f32 %v1756_v14  ;;  %vm1704_vm3 = vweird.f32 %v1696_v22 }
 0x650   : > { %1554 = vrot.lane.b32.xlu2 %v1545_v40, %s2898_s16  ;;  %2848 = vrsqrt.f32 %v1696_v22 }
 0x655   : > { %v2847_v41 = vpop.eup %2846 }
 0x656   : > { %v2849_v23 = vpop.eup %2848  ;;  %v1759_v24 = vmul.f32 %v2847_v41, %v1756_v14  ;;  %vm1765_vm0 = vweird.f32 %v2847_v41 }
 0x657   : > { %v1699_v25 = vmul.f32 %v2849_v23, %v1696_v22  ;;  %vm1705_vm6 = vweird.f32 %v2849_v23  ;;  %vm1766_vm2 = vmor %vm1764_vm1, %vm1765_vm0 }
 0x658   : > { %v1760_v6 = vmul.f32 %v2847_v41, %v1759_v24  ;;  %vm1706_vm10 = vmor %vm1704_vm3, %vm1705_vm6 }
 0x659   : > { %v1700_v29 = vmul.f32 %v2849_v23, %v1699_v25 }
 0x65a   : > { %v1761_v30 = vmul.f32 0.5, %v1760_v6  ;;  %v697_v6 = vsel %vm358_vm5, %v695_v54, -inf }
 0x65b   : > { %v1701_v26 = vmul.f32 0.5, %v1700_v29 }
 0x65c   : > { %v1762_v33 = vsub.f32 1.5, %v1761_v30 }
 0x65d   : > { %v1702_v35 = vsub.f32 1.5, %v1701_v26 }
 0x65e   : > { %v1763_v37 = vmul.f32 %v2847_v41, %v1762_v33 }
 0x65f   : > { %v1703_v39 = vmul.f32 %v2849_v23, %v1702_v35 }
 0x660   : > { %v1767_v46 = vsel %vm1766_vm2, %v2847_v41, %v1763_v37  ;;  %v694_v41 = vmul.f32 0.35355338, %v3166_v38 }
 0x661   : > { %v1778_v47 = vmul.f32 %v1767_v46, %v1736_v51  ;;  %v1707_v48 = vsel %vm1706_vm10, %v2849_v23, %v1703_v39  ;;  %v1603_v51 = vrot.slane %v1602_v0, 2 }
 0x662   : > { %v1718_v49 = vmul.f32 %v1707_v48, %v1676_v1  ;;  %v696_v35 = vsel %vm358_vm5, %v694_v41, -inf }
 0x663   : > { %1860 = vrot.lane.b32.xlu0 %v1778_v47, %s2907_s26  ;;  %v1604_v1 = vadd.f32 %v1603_v51, %v1602_v0  ;;  %v698_v38 = vmax.f32 %v696_v35, %v697_v6 }
 0x664   : > { %1857 = vrot.lane.b32.xlu1 %v1718_v49, %s2906_s25 }
 0x665   : > { %v1605_v42 = vrot.slane %v1604_v1, 1  ;;  %v699_v34 = vsub.f32 %v694_v41, %v698_v38  ;;  %v700_v0 = vsub.f32 %v695_v54, %v698_v38 }
 0x667   : > { %v1606_v4 = vadd.f32 %v1605_v42, %v1604_v1 }
 0x669   : > { %v1614_v7 = vmul.f32 %v1606_v4, %v3058_v43 }
 0x678   : > { %v1359_v50 = vpop.trf.xlu2 }
 0x679   : > { %v3284_v58 = vadd.f32 %v1359_v50, %v3203_v56  ;;  %v1539_v56 = vrot.slane %v3236_v59, 6  ;;  %v3304_v59 = vsub.f32 %v3261_v32, %v1614_v7 }
 0x67b   : > { %2756 = vmatmul.msk.f32.vlgmr.msra.gmra.mxu2 %vm358_vm5, %v3284_v58 }
 0x680   : > { %v1391_v62 = vpop.trf.xlu2 }
 0x681   : > { %v3289_v63 = vadd.f32 %v1391_v62, %v3195_v17 }
 0x683   : > { %2757 = vmatmul.msk.f32.gmra.mxu2 %vm358_vm5, %v3289_v63 }
 0x6aa   : > { %v1555_v2 = vpop.permute.xlu2 %1554 }
 0x6ab   : > { %v1559_v18 = vadd.f32 %v1555_v2, %v1539_v56 }
 0x6ad   : > { %v1567_v5 = vadd.f32 %v3255_v55, %v1559_v18 }
 0x6af   : > { %v1583_v17 = vadd.f32 %v3257_v13, %v1567_v5  ;;  %v701_v5 = vmul.f32 1.442695, %v699_v34 }
 0x6b1   : > { %v1599_v9 = vadd.f32 %v3259_v21, %v1583_v17  ;;  %v1618_v21 = vmul.f32 %v3304_v59, %v3304_v59  ;;  %2850 = vpow2.f32 %v701_v5 }
 0x6b3   : > { %v1727_v15 = vsel %vm587_vm9, %v1599_v9, 0.0  ;;  %v1667_v16 = vsel %vm526_vm8, %v1599_v9, 0.0  ;;  %v1607_v27 = vsel %vm358_vm5, %v1599_v9, 0.0  ;;  %v1620_v24 = vsel %vm358_vm5, %v1618_v21, 0.0 }
 0x6b4   : > { %v1728_v3 = vrot.slane %v1727_v15, 4  ;;  %v1668_v44 = vrot.slane %v1667_v16, 4  ;;  %v1608_v11 = vrot.slane %v1607_v27, 4  ;;  %v1621_v33 = vrot.slane %v1620_v24, 4 }
 0x6b6   : > { %v1729_v20 = vadd.f32 %v1728_v3, %v1727_v15  ;;  %v1669_v55 = vadd.f32 %v1668_v44, %v1667_v16  ;;  %v1609_v12 = vadd.f32 %v1608_v11, %v1607_v27  ;;  %v1622_v49 = vadd.f32 %v1621_v33, %v1620_v24  ;;  %v3331_v15 = vpop.trf.xlu0 }
 0x6b8   : > { %v1730_v13 = vrot.slane %v1729_v20, 2  ;;  %v1670_v60 = vrot.slane %v1669_v55, 2  ;;  %v1610_v57 = vrot.slane %v1609_v12, 2  ;;  %v1623_v18 = vrot.slane %v1622_v49, 2 }
 0x6ba   : > { %v1731_v14 = vadd.f32 %v1730_v13, %v1729_v20  ;;  %v1671_v22 = vadd.f32 %v1670_v60, %v1669_v55  ;;  %v1611_v40 = vadd.f32 %v1610_v57, %v1609_v12  ;;  %v1624_v3 = vadd.f32 %v1623_v18, %v1622_v49  ;;  %v3333_v55 = vpop.trf.xlu1 }
 0x6bc   : > { %v1732_v23 = vrot.slane %v1731_v14, 1  ;;  %v1672_v32 = vrot.slane %v1671_v22, 1  ;;  %v1612_v25 = vrot.slane %v1611_v40, 1  ;;  %v1625_v60 = vrot.slane %v1624_v3, 1 }
 0x6be   : > { %v1733_v29 = vadd.f32 %v1732_v23, %v1731_v14  ;;  %v1673_v30 = vadd.f32 %v1672_v32, %v1671_v22  ;;  %v1613_v26 = vadd.f32 %v1612_v25, %v1611_v40  ;;  %v3335_v14 = vpop.eup %2850  ;;  %v1626_v41 = vadd.f32 %v1625_v60, %v1624_v3 }
 0x6c0   : > { %v1735_v45 = vmul.f32 %v1733_v29, %v3058_v43  ;;  %v1675_v37 = vmul.f32 %v1673_v30, %v3058_v43  ;;  %v1615_v39 = vmul.f32 %v1613_v26, %v3058_v43  ;;  %v705_v29 = vsel %vm358_vm5, %v3335_v14, 0.0 }
 0x6c1   : > { %v1634_v26 = vmul.f32 %v1626_v41, %v3058_v43 }
 0x6c2   : > { %v3316_v46 = vsub.f32 %v1599_v9, %v1735_v45  ;;  %v3318_v47 = vsub.f32 %v1599_v9, %v1675_v37  ;;  %v3320_v48 = vsub.f32 %v1599_v9, %v1615_v39  ;;  %v703_v9 = vmul.f32 1.442695, %v700_v0 }
 0x6c3   : > { %v1636_v37 = vadd.f32 1e-05, %v1634_v26 }
 0x6c4   : > { %v1739_v50 = vmul.f32 %v3316_v46, %v3316_v46  ;;  %v1679_v62 = vmul.f32 %v3318_v47, %v3318_v47  ;;  %v1619_v53 = vmul.f32 %v3320_v48, %v3320_v48  ;;  %2852 = vpow2.f32 %v703_v9 }
 0x6c5   : > { %vm1644_vm3 = vweird.f32 %v1636_v37 }
 0x6c6   : > { %v1747_v51 = vsel %vm587_vm9, %v1739_v50, 0.0  ;;  %v1687_v1 = vsel %vm526_vm8, %v1679_v62, 0.0  ;;  %v1627_v42 = vsel %vm358_vm5, %v1619_v53, 0.0 }
 0x6c7   : > { %v1748_v56 = vrot.slane %v1747_v51, 4  ;;  %v1688_v2 = vrot.slane %v1687_v1, 4  ;;  %v1628_v4 = vrot.slane %v1627_v42, 4 }
 0x6c9   : > { %v1749_v17 = vadd.f32 %v1748_v56, %v1747_v51  ;;  %v1689_v7 = vadd.f32 %v1688_v2, %v1687_v1  ;;  %v1629_v44 = vadd.f32 %v1628_v4, %v1627_v42 }
 0x6ca   : > { %v3339_v32 = vpop.eup %2852 }
 0x6cb   : > { %v1750_v16 = vrot.slane %v1749_v17, 2  ;;  %v1690_v27 = vrot.slane %v1689_v7, 2  ;;  %v1630_v21 = vrot.slane %v1629_v44, 2  ;;  %v706_v30 = vsel %vm358_vm5, %v3339_v32, 0.0 }
 0x6cc   : > { %v707_v45 = vadd.f32 %v706_v30, %v705_v29 }
 0x6cd   : > { %v1751_v11 = vadd.f32 %v1750_v16, %v1749_v17  ;;  %v1691_v20 = vadd.f32 %v1690_v27, %v1689_v7  ;;  %v1631_v23 = vadd.f32 %v1630_v21, %v1629_v44 }
 0x6ce   : > { %vm713_vm0 = vweird.f32 %v707_v45 }
 0x6cf   : > { %v1752_v12 = vrot.slane %v1751_v11, 1  ;;  %v1692_v13 = vrot.slane %v1691_v20, 1  ;;  %v1632_v33 = vrot.slane %v1631_v23, 1 }
 0x6d1   : > { %v1753_v57 = vadd.f32 %v1752_v12, %v1751_v11  ;;  %v1693_v54 = vadd.f32 %v1692_v13, %v1691_v20  ;;  %v1633_v39 = vadd.f32 %v1632_v33, %v1631_v23 }
 0x6d3   : > { %v1755_v22 = vmul.f32 %v1753_v57, %v3058_v43  ;;  %v1695_v40 = vmul.f32 %v1693_v54, %v3058_v43  ;;  %v1635_v53 = vmul.f32 %v1633_v39, %v3058_v43 }
 0x6d5   : > { %v1861_v24 = vpop.permute.xlu0 %1860  ;;  %v1757_v25 = vadd.f32 1e-05, %v1755_v22  ;;  %v1697_v6 = vadd.f32 1e-05, %v1695_v40  ;;  %v1637_v42 = vadd.f32 1e-05, %v1635_v53 }
 0x6d6   : > { %2766 = vmatpush.xpose.msk.msrb.mxu2 %vm358_vm5, %v1861_v24  ;;  %v1858_v35 = vpop.permute.xlu1 %1857  ;;  %v719_v22 = vand.u32 2147483648, %v707_v45  ;;  %v717_v40 = vand.u32 2147483647, %v707_v45 }
 0x6d7   : > { %2854 = vrsqrt.f32 %v1757_v25  ;;  %vm1774_vm9 = vweird.f32 %v1757_v25  ;;  %vm1714_vm13 = vweird.f32 %v1697_v6 }
 0x6d8   : > { %2856 = vrsqrt.f32 %v1697_v6  ;;  %vm718_vm2 = vcmp.eq.f32.partialorder %v717_v40, 8.507059e+37 }
 0x6d9   : > { %2767 = vmatmul.msk.f32.vlgmr.msrb.gmra.mxu2 %vm358_vm5, %v1858_v35  ;;  %2858 = vrcp.f32 %v707_v45 }
 0x6da   : > { %2860 = vrsqrt.f32 %v1636_v37 }
 0x6db   : > { %2862 = vrsqrt.f32 %v1637_v42 }
 0x6dd   : > { %v2855_v38 = vpop.eup %2854 }
 0x6de   : > { %v2857_v49 = vpop.eup %2856  ;;  %v1769_v50 = vmul.f32 %v2855_v38, %v1757_v25  ;;  %vm1775_vm8 = vweird.f32 %v2855_v38  ;;  %v720_v25 = vor.u32 1.1754944e-38, %v719_v22 }
 0x6df   : > { %v1709_v62 = vmul.f32 %v2857_v49, %v1697_v6  ;;  %v2859_v56 = vpop.eup %2858  ;;  %vm1776_vm11 = vmor %vm1774_vm9, %vm1775_vm8  ;;  %vm1715_vm12 = vweird.f32 %v2857_v49  ;;  %vm1654_vm9 = vweird.f32 %v1637_v42 }
 0x6e0   : > { %v1770_v34 = vmul.f32 %v2855_v38, %v1769_v50  ;;  %v2861_v18 = vpop.eup %2860  ;;  %v709_v17 = vmul.f32 %v2859_v56, %v707_v45  ;;  %vm1716_vm14 = vmor %vm1714_vm13, %vm1715_vm12  ;;  %vm714_vm15 = vweird.f32 %v2859_v56 }
 0x6e1   : > { %v1710_v0 = vmul.f32 %v2857_v49, %v1709_v62  ;;  %v1639_v9 = vmul.f32 %v2861_v18, %v1636_v37  ;;  %v2863_v11 = vpop.eup %2862  ;;  %vm715_vm6 = vmor %vm713_vm0, %vm714_vm15  ;;  %vm1645_vm1 = vweird.f32 %v2861_v18 }
 0x6e2   : > { %v1771_v51 = vmul.f32 0.5, %v1770_v34  ;;  %v710_v3 = vsub.f32 1.0, %v709_v17  ;;  %v1649_v60 = vmul.f32 %v2863_v11, %v1637_v42  ;;  %vm1646_vm10 = vmor %vm1644_vm3, %vm1645_vm1  ;;  %vm1655_vm8 = vweird.f32 %v2863_v11 }
 0x6e3   : > { %v1711_v1 = vmul.f32 0.5, %v1710_v0  ;;  %v1640_v44 = vmul.f32 %v2861_v18, %v1639_v9 }
 0x6e4   : > { %v1772_v2 = vsub.f32 1.5, %v1771_v51  ;;  %v711_v12 = vmul.f32 %v2859_v56, %v710_v3  ;;  %v1650_v54 = vmul.f32 %v2863_v11, %v1649_v60 }
 0x6e5   : > { %v1712_v5 = vsub.f32 1.5, %v1711_v1  ;;  %v1641_v13 = vmul.f32 0.5, %v1640_v44 }
 0x6e6   : > { %v1773_v4 = vmul.f32 %v2855_v38, %v1772_v2  ;;  %v712_v57 = vadd.f32 %v2859_v56, %v711_v12  ;;  %v1651_v24 = vmul.f32 0.5, %v1650_v54 }
 0x6e7   : > { %v1713_v27 = vmul.f32 %v2857_v49, %v1712_v5 }
 0x6e8   : > { %v1777_v7 = vsel %vm1776_vm11, %v2855_v38, %v1773_v4  ;;  %v716_v41 = vsel %vm715_vm6, %v2859_v56, %v712_v57  ;;  %v1652_v29 = vsub.f32 1.5, %v1651_v24  ;;  %vm1656_vm11 = vmor %vm1654_vm9, %vm1655_vm8 }
 0x6e9   : > { %v1779_v16 = vmul.f32 %v1777_v7, %v3316_v46  ;;  %v1717_v20 = vsel %vm1716_vm14, %v2857_v49, %v1713_v27  ;;  %v1642_v46 = vsub.f32 1.5, %v1641_v13  ;;  %v721_v6 = vsel %vm718_vm2, %v720_v25, %v716_v41 }
 0x6ea   : > { %v1719_v21 = vmul.f32 %v1717_v20, %v3318_v47  ;;  %v722_v26 = vmul.f32 %v3335_v14, %v721_v6  ;;  %v1653_v35 = vmul.f32 %v2863_v11, %v1652_v29  ;;  %v723_v37 = vmul.f32 %v3339_v32, %v721_v6 }
 0x6eb   : > { %1890 = vrot.lane.b32.xlu2 %v1779_v16, %s2907_s26  ;;  %v1643_v23 = vmul.f32 %v2861_v18, %v1642_v46 }
 0x6ec   : > { %v1657_v45 = vsel %vm1656_vm11, %v2863_v11, %v1653_v35 }
 0x6ed   : > { %v1647_v47 = vsel %vm1646_vm10, %v2861_v18, %v1643_v23  ;;  %v1659_v38 = vmul.f32 %v1657_v45, %v3320_v48 }
 0x6ee   : > { %v1658_v33 = vmul.f32 %v1647_v47, %v3304_v59  ;;  %v2887_v59 = vld [vmem:[%s2973_s13 + $0x10] sm:$0x7f] }
 0x6f3   : > { %1887 = vrot.lane.b32.xlu2 %v1719_v21, %s2906_s25 }
 0x6fe   : > { %v1432_v30 = vpop.f32.mrf.mxu2 }
 0x6ff   : > { %1457 = vmatpush.msrb.mxu3 %v1432_v30 }
 0x700   : > { %2758 = vmatmul.msk.f32.vlgmr.msrb.gmra.mxu3 %vm358_vm5, %v722_v26 }
 0x701   : > { %2762 = vmatpush.xpose.msk.msra.mxu3 %vm358_vm5, %v1658_v33 }
 0x706   : > { %v1435_v39 = vpop.f32.mrf.mxu2 }
 0x707   : > { %1480 = vmatpush.msrb.mxu0 %v1435_v39 }
 0x708   : > { %2759 = vmatmul.msk.f32.vlgmr.msrb.gmra.mxu0 %vm358_vm5, %v723_v37  ;;  %2763 = vmatmul.msk.f32.vlgmr.msra.gmra.mxu3 %vm358_vm5, %v1658_v33 }
 0x709   : > { %2764 = vmatpush.xpose.msk.msra.mxu0 %vm358_vm5, %v1659_v38 }
 0x70d   : > { %2770 = vmatpush.msk.msrb.mxu0 %vm429_vm4, %v2887_v59 }
 0x710   : > { %2765 = vmatmul.msk.f32.vlgmr.msra.gmra.mxu0 %vm358_vm5, %v1659_v38 }
 0x711   : > { %2422 = vmatpush.msra.mxu0 %v3212_v52  ;;  %v3379_v52 = vperm.slane %v3188_v8, 0 }
 0x718   : > { %2771 = vmatmul.msk.f32.vlgmr.msrb.gmra.mxu0 %vm890_vm7, %v3333_v55 }
 0x720   : > { %2772 = vmatmul.msk.f32.gmra.mxu0 %vm890_vm7, %v3331_v15 }
 0x745   : > { %v1891_v48 = vpop.permute.xlu2 %1890 }
 0x746   : > { %2768 = vmatpush.xpose.msk.msrb.mxu3 %vm358_vm5, %v1891_v48 }
 0x74a   : > { %2277 = vmatpush.msra.mxu3 %v3151_v28 }
 0x74d   : > { %v1888_v14 = vpop.permute.xlu2 %1887 }
 0x74e   : > { %2769 = vmatmul.msk.f32.vlgmr.msrb.gmra.mxu3 %vm358_vm5, %v1888_v14 }
 0x74f   : > { %2565 = vmatpush.msrb.mxu3 %v3274_v31 }
 0x756   : > { %2777 = vmatmul.msk.f32.vlgmr.msra.gmra.mxu3 %vm358_vm5, %v2988_v19 }
 0x75c   : > { %v1883_v45 = vpop.f32.mrf.mxu2 }
 0x75d   : > { %v1916_v59 = vmul.f32 0.35355338, %v1883_v45 }
 0x75e   : > { %2778 = vmatmul.msk.f32.gmra.mxu3 %vm358_vm5, %v3009_v36 }
 0x783   : > { %v1459_v15 = vpop.f32.mrf.mxu3 }
 0x784   : > { %v1460_v55 = vadd.f32 %v1459_v15, %v3379_v52 }
 0x785   : > { %v1482_v32 = vpop.f32.mrf.mxu0 }
 0x786   : > { %v1485_v49 = vmax.f32 %v1460_v55, 0.0  ;;  %v1483_v28 = vadd.f32 %v1482_v32, %v3379_v52  ;;  %v1918_v32 = vsel %vm358_vm5, %v1916_v59, -inf }
 0x788   : > { %v1487_v31 = vadd.f32 %v1485_v49, %v3284_v58  ;;  %v1486_v50 = vmax.f32 %v1483_v28, 0.0 }
 0x78a   : > { %2623 = vst.msk [vmem:[%s3388_s8] sm:$0xff] %vm358_vm5, %v1487_v31  ;;  %v1488_v8 = vadd.f32 %v1486_v50, %v3289_v63 }
 0x78b   : > { %v1800_v62 = vpop.f32.mrf.mxu3 }
 0x78c   : > { %2625 = vst.msk [vmem:[%s3388_s8 + $0x10] sm:$0xff] %vm358_vm5, %v1488_v8  ;;  %v1826_v53 = vmul.f32 0.35355338, %v1800_v62 }
 0x78d   : > { %v1823_v34 = vpop.f32.mrf.mxu0 }
 0x78e   : > { %v1827_v0 = vmul.f32 0.35355338, %v1823_v34  ;;  %v1828_v51 = vsel %vm358_vm5, %v1826_v53, -inf }
 0x790   : > { %v1829_v1 = vsel %vm358_vm5, %v1827_v0, -inf }
 0x791   : > { %v1830_v42 = vmax.f32 %v1828_v51, %v1829_v1 }
 0x793   : > { %v1831_v56 = vsub.f32 %v1826_v53, %v1830_v42  ;;  %v1832_v2 = vsub.f32 %v1827_v0, %v1830_v42 }
 0x795   : > { %v1833_v18 = vmul.f32 1.442695, %v1831_v56  ;;  %v1835_v58 = vmul.f32 1.442695, %v1832_v2  ;;  %v2052_v4 = vpop.f32.mrf.mxu0 }
 0x796   : > { %2082 = vrot.lane.b32.xlu2 %v2052_v4, %s2901_s21  ;;  %v2066_v63 = vrot.slane %v2052_v4, 7  ;;  %v2090_v27 = vrot.slane %v2052_v4, 1  ;;  %v2106_v12 = vrot.slane %v2052_v4, 2  ;;  %v2060_v47 = vrot.slane %v2052_v4, 6 }
 0x797   : > { %2864 = vpow2.f32 %v1833_v18 }
 0x798   : > { %2866 = vpow2.f32 %v1835_v58 }
 0x79d   : > { %v3399_v5 = vpop.eup %2864  ;;  %v2055_v40 = vpop.f32.mrf.mxu0 }
 0x79e   : > { %v2867_v17 = vpop.eup %2866  ;;  %v1837_v7 = vsel %vm358_vm5, %v3399_v5, 0.0  ;;  %2074 = vrot.lane.b32.xlu2 %v2066_v63, %s2902_s22  ;;  %v2067_v41 = vrot.slane %v2055_v40, 7  ;;  %v2091_v23 = vrot.slane %v2055_v40, 1  ;;  %v2107_v24 = vrot.slane %v2055_v40, 2 }
 0x79f   : > { %v1838_v9 = vsel %vm358_vm5, %v2867_v17, 0.0  ;;  %v2061_v4 = vrot.slane %v2055_v40, 6 }
 0x7a0   : > { %v1839_v16 = vadd.f32 %v1838_v9, %v1837_v7 }
 0x7a2   : > { %2868 = vrcp.f32 %v1839_v16  ;;  %v1851_v20 = vand.u32 2147483648, %v1839_v16  ;;  %v1849_v60 = vand.u32 2147483647, %v1839_v16  ;;  %vm1845_vm12 = vweird.f32 %v1839_v16 }
 0x7a4   : > { %v1852_v57 = vor.u32 1.1754944e-38, %v1851_v20  ;;  %vm1850_vm14 = vcmp.eq.f32.partialorder %v1849_v60, 8.507059e+37 }
 0x7a6   : > { %2098 = vrot.lane.b32.xlu2 %v2090_v27, %s2903_s23 }
 0x7a8   : > { %v2869_v3 = vpop.eup %2868 }
 0x7a9   : > { %v1841_v44 = vmul.f32 %v2869_v3, %v1839_v16  ;;  %vm1846_vm4 = vweird.f32 %v2869_v3 }
 0x7aa   : > { %vm1847_vm13 = vmor %vm1845_vm12, %vm1846_vm4 }
 0x7ab   : > { %v1842_v11 = vsub.f32 1.0, %v1841_v44 }
 0x7ad   : > { %v1843_v13 = vmul.f32 %v2869_v3, %v1842_v11 }
 0x7ae   : > { %2114 = vrot.lane.b32.xlu2 %v2106_v12, %s2904_s24 }
 0x7af   : > { %v1844_v21 = vadd.f32 %v2869_v3, %v1843_v13 }
 0x7b1   : > { %v1848_v46 = vsel %vm1847_vm13, %v2869_v3, %v1844_v21 }
 0x7b2   : > { %v3407_v54 = vsel %vm1850_vm14, %v1852_v57, %v1848_v46 }
 0x7b3   : > { %v3410_v22 = vmul.f32 %v2867_v17, %v3407_v54 }
 0x7b6   : > { %2084 = vrot.lane.b32.xlu2 %v2055_v40, %s2901_s21 }
 0x7be   : > { %2076 = vrot.lane.b32.xlu2 %v2067_v41, %s2902_s22 }
 0x7c6   : > { %2100 = vrot.lane.b32.xlu2 %v2091_v23, %s2903_s23 }
 0x7ce   : > { %2116 = vrot.lane.b32.xlu2 %v2107_v24, %s2904_s24 }
 0x7d1   : > { %v1913_v33 = vpop.f32.mrf.mxu3 }
 0x7d2   : > { %v1917_v39 = vmul.f32 0.35355338, %v1913_v33 }
 0x7d4   : > { %v1919_v15 = vsel %vm358_vm5, %v1917_v39, -inf }
 0x7d5   : > { %v1920_v49 = vmax.f32 %v1918_v32, %v1919_v15 }
 0x7d7   : > { %v1921_v8 = vsub.f32 %v1916_v59, %v1920_v49  ;;  %v1922_v53 = vsub.f32 %v1917_v39, %v1920_v49 }
 0x7d9   : > { %v1923_v0 = vmul.f32 1.442695, %v1921_v8  ;;  %v1925_v42 = vmul.f32 1.442695, %v1922_v53 }
 0x7db   : > { %2870 = vpow2.f32 %v1923_v0 }
 0x7dc   : > { %2872 = vpow2.f32 %v1925_v42 }
 0x7e1   : > { %v3421_v9 = vpop.eup %2870 }
 0x7e2   : > { %v3423_v16 = vpop.eup %2872  ;;  %v1927_v11 = vsel %vm358_vm5, %v3421_v9, 0.0 }
 0x7e3   : > { %v1928_v20 = vsel %vm358_vm5, %v3423_v16, 0.0 }
 0x7e4   : > { %v1929_v21 = vadd.f32 %v1928_v20, %v1927_v11 }
 0x7e6   : > { %2874 = vrcp.f32 %v1929_v21  ;;  %v1941_v53 = vand.u32 2147483648, %v1929_v21  ;;  %vm1935_vm2 = vweird.f32 %v1929_v21 }
 0x7f0   : > { %v2083_v25 = vpop.permute.xlu2 %2082 }
 0x7f8   : > { %v2075_v6 = vpop.permute.xlu2 %2074 }
 0x7f9   : > { %v2080_v30 = vadd.f32 %v2075_v6, %v2060_v47 }
 0x7fb   : > { %v2088_v26 = vadd.f32 %v2083_v25, %v2080_v30 }
 0x800   : > { %v2099_v29 = vpop.permute.xlu2 %2098 }
 0x801   : > { %v2104_v35 = vadd.f32 %v2099_v29, %v2088_v26  ;;  %v2875_v29 = vpop.eup %2874 }
 0x802   : > { %v1931_v33 = vmul.f32 %v2875_v29, %v1929_v21  ;;  %vm1936_vm1 = vweird.f32 %v2875_v29 }
 0x803   : > { %vm1937_vm3 = vmor %vm1935_vm2, %vm1936_vm1 }
 0x808   : > { %v2115_v37 = vpop.permute.xlu2 %2114 }
 0x809   : > { %v2120_v38 = vadd.f32 %v2115_v37, %v2104_v35 }
 0x80b   : > { %v2122_v48 = vsel %vm890_vm7, %v2120_v38, 0.0 }
 0x80c   : > { %v2123_v14 = vrot.slane %v2122_v48, 4 }
 0x80e   : > { %v2124_v55 = vadd.f32 %v2123_v14, %v2122_v48 }
 0x810   : > { %v2125_v28 = vrot.slane %v2124_v55, 2  ;;  %v2085_v31 = vpop.permute.xlu2 %2084 }
 0x812   : > { %v2126_v50 = vadd.f32 %v2125_v28, %v2124_v55 }
 0x814   : > { %v2127_v62 = vrot.slane %v2126_v50, 1 }
 0x816   : > { %v2128_v34 = vadd.f32 %v2127_v62, %v2126_v50 }
 0x818   : > { %v2136_v51 = vmul.f32 %v2128_v34, %v3058_v43  ;;  %v2077_v1 = vpop.permute.xlu2 %2076  ;;  %v2279_v34 = vpop.f32.mrf.mxu3 }
 0x819   : > { %v2081_v7 = vadd.f32 %v2077_v1, %v2061_v4 }
 0x81a   : > { %v2138_v56 = vsub.f32 %v2120_v38, %v2136_v51  ;;  %v1932_v38 = vsub.f32 1.0, %v1931_v33  ;;  %v1939_v51 = vand.u32 2147483647, %v1929_v21 }
 0x81b   : > { %v2089_v44 = vadd.f32 %v2085_v31, %v2081_v7 }
 0x81c   : > { %v2140_v2 = vmul.f32 %v2138_v56, %v2138_v56  ;;  %v1933_v55 = vmul.f32 %v2875_v29, %v1932_v38  ;;  %vm1940_vm10 = vcmp.eq.f32.partialorder %v1939_v51, 8.507059e+37 }
 0x81e   : > { %v2142_v18 = vsel %vm890_vm7, %v2140_v2, 0.0  ;;  %v1934_v62 = vadd.f32 %v2875_v29, %v1933_v55  ;;  %v1942_v2 = vor.u32 1.1754944e-38, %v1941_v53 }
 0x81f   : > { %v2143_v58 = vrot.slane %v2142_v18, 4 }
 0x820   : > { %v2101_v63 = vpop.permute.xlu2 %2100  ;;  %v1938_v42 = vsel %vm1937_vm3, %v2875_v29, %v1934_v62 }
 0x821   : > { %v2144_v17 = vadd.f32 %v2143_v58, %v2142_v18  ;;  %v2105_v13 = vadd.f32 %v2101_v63, %v2089_v44 }
 0x823   : > { %v2145_v27 = vrot.slane %v2144_v17, 2 }
 0x825   : > { %v2146_v3 = vadd.f32 %v2145_v27, %v2144_v17 }
 0x827   : > { %v2147_v12 = vrot.slane %v2146_v3, 1 }
 0x828   : > { %v2117_v60 = vpop.permute.xlu2 %2116 }
 0x829   : > { %v2148_v57 = vadd.f32 %v2147_v12, %v2146_v3  ;;  %v2121_v46 = vadd.f32 %v2117_v60, %v2105_v13  ;;  %v2282_v60 = vpop.f32.mrf.mxu3 }
 0x82b   : > { %v2156_v40 = vmul.f32 %v2148_v57, %v3058_v43  ;;  %v2129_v41 = vsel %vm890_vm7, %v2121_v46, 0.0 }
 0x82c   : > { %v2130_v23 = vrot.slane %v2129_v41, 4 }
 0x82d   : > { %v2158_v24 = vadd.f32 1e-05, %v2156_v40 }
 0x82e   : > { %v2131_v25 = vadd.f32 %v2130_v23, %v2129_v41 }
 0x82f   : > { %2876 = vrsqrt.f32 %v2158_v24  ;;  %vm2166_vm0 = vweird.f32 %v2158_v24 }
 0x830   : > { %v2132_v6 = vrot.slane %v2131_v25, 2 }
 0x832   : > { %v2133_v47 = vadd.f32 %v2132_v6, %v2131_v25 }
 0x834   : > { %v2134_v30 = vrot.slane %v2133_v47, 1 }
 0x835   : > { %v2877_v26 = vpop.eup %2876 }
 0x836   : > { %v2161_v35 = vmul.f32 %v2877_v26, %v2158_v24  ;;  %v2135_v45 = vadd.f32 %v2134_v30, %v2133_v47  ;;  %vm2167_vm15 = vweird.f32 %v2877_v26 }
 0x837   : > { %vm2168_vm6 = vmor %vm2166_vm0, %vm2167_vm15 }
 0x838   : > { %v2162_v37 = vmul.f32 %v2877_v26, %v2161_v35  ;;  %v2137_v39 = vmul.f32 %v2135_v45, %v3058_v43 }
 0x83a   : > { %v2163_v59 = vmul.f32 0.5, %v2162_v37  ;;  %v2139_v48 = vsub.f32 %v2121_v46, %v2137_v39 }
 0x83c   : > { %v2164_v14 = vsub.f32 1.5, %v2163_v59  ;;  %v2141_v15 = vmul.f32 %v2139_v48, %v2139_v48 }
 0x83e   : > { %v2165_v32 = vmul.f32 %v2877_v26, %v2164_v14  ;;  %v2149_v49 = vsel %vm890_vm7, %v2141_v15, 0.0 }
 0x83f   : > { %v2150_v28 = vrot.slane %v2149_v49, 4 }
 0x840   : > { %v2169_v31 = vsel %vm2168_vm6, %v2877_v26, %v2165_v32 }
 0x841   : > { %v2180_v50 = vmul.f32 %v2169_v31, %v2138_v56  ;;  %v2151_v8 = vadd.f32 %v2150_v28, %v2149_v49  ;;  %v1943_v56 = vsel %vm1940_vm10, %v1942_v2, %v1938_v42 }
 0x842   : > { %v1944_v63 = vmul.f32 %v3421_v9, %v1943_v56 }
 0x843   : > { %v2152_v0 = vrot.slane %v2151_v8, 2  ;;  %2773 = vmatpush.xpose.msk.msra.mxu1 %vm890_vm7, %v2180_v50 }
 0x845   : > { %v2153_v1 = vadd.f32 %v2152_v0, %v2151_v8 }
 0x846   : > { %2774 = vmatmul.msk.f32.vlgmr.msra.gmra.mxu1 %vm890_vm7, %v2180_v50 }
 0x847   : > { %2303 = vmatpush.msrb.mxu1 %v2279_v34  ;;  %v2154_v18 = vrot.slane %v2153_v1, 1 }
 0x849   : > { %v2155_v58 = vadd.f32 %v2154_v18, %v2153_v1 }
 0x84b   : > { %v2157_v4 = vmul.f32 %v2155_v58, %v3058_v43  ;;  %v1945_v43 = vmul.f32 %v3423_v16, %v1943_v56 }
 0x84d   : > { %v2159_v17 = vadd.f32 1e-05, %v2157_v4 }
 0x84e   : > { %2779 = vmatmul.msk.f32.vlgmr.msrb.gmra.mxu1 %vm358_vm5, %v1944_v63 }
 0x84f   : > { %2878 = vrsqrt.f32 %v2159_v17  ;;  %vm2176_vm9 = vweird.f32 %v2159_v17 }
 0x855   : > { %v2879_v7 = vpop.eup %2878 }
 0x856   : > { %v2171_v27 = vmul.f32 %v2879_v7, %v2159_v17  ;;  %vm2177_vm8 = vweird.f32 %v2879_v7 }
 0x857   : > { %vm2178_vm11 = vmor %vm2176_vm9, %vm2177_vm8 }
 0x858   : > { %v2172_v3 = vmul.f32 %v2879_v7, %v2171_v27 }
 0x85a   : > { %v2173_v44 = vmul.f32 0.5, %v2172_v3  ;;  %v1854_v3 = vmul.f32 %v3399_v5, %v3407_v54 }
 0x85c   : > { %v2174_v11 = vsub.f32 1.5, %v2173_v44 }
 0x85e   : > { %v2175_v20 = vmul.f32 %v2879_v7, %v2174_v11 }
 0x860   : > { %v2179_v12 = vsel %vm2178_vm11, %v2879_v7, %v2175_v20 }
 0x861   : > { %v2181_v13 = vmul.f32 %v2179_v12, %v2139_v48 }
 0x863   : > { %2775 = vmatpush.xpose.msk.msra.mxu2 %vm890_vm7, %v2181_v13 }
 0x866   : > { %2776 = vmatmul.msk.f32.vlgmr.msra.gmra.mxu2 %vm890_vm7, %v2181_v13 }
 0x867   : > { %2326 = vmatpush.msrb.mxu2 %v2282_v60 }
 0x86e   : > { %2780 = vmatmul.msk.f32.vlgmr.msrb.gmra.mxu2 %vm358_vm5, %v1945_v43 }
 0x8c3   : > { %v2202_v9 = vpop.f32.mrf.mxu1 }
 0x8c4   : > { %v2228_v41 = vmul.f32 0.37796447, %v2202_v9 }
 0x8c6   : > { %v2230_v25 = vsel %vm358_vm5, %v2228_v41, -inf }
 0x8cb   : > { %v2305_v21 = vpop.f32.mrf.mxu1 }
 0x8cc   : > { %v2306_v57 = vadd.f32 %v2305_v21, %v3191_v10 }
 0x8ce   : > { %v2331_v46 = vmax.f32 %v2306_v57, 0.0 }
 0x8d0   : > { %v2335_v40 = vadd.f32 %v2331_v46, %v2988_v19 }
 0x8d2   : > { %2337 = vxpose.xlu2.b32.start.end [1/1] (short) (narrow) %v2335_v40, 8 }
 0x8e9   : > { %v2225_v23 = vpop.f32.mrf.mxu2 }
 0x8ea   : > { %v2229_v24 = vmul.f32 0.37796447, %v2225_v23 }
 0x8ec   : > { %v2231_v6 = vsel %vm358_vm5, %v2229_v24, -inf }
 0x8ed   : > { %v2232_v47 = vmax.f32 %v2230_v25, %v2231_v6 }
 0x8ef   : > { %v2233_v29 = vsub.f32 %v2228_v41, %v2232_v47  ;;  %v2234_v16 = vsub.f32 %v2229_v24, %v2232_v47 }
 0x8f1   : > { %v2235_v30 = vmul.f32 1.442695, %v2233_v29  ;;  %v2237_v26 = vmul.f32 1.442695, %v2234_v16  ;;  %v2328_v33 = vpop.f32.mrf.mxu2 }
 0x8f2   : > { %v2329_v35 = vadd.f32 %v2328_v33, %v3191_v10 }
 0x8f3   : > { %2880 = vpow2.f32 %v2235_v30 }
 0x8f4   : > { %2882 = vpow2.f32 %v2237_v26  ;;  %v2332_v45 = vmax.f32 %v2329_v35, 0.0 }
 0x8f6   : > { %v2336_v19 = vadd.f32 %v2332_v45, %v3009_v36 }
 0x8f8   : > { %2369 = vxpose.xlu1.b32.start.end [1/1] (short) (narrow) %v2336_v19, 8 }
 0x8f9   : > { %v2881_v37 = vpop.eup %2880 }
 0x8fa   : > { %v2883_v39 = vpop.eup %2882  ;;  %v2239_v38 = vsel %vm358_vm5, %v2881_v37, 0.0 }
 0x8fb   : > { %v2240_v59 = vsel %vm358_vm5, %v2883_v39, 0.0 }
 0x8fc   : > { %v2241_v48 = vadd.f32 %v2240_v59, %v2239_v38 }
 0x8fe   : > { %2884 = vrcp.f32 %v2241_v48  ;;  %v2253_v32 = vand.u32 2147483648, %v2241_v48  ;;  %v2251_v10 = vand.u32 2147483647, %v2241_v48  ;;  %vm2247_vm4 = vweird.f32 %v2241_v48 }
 0x900   : > { %v2254_v36 = vor.u32 1.1754944e-38, %v2253_v32  ;;  %vm2252_vm13 = vcmp.eq.f32.partialorder %v2251_v10, 8.507059e+37 }
 0x904   : > { %v2885_v14 = vpop.eup %2884 }
 0x905   : > { %v2243_v15 = vmul.f32 %v2885_v14, %v2241_v48  ;;  %vm2248_vm7 = vweird.f32 %v2885_v14 }
 0x906   : > { %vm2249_vm12 = vmor %vm2247_vm4, %vm2248_vm7 }
 0x907   : > { %v2244_v55 = vsub.f32 1.0, %v2243_v15 }
 0x909   : > { %v2245_v49 = vmul.f32 %v2885_v14, %v2244_v55 }
 0x90b   : > { %v2246_v28 = vadd.f32 %v2885_v14, %v2245_v49 }
 0x90d   : > { %v2250_v31 = vsel %vm2249_vm12, %v2885_v14, %v2246_v28 }
 0x90e   : > { %v2255_v50 = vsel %vm2252_vm13, %v2254_v36, %v2250_v31 }
 0x90f   : > { %v2257_v8 = vmul.f32 %v2883_v39, %v2255_v50  ;;  %v2256_v62 = vmul.f32 %v2881_v37, %v2255_v50 }
 0x96b   : > { %v2353_v53 = vpop.trf.xlu2 }
 0x96c   : > { %2781 = vmatmul.msk.f32.vlgmr.msra.gmra.mxu0 %vm358_vm5, %v2353_v53 }
 0x99c   : > { %v2385_v34 = vpop.trf.xlu1 }
 0x99d   : > { %2782 = vmatmul.msk.f32.gmra.mxu0 %vm358_vm5, %v2385_v34 }
 0x9e9   : > { %v2424_v0 = vpop.f32.mrf.mxu0 }
 0x9ea   : > { %2448 = vmatpush.msra.mxu1 %v2424_v0 }
 0x9eb   : > { %2783 = vmatmul.msk.f32.vlgmr.msra.gmra.mxu1 %vm358_vm5, %v2256_v62 }
 0xa1a   : > { %v2427_v51 = vpop.f32.mrf.mxu0 }
 0xa1b   : > { %2471 = vmatpush.msra.mxu2 %v2427_v51 }
 0xa1c   : > { %2784 = vmatmul.msk.f32.vlgmr.msra.gmra.mxu2 %vm358_vm5, %v2257_v8 }
 0xa68   : > { %v2450_v1 = vpop.f32.mrf.mxu1 }
 0xa69   : > { %v2451_v42 = vadd.f32 %v2450_v1, %v3249_v61 }
 0xa6b   : > { %v2476_v2 = vmax.f32 %v2451_v42, 0.0 }
 0xa6d   : > { %2478 = vxpose.xlu0.b32.start.end [1/1] (short) (narrow) %v2476_v2, 8 }
 0xa9f   : > { %v2473_v18 = vpop.f32.mrf.mxu2 }
 0xaa0   : > { %v2474_v56 = vadd.f32 %v2473_v18, %v3249_v61 }
 0xaa2   : > { %v2477_v58 = vmax.f32 %v2474_v56, 0.0 }
 0xaa4   : > { %2510 = vxpose.xlu2.b32.start.end [1/1] (short) (narrow) %v2477_v58, 8 }
 0xb11   : > { %v2494_v4 = vpop.trf.xlu0 }
 0xb12   : > { %v2542_v63 = vadd.f32 %v2494_v4, %v2335_v40 }
 0xb14   : > { %2785 = vmatmul.msk.f32.vlgmr.msrb.gmra.mxu3 %vm358_vm5, %v2542_v63 }
 0xb3d   : > { %v2526_v17 = vpop.trf.xlu2 }
 0xb3e   : > { %v2543_v7 = vadd.f32 %v2526_v17, %v2336_v19 }
 0xb40   : > { %2786 = vmatmul.msk.f32.gmra.mxu3 %vm358_vm5, %v2543_v7 }
 0xb97   : > { %v2567_v27 = vpop.f32.mrf.mxu3 }
 0xb98   : > { %2591 = vmatpush.msrb.mxu1 %v2567_v27 }
 0xb99   : > { %2787 = vmatmul.msk.f32.vlgmr.msrb.gmra.mxu1 %vm358_vm5, %v1854_v3 }
 0xbc3   : > { %v2570_v61 = vpop.f32.mrf.mxu3 }
 0xbc4   : > { %2614 = vmatpush.msrb.mxu2 %v2570_v61 }
 0xbc5   : > { %2788 = vmatmul.msk.f32.vlgmr.msrb.gmra.mxu2 %vm358_vm5, %v3410_v22 }
 0xc16   : > { %v2593_v44 = vpop.f32.mrf.mxu1 }
 0xc17   : > { %v2594_v11 = vadd.f32 %v2593_v44, %v3379_v52 }
 0xc19   : > { %v2619_v20 = vmax.f32 %v2594_v11, 0.0 }
 0xc1b   : > { %v2621_v12 = vadd.f32 %v2619_v20, %v2542_v63 }
 0xc1d   : > { %2624 = vst.msk [vmem:[%s3388_s8 + $0x8] sm:$0xff] %vm358_vm5, %v2621_v12 }
 0xc48   : > { %v2616_v13 = vpop.f32.mrf.mxu2 }
 0xc49   : > { %v2617_v60 = vadd.f32 %v2616_v13, %v3379_v52 }
 0xc4b   : > { %v2620_v43 = vmax.f32 %v2617_v60, 0.0 }
 0xc4d   : > { %v2622_v5 = vadd.f32 %v2620_v43, %v2543_v7 }
 0xc4f   : > { %2626 = vst.msk [vmem:[%s3388_s8 + $0x18] sm:$0xff] %vm358_vm5, %v2622_v5 }
 0xc50 PF: > { %s15_s18 = sadd.s32 1, %s2894_s18  }
 0xc51   : > { %p12_p4 = scmp.ge.s32.totalorder %s15_s18, 4  }
 0xc53   :  { %14 = sbr.rel (!%p12_p4) target bundleno = 1 (0x1), region = 79 }

</bundles_post_ra>
